<compile_context>
chip_gen: v6e
topology: v6e:2x2x1
jax: 0.10.0
libtpu: 0.0.40
codegen_flags: <defaults>
</compile_context>

<pallas_src>
import functools

import jax
import jax.numpy as jnp
from jax.experimental import pallas as pl
from jax.experimental.pallas import tpu as pltpu

# ----------------------------- model hyperparams -----------------------------
PATCH = 8        # patch size
DIM = 32         # hidden dim
HEADS = 4
DH = DIM // HEADS
MLP = 64
CLASS_NUM = 10
BLOCK = 4        # transformer depth
EPS = 1e-6

_LAYER_WEIGHTS = ("ln1_g", "ln1_b", "qkv_w", "qkv_b", "proj_w", "proj_b",
                  "ln2_g", "ln2_b", "fc1_w", "fc1_b", "fc2_w", "fc2_b")
_HEAD_WEIGHTS = ("lnf_g", "lnf_b", "bn_lin_w", "bn_lin_b",
                 "bn_g", "bn_b", "cls_w", "cls_b")


# ------------------------------ fused Pallas kernel ---------------------------
def _backbone_kernel(patches_ref, patch_w_ref, add_ref, *rest,
                     batch, tokens, depth, eps):
    (ln1_g, ln1_b, qkv_w, qkv_b, proj_w, proj_b,
     ln2_g, ln2_b, fc1_w, fc1_b, fc2_w, fc2_b,
     lnf_g, lnf_b, bn_lin_w, bn_lin_b, bn_g, bn_b, cls_w, cls_b,
     out_ref) = rest

    T = tokens
    scale = 1.0 / float(DH) ** 0.5

    def ln(x, g, b):
        mean = jnp.mean(x, axis=-1, keepdims=True)
        xc = x - mean
        var = jnp.mean(xc * xc, axis=-1, keepdims=True)
        return xc * jax.lax.rsqrt(var + eps) * g + b

    # --- patch embedding ------------------------------------------------------
    # cls rows are zero-padded in the wrapper; [cls] token, positional embedding
    # and the patch-embed bias are pre-folded into add_ref -> single matmul+add.
    h = jnp.dot(patches_ref[0], patch_w_ref[...],
                preferred_element_type=jnp.float32) + add_ref[...]   # (batch*T, DIM)

    # --- transformer blocks (unrolled; weights stay VMEM-resident) ------------
    for l in range(depth):
        y = ln(h, ln1_g[l], ln1_b[l])
        qkv = jnp.dot(y, qkv_w[l], preferred_element_type=jnp.float32) + qkv_b[l]

        attn_rows = []
        for b in range(batch):                             # per-image attention
            r0 = b * T
            q_all = qkv[r0:r0 + T, 0:DIM]
            k_all = qkv[r0:r0 + T, DIM:2 * DIM]
            v_all = qkv[r0:r0 + T, 2 * DIM:3 * DIM]
            heads = []
            for hd in range(HEADS):
                c0 = hd * DH
                q = q_all[:, c0:c0 + DH]
                k = k_all[:, c0:c0 + DH]
                v = v_all[:, c0:c0 + DH]
                s = jax.lax.dot_general(
                    q, k, (((1,), (1,)), ((), ())),
                    preferred_element_type=jnp.float32) * scale
                s = s - jnp.max(s, axis=-1, keepdims=True)
                p = jnp.exp(s)
                p = p * pl.reciprocal(jnp.sum(p, axis=-1, keepdims=True),
                                      approx=True)
                heads.append(jnp.dot(p, v, preferred_element_type=jnp.float32))
            attn_rows.append(jnp.concatenate(heads, axis=-1))
        attn = jnp.concatenate(attn_rows, axis=0)          # (batch*T, DIM)

        h = h + jnp.dot(attn, proj_w[l],
                        preferred_element_type=jnp.float32) + proj_b[l]

        y = ln(h, ln2_g[l], ln2_b[l])
        # TODO(synk): PyTorch nn.GELU defaults to exact erf; tanh approx is used here.
        y = jax.nn.gelu(jnp.dot(y, fc1_w[l],
                                preferred_element_type=jnp.float32) + fc1_b[l],
                        approximate=True)
        h = h + jnp.dot(y, fc2_w[l],
                        preferred_element_type=jnp.float32) + fc2_b[l]

    # --- final LN + ClassBlock head (Linear -> BN1d inference -> classifier) --
    h = ln(h, lnf_g[...], lnf_b[...])
    cls_rows = jnp.concatenate([h[b * T:b * T + 1, :] for b in range(batch)],
                               axis=0)                     # (batch, DIM)
    f = jnp.dot(cls_rows, bn_lin_w[...],
                preferred_element_type=jnp.float32) + bn_lin_b[...]
    f = f * bn_g[...] + bn_b[...]                          # BN1d, running stats 0/1
    logits = jnp.dot(f, cls_w[...],
                     preferred_element_type=jnp.float32) + cls_b[...]
    out_ref[0] = logits.astype(out_ref.dtype)


# ------------------------------ parameter setup ------------------------------
def init_params(key, in_chans, img_size, class_num, depth):
    num_patches = (img_size // PATCH) ** 2
    T = num_patches + 1
    cpp = in_chans * PATCH * PATCH
    ki = iter(jax.random.split(key, 16))

    def norm(shape, scale=0.02):
        return scale * jax.random.normal(next(ki), shape, dtype=jnp.float32)

    return {
        "patch_w": norm((cpp, DIM)),
        "patch_b": jnp.zeros((1, DIM), jnp.float32),
        "cls": norm((1, DIM)),
        "pos": norm((T, DIM)),
        # per-layer weights stacked on a leading depth axis
        "ln1_g": jnp.ones((depth, 1, DIM), jnp.float32),
        "ln1_b": jnp.zeros((depth, 1, DIM), jnp.float32),
        "qkv_w": norm((depth, DIM, 3 * DIM)),
        "qkv_b": jnp.zeros((depth, 1, 3 * DIM), jnp.float32),
        "proj_w": norm((depth, DIM, DIM)),
        "proj_b": jnp.zeros((depth, 1, DIM), jnp.float32),
        "ln2_g": jnp.ones((depth, 1, DIM), jnp.float32),
        "ln2_b": jnp.zeros((depth, 1, DIM), jnp.float32),
        "fc1_w": norm((depth, DIM, MLP)),
        "fc1_b": jnp.zeros((depth, 1, MLP), jnp.float32),
        "fc2_w": norm((depth, MLP, DIM)),
        "fc2_b": jnp.zeros((depth, 1, DIM), jnp.float32),
        "lnf_g": jnp.ones((1, DIM), jnp.float32),
        "lnf_b": jnp.zeros((1, DIM), jnp.float32),
        # ClassBlock head
        "bn_lin_w": norm((DIM, DIM)),
        "bn_lin_b": jnp.zeros((1, DIM), jnp.float32),
        "bn_g": jnp.ones((1, DIM), jnp.float32),
        "bn_b": jnp.zeros((1, DIM), jnp.float32),
        "cls_w": norm((DIM, class_num)),
        "cls_b": jnp.zeros((1, class_num), jnp.float32),
    }


# ------------------------------- model forward -------------------------------
@jax.jit
def transformer_forward(params, xs):
    """Fused ViT backbone + ClassBlock head. xs: (V, N, C, H, W) float32."""
    V, N, C, H, W = xs.shape
    gh, gw = H // PATCH, W // PATCH
    num_patches = gh * gw
    T = num_patches + 1
    cpp = C * PATCH * PATCH
    depth = params["qkv_w"].shape[0]
    class_num = params["cls_w"].shape[1]

    # NCHW -> per-view [rows, features] patch matrix (channel-major flatten,
    # matching PyTorch Conv2d(patch, stride=patch) flattened weights), with a
    # zero row inserted at each image's cls position.
    patches = (
        xs.reshape(V * N, C, gh, PATCH, gw, PATCH)
        .transpose(0, 2, 4, 1, 3, 5)
        .reshape(V, N, num_patches, cpp)
    )
    patches = jnp.concatenate(
        [jnp.zeros((V, N, 1, cpp), patches.dtype), patches], axis=2
    ).reshape(V, N * T, cpp)

    # Fold [cls] token + positional embedding + patch-embed bias into one
    # additive matrix so the kernel's patch embedding is a single matmul + add.
    add = jnp.concatenate(
        [params["cls"] + params["pos"][0:1],
         params["patch_b"] + params["pos"][1:]], axis=0)       # (T, DIM)
    add_full = jnp.tile(add, (N, 1))                            # (N*T, DIM)

    weights = ([params["patch_w"], add_full]
               + [params[n] for n in _LAYER_WEIGHTS + _HEAD_WEIGHTS])

    in_specs = [pl.BlockSpec((1, N * T, cpp), lambda v: (v, 0, 0))]
    for w in weights:  # full-array, grid-invariant blocks -> stay VMEM-resident
        in_specs.append(pl.BlockSpec(w.shape, lambda v, nd=w.ndim: (0,) * nd))

    kernel = functools.partial(
        _backbone_kernel, batch=N, tokens=T, depth=depth, eps=EPS)

    return pl.pallas_call(
        kernel,
        out_shape=jax.ShapeDtypeStruct((V, N, class_num), jnp.float32),
        grid=(V,),
        in_specs=in_specs,
        out_specs=pl.BlockSpec((1, N, class_num), lambda v: (v, 0, 0)),
        compiler_params=pltpu.CompilerParams(
            dimension_semantics=("parallel",)),   # views -> 2 TCs on v7x
    )(patches, *weights)


def two_view_net_forward(params, x1, x2):
    """Mirrors two_view_net.forward: shared model_1 applied to both views,
    executed in a single fused pass when both views are present."""
    views = [x for x in (x1, x2) if x is not None]
    if not views:
        return (None, None)
    logits = transformer_forward(params, jnp.stack(views, axis=0))
    out, idx = [], 0
    for x in (x1, x2):
        if x is None:
            out.append(None)
        else:
            out.append(logits[idx])
            idx += 1
    return tuple(out)


# ------------------------------------ main ------------------------------------
if __name__ == "__main__":
    key = jax.random.PRNGKey(0)
    k_p, k_x1, k_x2 = jax.random.split(key, 3)

    batch, chans, size = 2, 3, 16
    x1 = jax.random.normal(k_x1, (batch, chans, size, size), dtype=jnp.float32)
    x2 = jax.random.normal(k_x2, (batch, chans, size, size), dtype=jnp.float32)

    params = init_params(k_p, chans, size, CLASS_NUM, BLOCK)

    y1, y2 = two_view_net_forward(params, x1, x2)
    y1 = jax.block_until_ready(y1)
    y2 = jax.block_until_ready(y2)

    assert y1.shape == (batch, CLASS_NUM) and y2.shape == (batch, CLASS_NUM)
    assert jnp.all(jnp.isfinite(y1)) and jnp.all(jnp.isfinite(y2))
    print("KERNEL_OK")
</pallas_src>

<mosaic_0001>
module attributes {stable_mosaic.version = 11 : i64} {
  func.func @_backbone_kernel(%arg0: i32, %arg1: memref<1x10x192xf32, #tpu.memory_space<vmem>>, %arg2: memref<192x32xf32, #tpu.memory_space<vmem>>, %arg3: memref<10x32xf32, #tpu.memory_space<vmem>>, %arg4: memref<4x1x32xf32, #tpu.memory_space<vmem>>, %arg5: memref<4x1x32xf32, #tpu.memory_space<vmem>>, %arg6: memref<4x32x96xf32, #tpu.memory_space<vmem>>, %arg7: memref<4x1x96xf32, #tpu.memory_space<vmem>>, %arg8: memref<4x32x32xf32, #tpu.memory_space<vmem>>, %arg9: memref<4x1x32xf32, #tpu.memory_space<vmem>>, %arg10: memref<4x1x32xf32, #tpu.memory_space<vmem>>, %arg11: memref<4x1x32xf32, #tpu.memory_space<vmem>>, %arg12: memref<4x32x64xf32, #tpu.memory_space<vmem>>, %arg13: memref<4x1x64xf32, #tpu.memory_space<vmem>>, %arg14: memref<4x64x32xf32, #tpu.memory_space<vmem>>, %arg15: memref<4x1x32xf32, #tpu.memory_space<vmem>>, %arg16: memref<1x32xf32, #tpu.memory_space<vmem>>, %arg17: memref<1x32xf32, #tpu.memory_space<vmem>>, %arg18: memref<32x32xf32, #tpu.memory_space<vmem>>, %arg19: memref<1x32xf32, #tpu.memory_space<vmem>>, %arg20: memref<1x32xf32, #tpu.memory_space<vmem>>, %arg21: memref<1x32xf32, #tpu.memory_space<vmem>>, %arg22: memref<32x10xf32, #tpu.memory_space<vmem>>, %arg23: memref<1x10xf32, #tpu.memory_space<vmem>>, %arg24: memref<1x2x10xf32, #tpu.memory_space<vmem>>) attributes {dimension_semantics = [#tpu.dimension_semantics<parallel>], iteration_bounds = array<i64: 2>, scalar_prefetch = 0 : i64, scratch_operands = 0 : i64, tpu.core_type = #tpu.core_type<tc>, window_params = [{transform_indices = @transform_0, window_bounds = array<i64: 1, 10, 192>}, {pipeline_mode = #tpu.pipeline_mode<synchronous>, transform_indices = @transform_1, window_bounds = array<i64: 192, 32>}, {pipeline_mode = #tpu.pipeline_mode<synchronous>, transform_indices = @transform_2, window_bounds = array<i64: 10, 32>}, {pipeline_mode = #tpu.pipeline_mode<synchronous>, transform_indices = @transform_3, window_bounds = array<i64: 4, 1, 32>}, {pipeline_mode = #tpu.pipeline_mode<synchronous>, transform_indices = @transform_4, window_bounds = array<i64: 4, 1, 32>}, {pipeline_mode = #tpu.pipeline_mode<synchronous>, transform_indices = @transform_5, window_bounds = array<i64: 4, 32, 96>}, {pipeline_mode = #tpu.pipeline_mode<synchronous>, transform_indices = @transform_6, window_bounds = array<i64: 4, 1, 96>}, {pipeline_mode = #tpu.pipeline_mode<synchronous>, transform_indices = @transform_7, window_bounds = array<i64: 4, 32, 32>}, {pipeline_mode = #tpu.pipeline_mode<synchronous>, transform_indices = @transform_8, window_bounds = array<i64: 4, 1, 32>}, {pipeline_mode = #tpu.pipeline_mode<synchronous>, transform_indices = @transform_9, window_bounds = array<i64: 4, 1, 32>}, {pipeline_mode = #tpu.pipeline_mode<synchronous>, transform_indices = @transform_10, window_bounds = array<i64: 4, 1, 32>}, {pipeline_mode = #tpu.pipeline_mode<synchronous>, transform_indices = @transform_11, window_bounds = array<i64: 4, 32, 64>}, {pipeline_mode = #tpu.pipeline_mode<synchronous>, transform_indices = @transform_12, window_bounds = array<i64: 4, 1, 64>}, {pipeline_mode = #tpu.pipeline_mode<synchronous>, transform_indices = @transform_13, window_bounds = array<i64: 4, 64, 32>}, {pipeline_mode = #tpu.pipeline_mode<synchronous>, transform_indices = @transform_14, window_bounds = array<i64: 4, 1, 32>}, {pipeline_mode = #tpu.pipeline_mode<synchronous>, transform_indices = @transform_15, window_bounds = array<i64: 1, 32>}, {pipeline_mode = #tpu.pipeline_mode<synchronous>, transform_indices = @transform_16, window_bounds = array<i64: 1, 32>}, {pipeline_mode = #tpu.pipeline_mode<synchronous>, transform_indices = @transform_17, window_bounds = array<i64: 32, 32>}, {pipeline_mode = #tpu.pipeline_mode<synchronous>, transform_indices = @transform_18, window_bounds = array<i64: 1, 32>}, {pipeline_mode = #tpu.pipeline_mode<synchronous>, transform_indices = @transform_19, window_bounds = array<i64: 1, 32>}, {pipeline_mode = #tpu.pipeline_mode<synchronous>, transform_indices = @transform_20, window_bounds = array<i64: 1, 32>}, {pipeline_mode = #tpu.pipeline_mode<synchronous>, transform_indices = @transform_21, window_bounds = array<i64: 32, 10>}, {pipeline_mode = #tpu.pipeline_mode<synchronous>, transform_indices = @transform_22, window_bounds = array<i64: 1, 10>}, {transform_indices = @transform_23, window_bounds = array<i64: 1, 2, 10>}]} {
    %c0 = arith.constant 0 : index
    %c0_0 = arith.constant 0 : index
    %c0_1 = arith.constant 0 : index
    %0 = vector.load %arg1[%c0, %c0_0, %c0_1] : memref<1x10x192xf32, #tpu.memory_space<vmem>>, vector<1x10x192xf32>
    %1 = vector.shape_cast %0 : vector<1x10x192xf32> to vector<10x192xf32>
    %c0_2 = arith.constant 0 : index
    %c0_3 = arith.constant 0 : index
    %2 = vector.load %arg2[%c0_2, %c0_3] : memref<192x32xf32, #tpu.memory_space<vmem>>, vector<192x32xf32>
    %cst = arith.constant dense<0.000000e+00> : vector<10x32xf32>
    %3 = tpu.matmul %1, %2, %cst {dimension_numbers = #tpu.dot_dimension_numbers<[1], [0], [0], [1], [0, 0, 1, 1], [], []>} : vector<10x192xf32>, vector<192x32xf32>, vector<10x32xf32> -> vector<10x32xf32>
    %c0_4 = arith.constant 0 : index
    %c0_5 = arith.constant 0 : index
    %4 = vector.load %arg3[%c0_4, %c0_5] : memref<10x32xf32, #tpu.memory_space<vmem>>, vector<10x32xf32>
    %5 = arith.addf %3, %4 : vector<10x32xf32>
    %c0_6 = arith.constant 0 : index
    %c0_7 = arith.constant 0 : index
    %c0_8 = arith.constant 0 : index
    %6 = vector.load %arg4[%c0_6, %c0_7, %c0_8] : memref<4x1x32xf32, #tpu.memory_space<vmem>>, vector<1x1x32xf32>
    %7 = vector.shape_cast %6 : vector<1x1x32xf32> to vector<1x32xf32>
    %c0_9 = arith.constant 0 : index
    %c0_10 = arith.constant 0 : index
    %c0_11 = arith.constant 0 : index
    %8 = vector.load %arg5[%c0_9, %c0_10, %c0_11] : memref<4x1x32xf32, #tpu.memory_space<vmem>>, vector<1x1x32xf32>
    %9 = vector.shape_cast %8 : vector<1x1x32xf32> to vector<1x32xf32>
    %cst_12 = arith.constant dense<0.000000e+00> : vector<10xf32>
    %10 = vector.multi_reduction <add>, %5, %cst_12 [1] : vector<10x32xf32> to vector<10xf32>
    %11 = vector.shape_cast %10 : vector<10xf32> to vector<10x1xf32>
    %cst_13 = arith.constant 3.200000e+01 : f32
    %12 = vector.broadcast %cst_13 : f32 to vector<10x1xf32>
    %13 = arith.divf %11, %12 : vector<10x1xf32>
    %14 = vector.broadcast %13 : vector<10x1xf32> to vector<10x32xf32>
    %15 = arith.subf %5, %14 : vector<10x32xf32>
    %16 = arith.mulf %15, %15 : vector<10x32xf32>
    %cst_14 = arith.constant dense<0.000000e+00> : vector<10xf32>
    %17 = vector.multi_reduction <add>, %16, %cst_14 [1] : vector<10x32xf32> to vector<10xf32>
    %18 = vector.shape_cast %17 : vector<10xf32> to vector<10x1xf32>
    %cst_15 = arith.constant 3.200000e+01 : f32
    %19 = vector.broadcast %cst_15 : f32 to vector<10x1xf32>
    %20 = arith.divf %18, %19 : vector<10x1xf32>
    %cst_16 = arith.constant 9.99999997E-7 : f32
    %21 = vector.broadcast %cst_16 : f32 to vector<10x1xf32>
    %22 = arith.addf %20, %21 : vector<10x1xf32>
    %23 = math.rsqrt %22 : vector<10x1xf32>
    %24 = vector.broadcast %23 : vector<10x1xf32> to vector<10x32xf32>
    %25 = arith.mulf %15, %24 : vector<10x32xf32>
    %26 = vector.broadcast %7 : vector<1x32xf32> to vector<10x32xf32>
    %27 = arith.mulf %25, %26 : vector<10x32xf32>
    %28 = vector.broadcast %9 : vector<1x32xf32> to vector<10x32xf32>
    %29 = arith.addf %27, %28 : vector<10x32xf32>
    %c0_17 = arith.constant 0 : index
    %c0_18 = arith.constant 0 : index
    %c0_19 = arith.constant 0 : index
    %30 = vector.load %arg6[%c0_17, %c0_18, %c0_19] : memref<4x32x96xf32, #tpu.memory_space<vmem>>, vector<1x32x96xf32>
    %31 = vector.shape_cast %30 : vector<1x32x96xf32> to vector<32x96xf32>
    %cst_20 = arith.constant dense<0.000000e+00> : vector<10x96xf32>
    %32 = tpu.matmul %29, %31, %cst_20 {dimension_numbers = #tpu.dot_dimension_numbers<[1], [0], [0], [1], [0, 0, 1, 1], [], []>} : vector<10x32xf32>, vector<32x96xf32>, vector<10x96xf32> -> vector<10x96xf32>
    %c0_21 = arith.constant 0 : index
    %c0_22 = arith.constant 0 : index
    %c0_23 = arith.constant 0 : index
    %33 = vector.load %arg7[%c0_21, %c0_22, %c0_23] : memref<4x1x96xf32, #tpu.memory_space<vmem>>, vector<1x1x96xf32>
    %34 = vector.shape_cast %33 : vector<1x1x96xf32> to vector<1x96xf32>
    %35 = vector.broadcast %34 : vector<1x96xf32> to vector<10x96xf32>
    %36 = arith.addf %32, %35 : vector<10x96xf32>
    %37 = vector.extract_strided_slice %36 {offsets = [0, 0], sizes = [5, 32], strides = [1, 1]} : vector<10x96xf32> to vector<5x32xf32>
    %38 = vector.extract_strided_slice %36 {offsets = [0, 32], sizes = [5, 32], strides = [1, 1]} : vector<10x96xf32> to vector<5x32xf32>
    %39 = vector.extract_strided_slice %36 {offsets = [0, 64], sizes = [5, 32], strides = [1, 1]} : vector<10x96xf32> to vector<5x32xf32>
    %40 = vector.extract_strided_slice %37 {offsets = [0, 0], sizes = [5, 8], strides = [1, 1]} : vector<5x32xf32> to vector<5x8xf32>
    %41 = vector.extract_strided_slice %38 {offsets = [0, 0], sizes = [5, 8], strides = [1, 1]} : vector<5x32xf32> to vector<5x8xf32>
    %42 = vector.extract_strided_slice %39 {offsets = [0, 0], sizes = [5, 8], strides = [1, 1]} : vector<5x32xf32> to vector<5x8xf32>
    %cst_24 = arith.constant dense<0.000000e+00> : vector<5x5xf32>
    %43 = tpu.matmul %40, %41, %cst_24 {dimension_numbers = #tpu.dot_dimension_numbers<[1], [1], [0], [0], [0, 0, 1, 0], [], []>} : vector<5x8xf32>, vector<5x8xf32>, vector<5x5xf32> -> vector<5x5xf32>
    %cst_25 = arith.constant 0.353553385 : f32
    %44 = vector.broadcast %cst_25 : f32 to vector<5x5xf32>
    %45 = arith.mulf %43, %44 : vector<5x5xf32>
    %cst_26 = arith.constant dense<0xFF800000> : vector<5xf32>
    %46 = vector.multi_reduction <maximumf>, %45, %cst_26 [1] : vector<5x5xf32> to vector<5xf32>
    %47 = vector.shape_cast %46 : vector<5xf32> to vector<5x1xf32>
    %48 = vector.broadcast %47 : vector<5x1xf32> to vector<5x5xf32>
    %49 = arith.subf %45, %48 : vector<5x5xf32>
    %50 = math.exp %49 : vector<5x5xf32>
    %cst_27 = arith.constant dense<0.000000e+00> : vector<5xf32>
    %51 = vector.multi_reduction <add>, %50, %cst_27 [1] : vector<5x5xf32> to vector<5xf32>
    %52 = vector.shape_cast %51 : vector<5xf32> to vector<5x1xf32>
    %53 = tpu.reciprocal %52 {approx = true} : vector<5x1xf32> -> vector<5x1xf32>
    %54 = vector.broadcast %53 : vector<5x1xf32> to vector<5x5xf32>
    %55 = arith.mulf %50, %54 : vector<5x5xf32>
    %cst_28 = arith.constant dense<0.000000e+00> : vector<5x8xf32>
    %56 = tpu.matmul %55, %42, %cst_28 {dimension_numbers = #tpu.dot_dimension_numbers<[1], [0], [0], [1], [0, 0, 1, 1], [], []>} : vector<5x5xf32>, vector<5x8xf32>, vector<5x8xf32> -> vector<5x8xf32>
    %57 = vector.extract_strided_slice %37 {offsets = [0, 8], sizes = [5, 8], strides = [1, 1]} : vector<5x32xf32> to vector<5x8xf32>
    %58 = vector.extract_strided_slice %38 {offsets = [0, 8], sizes = [5, 8], strides = [1, 1]} : vector<5x32xf32> to vector<5x8xf32>
    %59 = vector.extract_strided_slice %39 {offsets = [0, 8], sizes = [5, 8], strides = [1, 1]} : vector<5x32xf32> to vector<5x8xf32>
    %cst_29 = arith.constant dense<0.000000e+00> : vector<5x5xf32>
    %60 = tpu.matmul %57, %58, %cst_29 {dimension_numbers = #tpu.dot_dimension_numbers<[1], [1], [0], [0], [0, 0, 1, 0], [], []>} : vector<5x8xf32>, vector<5x8xf32>, vector<5x5xf32> -> vector<5x5xf32>
    %cst_30 = arith.constant 0.353553385 : f32
    %61 = vector.broadcast %cst_30 : f32 to vector<5x5xf32>
    %62 = arith.mulf %60, %61 : vector<5x5xf32>
    %cst_31 = arith.constant dense<0xFF800000> : vector<5xf32>
    %63 = vector.multi_reduction <maximumf>, %62, %cst_31 [1] : vector<5x5xf32> to vector<5xf32>
    %64 = vector.shape_cast %63 : vector<5xf32> to vector<5x1xf32>
    %65 = vector.broadcast %64 : vector<5x1xf32> to vector<5x5xf32>
    %66 = arith.subf %62, %65 : vector<5x5xf32>
    %67 = math.exp %66 : vector<5x5xf32>
    %cst_32 = arith.constant dense<0.000000e+00> : vector<5xf32>
    %68 = vector.multi_reduction <add>, %67, %cst_32 [1] : vector<5x5xf32> to vector<5xf32>
    %69 = vector.shape_cast %68 : vector<5xf32> to vector<5x1xf32>
    %70 = tpu.reciprocal %69 {approx = true} : vector<5x1xf32> -> vector<5x1xf32>
    %71 = vector.broadcast %70 : vector<5x1xf32> to vector<5x5xf32>
    %72 = arith.mulf %67, %71 : vector<5x5xf32>
    %cst_33 = arith.constant dense<0.000000e+00> : vector<5x8xf32>
    %73 = tpu.matmul %72, %59, %cst_33 {dimension_numbers = #tpu.dot_dimension_numbers<[1], [0], [0], [1], [0, 0, 1, 1], [], []>} : vector<5x5xf32>, vector<5x8xf32>, vector<5x8xf32> -> vector<5x8xf32>
    %74 = vector.extract_strided_slice %37 {offsets = [0, 16], sizes = [5, 8], strides = [1, 1]} : vector<5x32xf32> to vector<5x8xf32>
    %75 = vector.extract_strided_slice %38 {offsets = [0, 16], sizes = [5, 8], strides = [1, 1]} : vector<5x32xf32> to vector<5x8xf32>
    %76 = vector.extract_strided_slice %39 {offsets = [0, 16], sizes = [5, 8], strides = [1, 1]} : vector<5x32xf32> to vector<5x8xf32>
    %cst_34 = arith.constant dense<0.000000e+00> : vector<5x5xf32>
    %77 = tpu.matmul %74, %75, %cst_34 {dimension_numbers = #tpu.dot_dimension_numbers<[1], [1], [0], [0], [0, 0, 1, 0], [], []>} : vector<5x8xf32>, vector<5x8xf32>, vector<5x5xf32> -> vector<5x5xf32>
    %cst_35 = arith.constant 0.353553385 : f32
    %78 = vector.broadcast %cst_35 : f32 to vector<5x5xf32>
    %79 = arith.mulf %77, %78 : vector<5x5xf32>
    %cst_36 = arith.constant dense<0xFF800000> : vector<5xf32>
    %80 = vector.multi_reduction <maximumf>, %79, %cst_36 [1] : vector<5x5xf32> to vector<5xf32>
    %81 = vector.shape_cast %80 : vector<5xf32> to vector<5x1xf32>
    %82 = vector.broadcast %81 : vector<5x1xf32> to vector<5x5xf32>
    %83 = arith.subf %79, %82 : vector<5x5xf32>
    %84 = math.exp %83 : vector<5x5xf32>
    %cst_37 = arith.constant dense<0.000000e+00> : vector<5xf32>
    %85 = vector.multi_reduction <add>, %84, %cst_37 [1] : vector<5x5xf32> to vector<5xf32>
    %86 = vector.shape_cast %85 : vector<5xf32> to vector<5x1xf32>
    %87 = tpu.reciprocal %86 {approx = true} : vector<5x1xf32> -> vector<5x1xf32>
    %88 = vector.broadcast %87 : vector<5x1xf32> to vector<5x5xf32>
    %89 = arith.mulf %84, %88 : vector<5x5xf32>
    %cst_38 = arith.constant dense<0.000000e+00> : vector<5x8xf32>
    %90 = tpu.matmul %89, %76, %cst_38 {dimension_numbers = #tpu.dot_dimension_numbers<[1], [0], [0], [1], [0, 0, 1, 1], [], []>} : vector<5x5xf32>, vector<5x8xf32>, vector<5x8xf32> -> vector<5x8xf32>
    %91 = vector.extract_strided_slice %37 {offsets = [0, 24], sizes = [5, 8], strides = [1, 1]} : vector<5x32xf32> to vector<5x8xf32>
    %92 = vector.extract_strided_slice %38 {offsets = [0, 24], sizes = [5, 8], strides = [1, 1]} : vector<5x32xf32> to vector<5x8xf32>
    %93 = vector.extract_strided_slice %39 {offsets = [0, 24], sizes = [5, 8], strides = [1, 1]} : vector<5x32xf32> to vector<5x8xf32>
    %cst_39 = arith.constant dense<0.000000e+00> : vector<5x5xf32>
    %94 = tpu.matmul %91, %92, %cst_39 {dimension_numbers = #tpu.dot_dimension_numbers<[1], [1], [0], [0], [0, 0, 1, 0], [], []>} : vector<5x8xf32>, vector<5x8xf32>, vector<5x5xf32> -> vector<5x5xf32>
    %cst_40 = arith.constant 0.353553385 : f32
    %95 = vector.broadcast %cst_40 : f32 to vector<5x5xf32>
    %96 = arith.mulf %94, %95 : vector<5x5xf32>
    %cst_41 = arith.constant dense<0xFF800000> : vector<5xf32>
    %97 = vector.multi_reduction <maximumf>, %96, %cst_41 [1] : vector<5x5xf32> to vector<5xf32>
    %98 = vector.shape_cast %97 : vector<5xf32> to vector<5x1xf32>
    %99 = vector.broadcast %98 : vector<5x1xf32> to vector<5x5xf32>
    %100 = arith.subf %96, %99 : vector<5x5xf32>
    %101 = math.exp %100 : vector<5x5xf32>
    %cst_42 = arith.constant dense<0.000000e+00> : vector<5xf32>
    %102 = vector.multi_reduction <add>, %101, %cst_42 [1] : vector<5x5xf32> to vector<5xf32>
    %103 = vector.shape_cast %102 : vector<5xf32> to vector<5x1xf32>
    %104 = tpu.reciprocal %103 {approx = true} : vector<5x1xf32> -> vector<5x1xf32>
    %105 = vector.broadcast %104 : vector<5x1xf32> to vector<5x5xf32>
    %106 = arith.mulf %101, %105 : vector<5x5xf32>
    %cst_43 = arith.constant dense<0.000000e+00> : vector<5x8xf32>
    %107 = tpu.matmul %106, %93, %cst_43 {dimension_numbers = #tpu.dot_dimension_numbers<[1], [0], [0], [1], [0, 0, 1, 1], [], []>} : vector<5x5xf32>, vector<5x8xf32>, vector<5x8xf32> -> vector<5x8xf32>
    %108 = tpu.concatenate %56, %73, %90, %107 in 1 : vector<5x8xf32>, vector<5x8xf32>, vector<5x8xf32>, vector<5x8xf32> -> vector<5x32xf32>
    %109 = vector.extract_strided_slice %36 {offsets = [5, 0], sizes = [5, 32], strides = [1, 1]} : vector<10x96xf32> to vector<5x32xf32>
    %110 = vector.extract_strided_slice %36 {offsets = [5, 32], sizes = [5, 32], strides = [1, 1]} : vector<10x96xf32> to vector<5x32xf32>
    %111 = vector.extract_strided_slice %36 {offsets = [5, 64], sizes = [5, 32], strides = [1, 1]} : vector<10x96xf32> to vector<5x32xf32>
    %112 = vector.extract_strided_slice %109 {offsets = [0, 0], sizes = [5, 8], strides = [1, 1]} : vector<5x32xf32> to vector<5x8xf32>
    %113 = vector.extract_strided_slice %110 {offsets = [0, 0], sizes = [5, 8], strides = [1, 1]} : vector<5x32xf32> to vector<5x8xf32>
    %114 = vector.extract_strided_slice %111 {offsets = [0, 0], sizes = [5, 8], strides = [1, 1]} : vector<5x32xf32> to vector<5x8xf32>
    %cst_44 = arith.constant dense<0.000000e+00> : vector<5x5xf32>
    %115 = tpu.matmul %112, %113, %cst_44 {dimension_numbers = #tpu.dot_dimension_numbers<[1], [1], [0], [0], [0, 0, 1, 0], [], []>} : vector<5x8xf32>, vector<5x8xf32>, vector<5x5xf32> -> vector<5x5xf32>
    %cst_45 = arith.constant 0.353553385 : f32
    %116 = vector.broadcast %cst_45 : f32 to vector<5x5xf32>
    %117 = arith.mulf %115, %116 : vector<5x5xf32>
    %cst_46 = arith.constant dense<0xFF800000> : vector<5xf32>
    %118 = vector.multi_reduction <maximumf>, %117, %cst_46 [1] : vector<5x5xf32> to vector<5xf32>
    %119 = vector.shape_cast %118 : vector<5xf32> to vector<5x1xf32>
    %120 = vector.broadcast %119 : vector<5x1xf32> to vector<5x5xf32>
    %121 = arith.subf %117, %120 : vector<5x5xf32>
    %122 = math.exp %121 : vector<5x5xf32>
    %cst_47 = arith.constant dense<0.000000e+00> : vector<5xf32>
    %123 = vector.multi_reduction <add>, %122, %cst_47 [1] : vector<5x5xf32> to vector<5xf32>
    %124 = vector.shape_cast %123 : vector<5xf32> to vector<5x1xf32>
    %125 = tpu.reciprocal %124 {approx = true} : vector<5x1xf32> -> vector<5x1xf32>
    %126 = vector.broadcast %125 : vector<5x1xf32> to vector<5x5xf32>
    %127 = arith.mulf %122, %126 : vector<5x5xf32>
    %cst_48 = arith.constant dense<0.000000e+00> : vector<5x8xf32>
    %128 = tpu.matmul %127, %114, %cst_48 {dimension_numbers = #tpu.dot_dimension_numbers<[1], [0], [0], [1], [0, 0, 1, 1], [], []>} : vector<5x5xf32>, vector<5x8xf32>, vector<5x8xf32> -> vector<5x8xf32>
    %129 = vector.extract_strided_slice %109 {offsets = [0, 8], sizes = [5, 8], strides = [1, 1]} : vector<5x32xf32> to vector<5x8xf32>
    %130 = vector.extract_strided_slice %110 {offsets = [0, 8], sizes = [5, 8], strides = [1, 1]} : vector<5x32xf32> to vector<5x8xf32>
    %131 = vector.extract_strided_slice %111 {offsets = [0, 8], sizes = [5, 8], strides = [1, 1]} : vector<5x32xf32> to vector<5x8xf32>
    %cst_49 = arith.constant dense<0.000000e+00> : vector<5x5xf32>
    %132 = tpu.matmul %129, %130, %cst_49 {dimension_numbers = #tpu.dot_dimension_numbers<[1], [1], [0], [0], [0, 0, 1, 0], [], []>} : vector<5x8xf32>, vector<5x8xf32>, vector<5x5xf32> -> vector<5x5xf32>
    %cst_50 = arith.constant 0.353553385 : f32
    %133 = vector.broadcast %cst_50 : f32 to vector<5x5xf32>
    %134 = arith.mulf %132, %133 : vector<5x5xf32>
    %cst_51 = arith.constant dense<0xFF800000> : vector<5xf32>
    %135 = vector.multi_reduction <maximumf>, %134, %cst_51 [1] : vector<5x5xf32> to vector<5xf32>
    %136 = vector.shape_cast %135 : vector<5xf32> to vector<5x1xf32>
    %137 = vector.broadcast %136 : vector<5x1xf32> to vector<5x5xf32>
    %138 = arith.subf %134, %137 : vector<5x5xf32>
    %139 = math.exp %138 : vector<5x5xf32>
    %cst_52 = arith.constant dense<0.000000e+00> : vector<5xf32>
    %140 = vector.multi_reduction <add>, %139, %cst_52 [1] : vector<5x5xf32> to vector<5xf32>
    %141 = vector.shape_cast %140 : vector<5xf32> to vector<5x1xf32>
    %142 = tpu.reciprocal %141 {approx = true} : vector<5x1xf32> -> vector<5x1xf32>
    %143 = vector.broadcast %142 : vector<5x1xf32> to vector<5x5xf32>
    %144 = arith.mulf %139, %143 : vector<5x5xf32>
    %cst_53 = arith.constant dense<0.000000e+00> : vector<5x8xf32>
    %145 = tpu.matmul %144, %131, %cst_53 {dimension_numbers = #tpu.dot_dimension_numbers<[1], [0], [0], [1], [0, 0, 1, 1], [], []>} : vector<5x5xf32>, vector<5x8xf32>, vector<5x8xf32> -> vector<5x8xf32>
    %146 = vector.extract_strided_slice %109 {offsets = [0, 16], sizes = [5, 8], strides = [1, 1]} : vector<5x32xf32> to vector<5x8xf32>
    %147 = vector.extract_strided_slice %110 {offsets = [0, 16], sizes = [5, 8], strides = [1, 1]} : vector<5x32xf32> to vector<5x8xf32>
    %148 = vector.extract_strided_slice %111 {offsets = [0, 16], sizes = [5, 8], strides = [1, 1]} : vector<5x32xf32> to vector<5x8xf32>
    %cst_54 = arith.constant dense<0.000000e+00> : vector<5x5xf32>
    %149 = tpu.matmul %146, %147, %cst_54 {dimension_numbers = #tpu.dot_dimension_numbers<[1], [1], [0], [0], [0, 0, 1, 0], [], []>} : vector<5x8xf32>, vector<5x8xf32>, vector<5x5xf32> -> vector<5x5xf32>
    %cst_55 = arith.constant 0.353553385 : f32
    %150 = vector.broadcast %cst_55 : f32 to vector<5x5xf32>
    %151 = arith.mulf %149, %150 : vector<5x5xf32>
    %cst_56 = arith.constant dense<0xFF800000> : vector<5xf32>
    %152 = vector.multi_reduction <maximumf>, %151, %cst_56 [1] : vector<5x5xf32> to vector<5xf32>
    %153 = vector.shape_cast %152 : vector<5xf32> to vector<5x1xf32>
    %154 = vector.broadcast %153 : vector<5x1xf32> to vector<5x5xf32>
    %155 = arith.subf %151, %154 : vector<5x5xf32>
    %156 = math.exp %155 : vector<5x5xf32>
    %cst_57 = arith.constant dense<0.000000e+00> : vector<5xf32>
    %157 = vector.multi_reduction <add>, %156, %cst_57 [1] : vector<5x5xf32> to vector<5xf32>
    %158 = vector.shape_cast %157 : vector<5xf32> to vector<5x1xf32>
    %159 = tpu.reciprocal %158 {approx = true} : vector<5x1xf32> -> vector<5x1xf32>
    %160 = vector.broadcast %159 : vector<5x1xf32> to vector<5x5xf32>
    %161 = arith.mulf %156, %160 : vector<5x5xf32>
    %cst_58 = arith.constant dense<0.000000e+00> : vector<5x8xf32>
    %162 = tpu.matmul %161, %148, %cst_58 {dimension_numbers = #tpu.dot_dimension_numbers<[1], [0], [0], [1], [0, 0, 1, 1], [], []>} : vector<5x5xf32>, vector<5x8xf32>, vector<5x8xf32> -> vector<5x8xf32>
    %163 = vector.extract_strided_slice %109 {offsets = [0, 24], sizes = [5, 8], strides = [1, 1]} : vector<5x32xf32> to vector<5x8xf32>
    %164 = vector.extract_strided_slice %110 {offsets = [0, 24], sizes = [5, 8], strides = [1, 1]} : vector<5x32xf32> to vector<5x8xf32>
    %165 = vector.extract_strided_slice %111 {offsets = [0, 24], sizes = [5, 8], strides = [1, 1]} : vector<5x32xf32> to vector<5x8xf32>
    %cst_59 = arith.constant dense<0.000000e+00> : vector<5x5xf32>
    %166 = tpu.matmul %163, %164, %cst_59 {dimension_numbers = #tpu.dot_dimension_numbers<[1], [1], [0], [0], [0, 0, 1, 0], [], []>} : vector<5x8xf32>, vector<5x8xf32>, vector<5x5xf32> -> vector<5x5xf32>
    %cst_60 = arith.constant 0.353553385 : f32
    %167 = vector.broadcast %cst_60 : f32 to vector<5x5xf32>
    %168 = arith.mulf %166, %167 : vector<5x5xf32>
    %cst_61 = arith.constant dense<0xFF800000> : vector<5xf32>
    %169 = vector.multi_reduction <maximumf>, %168, %cst_61 [1] : vector<5x5xf32> to vector<5xf32>
    %170 = vector.shape_cast %169 : vector<5xf32> to vector<5x1xf32>
    %171 = vector.broadcast %170 : vector<5x1xf32> to vector<5x5xf32>
    %172 = arith.subf %168, %171 : vector<5x5xf32>
    %173 = math.exp %172 : vector<5x5xf32>
    %cst_62 = arith.constant dense<0.000000e+00> : vector<5xf32>
    %174 = vector.multi_reduction <add>, %173, %cst_62 [1] : vector<5x5xf32> to vector<5xf32>
    %175 = vector.shape_cast %174 : vector<5xf32> to vector<5x1xf32>
    %176 = tpu.reciprocal %175 {approx = true} : vector<5x1xf32> -> vector<5x1xf32>
    %177 = vector.broadcast %176 : vector<5x1xf32> to vector<5x5xf32>
    %178 = arith.mulf %173, %177 : vector<5x5xf32>
    %cst_63 = arith.constant dense<0.000000e+00> : vector<5x8xf32>
    %179 = tpu.matmul %178, %165, %cst_63 {dimension_numbers = #tpu.dot_dimension_numbers<[1], [0], [0], [1], [0, 0, 1, 1], [], []>} : vector<5x5xf32>, vector<5x8xf32>, vector<5x8xf32> -> vector<5x8xf32>
    %180 = tpu.concatenate %128, %145, %162, %179 in 1 : vector<5x8xf32>, vector<5x8xf32>, vector<5x8xf32>, vector<5x8xf32> -> vector<5x32xf32>
    %181 = tpu.concatenate %108, %180 in 0 : vector<5x32xf32>, vector<5x32xf32> -> vector<10x32xf32>
    %c0_64 = arith.constant 0 : index
    %c0_65 = arith.constant 0 : index
    %c0_66 = arith.constant 0 : index
    %182 = vector.load %arg8[%c0_64, %c0_65, %c0_66] : memref<4x32x32xf32, #tpu.memory_space<vmem>>, vector<1x32x32xf32>
    %183 = vector.shape_cast %182 : vector<1x32x32xf32> to vector<32x32xf32>
    %cst_67 = arith.constant dense<0.000000e+00> : vector<10x32xf32>
    %184 = tpu.matmul %181, %183, %cst_67 {dimension_numbers = #tpu.dot_dimension_numbers<[1], [0], [0], [1], [0, 0, 1, 1], [], []>} : vector<10x32xf32>, vector<32x32xf32>, vector<10x32xf32> -> vector<10x32xf32>
    %185 = arith.addf %5, %184 : vector<10x32xf32>
    %c0_68 = arith.constant 0 : index
    %c0_69 = arith.constant 0 : index
    %c0_70 = arith.constant 0 : index
    %186 = vector.load %arg9[%c0_68, %c0_69, %c0_70] : memref<4x1x32xf32, #tpu.memory_space<vmem>>, vector<1x1x32xf32>
    %187 = vector.shape_cast %186 : vector<1x1x32xf32> to vector<1x32xf32>
    %188 = vector.broadcast %187 : vector<1x32xf32> to vector<10x32xf32>
    %189 = arith.addf %185, %188 : vector<10x32xf32>
    %c0_71 = arith.constant 0 : index
    %c0_72 = arith.constant 0 : index
    %c0_73 = arith.constant 0 : index
    %190 = vector.load %arg10[%c0_71, %c0_72, %c0_73] : memref<4x1x32xf32, #tpu.memory_space<vmem>>, vector<1x1x32xf32>
    %191 = vector.shape_cast %190 : vector<1x1x32xf32> to vector<1x32xf32>
    %c0_74 = arith.constant 0 : index
    %c0_75 = arith.constant 0 : index
    %c0_76 = arith.constant 0 : index
    %192 = vector.load %arg11[%c0_74, %c0_75, %c0_76] : memref<4x1x32xf32, #tpu.memory_space<vmem>>, vector<1x1x32xf32>
    %193 = vector.shape_cast %192 : vector<1x1x32xf32> to vector<1x32xf32>
    %cst_77 = arith.constant dense<0.000000e+00> : vector<10xf32>
    %194 = vector.multi_reduction <add>, %189, %cst_77 [1] : vector<10x32xf32> to vector<10xf32>
    %195 = vector.shape_cast %194 : vector<10xf32> to vector<10x1xf32>
    %cst_78 = arith.constant 3.200000e+01 : f32
    %196 = vector.broadcast %cst_78 : f32 to vector<10x1xf32>
    %197 = arith.divf %195, %196 : vector<10x1xf32>
    %198 = vector.broadcast %197 : vector<10x1xf32> to vector<10x32xf32>
    %199 = arith.subf %189, %198 : vector<10x32xf32>
    %200 = arith.mulf %199, %199 : vector<10x32xf32>
    %cst_79 = arith.constant dense<0.000000e+00> : vector<10xf32>
    %201 = vector.multi_reduction <add>, %200, %cst_79 [1] : vector<10x32xf32> to vector<10xf32>
    %202 = vector.shape_cast %201 : vector<10xf32> to vector<10x1xf32>
    %cst_80 = arith.constant 3.200000e+01 : f32
    %203 = vector.broadcast %cst_80 : f32 to vector<10x1xf32>
    %204 = arith.divf %202, %203 : vector<10x1xf32>
    %cst_81 = arith.constant 9.99999997E-7 : f32
    %205 = vector.broadcast %cst_81 : f32 to vector<10x1xf32>
    %206 = arith.addf %204, %205 : vector<10x1xf32>
    %207 = math.rsqrt %206 : vector<10x1xf32>
    %208 = vector.broadcast %207 : vector<10x1xf32> to vector<10x32xf32>
    %209 = arith.mulf %199, %208 : vector<10x32xf32>
    %210 = vector.broadcast %191 : vector<1x32xf32> to vector<10x32xf32>
    %211 = arith.mulf %209, %210 : vector<10x32xf32>
    %212 = vector.broadcast %193 : vector<1x32xf32> to vector<10x32xf32>
    %213 = arith.addf %211, %212 : vector<10x32xf32>
    %c0_82 = arith.constant 0 : index
    %c0_83 = arith.constant 0 : index
    %c0_84 = arith.constant 0 : index
    %214 = vector.load %arg12[%c0_82, %c0_83, %c0_84] : memref<4x32x64xf32, #tpu.memory_space<vmem>>, vector<1x32x64xf32>
    %215 = vector.shape_cast %214 : vector<1x32x64xf32> to vector<32x64xf32>
    %cst_85 = arith.constant dense<0.000000e+00> : vector<10x64xf32>
    %216 = tpu.matmul %213, %215, %cst_85 {dimension_numbers = #tpu.dot_dimension_numbers<[1], [0], [0], [1], [0, 0, 1, 1], [], []>} : vector<10x32xf32>, vector<32x64xf32>, vector<10x64xf32> -> vector<10x64xf32>
    %c0_86 = arith.constant 0 : index
    %c0_87 = arith.constant 0 : index
    %c0_88 = arith.constant 0 : index
    %217 = vector.load %arg13[%c0_86, %c0_87, %c0_88] : memref<4x1x64xf32, #tpu.memory_space<vmem>>, vector<1x1x64xf32>
    %218 = vector.shape_cast %217 : vector<1x1x64xf32> to vector<1x64xf32>
    %219 = vector.broadcast %218 : vector<1x64xf32> to vector<10x64xf32>
    %220 = arith.addf %216, %219 : vector<10x64xf32>
    %221 = arith.mulf %220, %220 : vector<10x64xf32>
    %222 = arith.mulf %220, %221 : vector<10x64xf32>
    %cst_89 = arith.constant 4.471500e-02 : f32
    %223 = vector.broadcast %cst_89 : f32 to vector<10x64xf32>
    %224 = arith.mulf %223, %222 : vector<10x64xf32>
    %225 = arith.addf %220, %224 : vector<10x64xf32>
    %cst_90 = arith.constant 0.797884583 : f32
    %226 = vector.broadcast %cst_90 : f32 to vector<10x64xf32>
    %227 = arith.mulf %226, %225 : vector<10x64xf32>
    %228 = math.tanh %227 : vector<10x64xf32>
    %cst_91 = arith.constant 1.000000e+00 : f32
    %229 = vector.broadcast %cst_91 : f32 to vector<10x64xf32>
    %230 = arith.addf %229, %228 : vector<10x64xf32>
    %cst_92 = arith.constant 5.000000e-01 : f32
    %231 = vector.broadcast %cst_92 : f32 to vector<10x64xf32>
    %232 = arith.mulf %231, %230 : vector<10x64xf32>
    %233 = arith.mulf %220, %232 : vector<10x64xf32>
    %c0_93 = arith.constant 0 : index
    %c0_94 = arith.constant 0 : index
    %c0_95 = arith.constant 0 : index
    %234 = vector.load %arg14[%c0_93, %c0_94, %c0_95] : memref<4x64x32xf32, #tpu.memory_space<vmem>>, vector<1x64x32xf32>
    %235 = vector.shape_cast %234 : vector<1x64x32xf32> to vector<64x32xf32>
    %cst_96 = arith.constant dense<0.000000e+00> : vector<10x32xf32>
    %236 = tpu.matmul %233, %235, %cst_96 {dimension_numbers = #tpu.dot_dimension_numbers<[1], [0], [0], [1], [0, 0, 1, 1], [], []>} : vector<10x64xf32>, vector<64x32xf32>, vector<10x32xf32> -> vector<10x32xf32>
    %237 = arith.addf %189, %236 : vector<10x32xf32>
    %c0_97 = arith.constant 0 : index
    %c0_98 = arith.constant 0 : index
    %c0_99 = arith.constant 0 : index
    %238 = vector.load %arg15[%c0_97, %c0_98, %c0_99] : memref<4x1x32xf32, #tpu.memory_space<vmem>>, vector<1x1x32xf32>
    %239 = vector.shape_cast %238 : vector<1x1x32xf32> to vector<1x32xf32>
    %240 = vector.broadcast %239 : vector<1x32xf32> to vector<10x32xf32>
    %241 = arith.addf %237, %240 : vector<10x32xf32>
    %c1 = arith.constant 1 : index
    %c0_100 = arith.constant 0 : index
    %c0_101 = arith.constant 0 : index
    %242 = vector.load %arg4[%c1, %c0_100, %c0_101] : memref<4x1x32xf32, #tpu.memory_space<vmem>>, vector<1x1x32xf32>
    %243 = vector.shape_cast %242 : vector<1x1x32xf32> to vector<1x32xf32>
    %c1_102 = arith.constant 1 : index
    %c0_103 = arith.constant 0 : index
    %c0_104 = arith.constant 0 : index
    %244 = vector.load %arg5[%c1_102, %c0_103, %c0_104] : memref<4x1x32xf32, #tpu.memory_space<vmem>>, vector<1x1x32xf32>
    %245 = vector.shape_cast %244 : vector<1x1x32xf32> to vector<1x32xf32>
    %cst_105 = arith.constant dense<0.000000e+00> : vector<10xf32>
    %246 = vector.multi_reduction <add>, %241, %cst_105 [1] : vector<10x32xf32> to vector<10xf32>
    %247 = vector.shape_cast %246 : vector<10xf32> to vector<10x1xf32>
    %cst_106 = arith.constant 3.200000e+01 : f32
    %248 = vector.broadcast %cst_106 : f32 to vector<10x1xf32>
    %249 = arith.divf %247, %248 : vector<10x1xf32>
    %250 = vector.broadcast %249 : vector<10x1xf32> to vector<10x32xf32>
    %251 = arith.subf %241, %250 : vector<10x32xf32>
    %252 = arith.mulf %251, %251 : vector<10x32xf32>
    %cst_107 = arith.constant dense<0.000000e+00> : vector<10xf32>
    %253 = vector.multi_reduction <add>, %252, %cst_107 [1] : vector<10x32xf32> to vector<10xf32>
    %254 = vector.shape_cast %253 : vector<10xf32> to vector<10x1xf32>
    %cst_108 = arith.constant 3.200000e+01 : f32
    %255 = vector.broadcast %cst_108 : f32 to vector<10x1xf32>
    %256 = arith.divf %254, %255 : vector<10x1xf32>
    %cst_109 = arith.constant 9.99999997E-7 : f32
    %257 = vector.broadcast %cst_109 : f32 to vector<10x1xf32>
    %258 = arith.addf %256, %257 : vector<10x1xf32>
    %259 = math.rsqrt %258 : vector<10x1xf32>
    %260 = vector.broadcast %259 : vector<10x1xf32> to vector<10x32xf32>
    %261 = arith.mulf %251, %260 : vector<10x32xf32>
    %262 = vector.broadcast %243 : vector<1x32xf32> to vector<10x32xf32>
    %263 = arith.mulf %261, %262 : vector<10x32xf32>
    %264 = vector.broadcast %245 : vector<1x32xf32> to vector<10x32xf32>
    %265 = arith.addf %263, %264 : vector<10x32xf32>
    %c1_110 = arith.constant 1 : index
    %c0_111 = arith.constant 0 : index
    %c0_112 = arith.constant 0 : index
    %266 = vector.load %arg6[%c1_110, %c0_111, %c0_112] : memref<4x32x96xf32, #tpu.memory_space<vmem>>, vector<1x32x96xf32>
    %267 = vector.shape_cast %266 : vector<1x32x96xf32> to vector<32x96xf32>
    %cst_113 = arith.constant dense<0.000000e+00> : vector<10x96xf32>
    %268 = tpu.matmul %265, %267, %cst_113 {dimension_numbers = #tpu.dot_dimension_numbers<[1], [0], [0], [1], [0, 0, 1, 1], [], []>} : vector<10x32xf32>, vector<32x96xf32>, vector<10x96xf32> -> vector<10x96xf32>
    %c1_114 = arith.constant 1 : index
    %c0_115 = arith.constant 0 : index
    %c0_116 = arith.constant 0 : index
    %269 = vector.load %arg7[%c1_114, %c0_115, %c0_116] : memref<4x1x96xf32, #tpu.memory_space<vmem>>, vector<1x1x96xf32>
    %270 = vector.shape_cast %269 : vector<1x1x96xf32> to vector<1x96xf32>
    %271 = vector.broadcast %270 : vector<1x96xf32> to vector<10x96xf32>
    %272 = arith.addf %268, %271 : vector<10x96xf32>
    %273 = vector.extract_strided_slice %272 {offsets = [0, 0], sizes = [5, 32], strides = [1, 1]} : vector<10x96xf32> to vector<5x32xf32>
    %274 = vector.extract_strided_slice %272 {offsets = [0, 32], sizes = [5, 32], strides = [1, 1]} : vector<10x96xf32> to vector<5x32xf32>
    %275 = vector.extract_strided_slice %272 {offsets = [0, 64], sizes = [5, 32], strides = [1, 1]} : vector<10x96xf32> to vector<5x32xf32>
    %276 = vector.extract_strided_slice %273 {offsets = [0, 0], sizes = [5, 8], strides = [1, 1]} : vector<5x32xf32> to vector<5x8xf32>
    %277 = vector.extract_strided_slice %274 {offsets = [0, 0], sizes = [5, 8], strides = [1, 1]} : vector<5x32xf32> to vector<5x8xf32>
    %278 = vector.extract_strided_slice %275 {offsets = [0, 0], sizes = [5, 8], strides = [1, 1]} : vector<5x32xf32> to vector<5x8xf32>
    %cst_117 = arith.constant dense<0.000000e+00> : vector<5x5xf32>
    %279 = tpu.matmul %276, %277, %cst_117 {dimension_numbers = #tpu.dot_dimension_numbers<[1], [1], [0], [0], [0, 0, 1, 0], [], []>} : vector<5x8xf32>, vector<5x8xf32>, vector<5x5xf32> -> vector<5x5xf32>
    %cst_118 = arith.constant 0.353553385 : f32
    %280 = vector.broadcast %cst_118 : f32 to vector<5x5xf32>
    %281 = arith.mulf %279, %280 : vector<5x5xf32>
    %cst_119 = arith.constant dense<0xFF800000> : vector<5xf32>
    %282 = vector.multi_reduction <maximumf>, %281, %cst_119 [1] : vector<5x5xf32> to vector<5xf32>
    %283 = vector.shape_cast %282 : vector<5xf32> to vector<5x1xf32>
    %284 = vector.broadcast %283 : vector<5x1xf32> to vector<5x5xf32>
    %285 = arith.subf %281, %284 : vector<5x5xf32>
    %286 = math.exp %285 : vector<5x5xf32>
    %cst_120 = arith.constant dense<0.000000e+00> : vector<5xf32>
    %287 = vector.multi_reduction <add>, %286, %cst_120 [1] : vector<5x5xf32> to vector<5xf32>
    %288 = vector.shape_cast %287 : vector<5xf32> to vector<5x1xf32>
    %289 = tpu.reciprocal %288 {approx = true} : vector<5x1xf32> -> vector<5x1xf32>
    %290 = vector.broadcast %289 : vector<5x1xf32> to vector<5x5xf32>
    %291 = arith.mulf %286, %290 : vector<5x5xf32>
    %cst_121 = arith.constant dense<0.000000e+00> : vector<5x8xf32>
    %292 = tpu.matmul %291, %278, %cst_121 {dimension_numbers = #tpu.dot_dimension_numbers<[1], [0], [0], [1], [0, 0, 1, 1], [], []>} : vector<5x5xf32>, vector<5x8xf32>, vector<5x8xf32> -> vector<5x8xf32>
    %293 = vector.extract_strided_slice %273 {offsets = [0, 8], sizes = [5, 8], strides = [1, 1]} : vector<5x32xf32> to vector<5x8xf32>
    %294 = vector.extract_strided_slice %274 {offsets = [0, 8], sizes = [5, 8], strides = [1, 1]} : vector<5x32xf32> to vector<5x8xf32>
    %295 = vector.extract_strided_slice %275 {offsets = [0, 8], sizes = [5, 8], strides = [1, 1]} : vector<5x32xf32> to vector<5x8xf32>
    %cst_122 = arith.constant dense<0.000000e+00> : vector<5x5xf32>
    %296 = tpu.matmul %293, %294, %cst_122 {dimension_numbers = #tpu.dot_dimension_numbers<[1], [1], [0], [0], [0, 0, 1, 0], [], []>} : vector<5x8xf32>, vector<5x8xf32>, vector<5x5xf32> -> vector<5x5xf32>
    %cst_123 = arith.constant 0.353553385 : f32
    %297 = vector.broadcast %cst_123 : f32 to vector<5x5xf32>
    %298 = arith.mulf %296, %297 : vector<5x5xf32>
    %cst_124 = arith.constant dense<0xFF800000> : vector<5xf32>
    %299 = vector.multi_reduction <maximumf>, %298, %cst_124 [1] : vector<5x5xf32> to vector<5xf32>
    %300 = vector.shape_cast %299 : vector<5xf32> to vector<5x1xf32>
    %301 = vector.broadcast %300 : vector<5x1xf32> to vector<5x5xf32>
    %302 = arith.subf %298, %301 : vector<5x5xf32>
    %303 = math.exp %302 : vector<5x5xf32>
    %cst_125 = arith.constant dense<0.000000e+00> : vector<5xf32>
    %304 = vector.multi_reduction <add>, %303, %cst_125 [1] : vector<5x5xf32> to vector<5xf32>
    %305 = vector.shape_cast %304 : vector<5xf32> to vector<5x1xf32>
    %306 = tpu.reciprocal %305 {approx = true} : vector<5x1xf32> -> vector<5x1xf32>
    %307 = vector.broadcast %306 : vector<5x1xf32> to vector<5x5xf32>
    %308 = arith.mulf %303, %307 : vector<5x5xf32>
    %cst_126 = arith.constant dense<0.000000e+00> : vector<5x8xf32>
    %309 = tpu.matmul %308, %295, %cst_126 {dimension_numbers = #tpu.dot_dimension_numbers<[1], [0], [0], [1], [0, 0, 1, 1], [], []>} : vector<5x5xf32>, vector<5x8xf32>, vector<5x8xf32> -> vector<5x8xf32>
    %310 = vector.extract_strided_slice %273 {offsets = [0, 16], sizes = [5, 8], strides = [1, 1]} : vector<5x32xf32> to vector<5x8xf32>
    %311 = vector.extract_strided_slice %274 {offsets = [0, 16], sizes = [5, 8], strides = [1, 1]} : vector<5x32xf32> to vector<5x8xf32>
    %312 = vector.extract_strided_slice %275 {offsets = [0, 16], sizes = [5, 8], strides = [1, 1]} : vector<5x32xf32> to vector<5x8xf32>
    %cst_127 = arith.constant dense<0.000000e+00> : vector<5x5xf32>
    %313 = tpu.matmul %310, %311, %cst_127 {dimension_numbers = #tpu.dot_dimension_numbers<[1], [1], [0], [0], [0, 0, 1, 0], [], []>} : vector<5x8xf32>, vector<5x8xf32>, vector<5x5xf32> -> vector<5x5xf32>
    %cst_128 = arith.constant 0.353553385 : f32
    %314 = vector.broadcast %cst_128 : f32 to vector<5x5xf32>
    %315 = arith.mulf %313, %314 : vector<5x5xf32>
    %cst_129 = arith.constant dense<0xFF800000> : vector<5xf32>
    %316 = vector.multi_reduction <maximumf>, %315, %cst_129 [1] : vector<5x5xf32> to vector<5xf32>
    %317 = vector.shape_cast %316 : vector<5xf32> to vector<5x1xf32>
    %318 = vector.broadcast %317 : vector<5x1xf32> to vector<5x5xf32>
    %319 = arith.subf %315, %318 : vector<5x5xf32>
    %320 = math.exp %319 : vector<5x5xf32>
    %cst_130 = arith.constant dense<0.000000e+00> : vector<5xf32>
    %321 = vector.multi_reduction <add>, %320, %cst_130 [1] : vector<5x5xf32> to vector<5xf32>
    %322 = vector.shape_cast %321 : vector<5xf32> to vector<5x1xf32>
    %323 = tpu.reciprocal %322 {approx = true} : vector<5x1xf32> -> vector<5x1xf32>
    %324 = vector.broadcast %323 : vector<5x1xf32> to vector<5x5xf32>
    %325 = arith.mulf %320, %324 : vector<5x5xf32>
    %cst_131 = arith.constant dense<0.000000e+00> : vector<5x8xf32>
    %326 = tpu.matmul %325, %312, %cst_131 {dimension_numbers = #tpu.dot_dimension_numbers<[1], [0], [0], [1], [0, 0, 1, 1], [], []>} : vector<5x5xf32>, vector<5x8xf32>, vector<5x8xf32> -> vector<5x8xf32>
    %327 = vector.extract_strided_slice %273 {offsets = [0, 24], sizes = [5, 8], strides = [1, 1]} : vector<5x32xf32> to vector<5x8xf32>
    %328 = vector.extract_strided_slice %274 {offsets = [0, 24], sizes = [5, 8], strides = [1, 1]} : vector<5x32xf32> to vector<5x8xf32>
    %329 = vector.extract_strided_slice %275 {offsets = [0, 24], sizes = [5, 8], strides = [1, 1]} : vector<5x32xf32> to vector<5x8xf32>
    %cst_132 = arith.constant dense<0.000000e+00> : vector<5x5xf32>
    %330 = tpu.matmul %327, %328, %cst_132 {dimension_numbers = #tpu.dot_dimension_numbers<[1], [1], [0], [0], [0, 0, 1, 0], [], []>} : vector<5x8xf32>, vector<5x8xf32>, vector<5x5xf32> -> vector<5x5xf32>
    %cst_133 = arith.constant 0.353553385 : f32
    %331 = vector.broadcast %cst_133 : f32 to vector<5x5xf32>
    %332 = arith.mulf %330, %331 : vector<5x5xf32>
    %cst_134 = arith.constant dense<0xFF800000> : vector<5xf32>
    %333 = vector.multi_reduction <maximumf>, %332, %cst_134 [1] : vector<5x5xf32> to vector<5xf32>
    %334 = vector.shape_cast %333 : vector<5xf32> to vector<5x1xf32>
    %335 = vector.broadcast %334 : vector<5x1xf32> to vector<5x5xf32>
    %336 = arith.subf %332, %335 : vector<5x5xf32>
    %337 = math.exp %336 : vector<5x5xf32>
    %cst_135 = arith.constant dense<0.000000e+00> : vector<5xf32>
    %338 = vector.multi_reduction <add>, %337, %cst_135 [1] : vector<5x5xf32> to vector<5xf32>
    %339 = vector.shape_cast %338 : vector<5xf32> to vector<5x1xf32>
    %340 = tpu.reciprocal %339 {approx = true} : vector<5x1xf32> -> vector<5x1xf32>
    %341 = vector.broadcast %340 : vector<5x1xf32> to vector<5x5xf32>
    %342 = arith.mulf %337, %341 : vector<5x5xf32>
    %cst_136 = arith.constant dense<0.000000e+00> : vector<5x8xf32>
    %343 = tpu.matmul %342, %329, %cst_136 {dimension_numbers = #tpu.dot_dimension_numbers<[1], [0], [0], [1], [0, 0, 1, 1], [], []>} : vector<5x5xf32>, vector<5x8xf32>, vector<5x8xf32> -> vector<5x8xf32>
    %344 = tpu.concatenate %292, %309, %326, %343 in 1 : vector<5x8xf32>, vector<5x8xf32>, vector<5x8xf32>, vector<5x8xf32> -> vector<5x32xf32>
    %345 = vector.extract_strided_slice %272 {offsets = [5, 0], sizes = [5, 32], strides = [1, 1]} : vector<10x96xf32> to vector<5x32xf32>
    %346 = vector.extract_strided_slice %272 {offsets = [5, 32], sizes = [5, 32], strides = [1, 1]} : vector<10x96xf32> to vector<5x32xf32>
    %347 = vector.extract_strided_slice %272 {offsets = [5, 64], sizes = [5, 32], strides = [1, 1]} : vector<10x96xf32> to vector<5x32xf32>
    %348 = vector.extract_strided_slice %345 {offsets = [0, 0], sizes = [5, 8], strides = [1, 1]} : vector<5x32xf32> to vector<5x8xf32>
    %349 = vector.extract_strided_slice %346 {offsets = [0, 0], sizes = [5, 8], strides = [1, 1]} : vector<5x32xf32> to vector<5x8xf32>
    %350 = vector.extract_strided_slice %347 {offsets = [0, 0], sizes = [5, 8], strides = [1, 1]} : vector<5x32xf32> to vector<5x8xf32>
    %cst_137 = arith.constant dense<0.000000e+00> : vector<5x5xf32>
    %351 = tpu.matmul %348, %349, %cst_137 {dimension_numbers = #tpu.dot_dimension_numbers<[1], [1], [0], [0], [0, 0, 1, 0], [], []>} : vector<5x8xf32>, vector<5x8xf32>, vector<5x5xf32> -> vector<5x5xf32>
    %cst_138 = arith.constant 0.353553385 : f32
    %352 = vector.broadcast %cst_138 : f32 to vector<5x5xf32>
    %353 = arith.mulf %351, %352 : vector<5x5xf32>
    %cst_139 = arith.constant dense<0xFF800000> : vector<5xf32>
    %354 = vector.multi_reduction <maximumf>, %353, %cst_139 [1] : vector<5x5xf32> to vector<5xf32>
    %355 = vector.shape_cast %354 : vector<5xf32> to vector<5x1xf32>
    %356 = vector.broadcast %355 : vector<5x1xf32> to vector<5x5xf32>
    %357 = arith.subf %353, %356 : vector<5x5xf32>
    %358 = math.exp %357 : vector<5x5xf32>
    %cst_140 = arith.constant dense<0.000000e+00> : vector<5xf32>
    %359 = vector.multi_reduction <add>, %358, %cst_140 [1] : vector<5x5xf32> to vector<5xf32>
    %360 = vector.shape_cast %359 : vector<5xf32> to vector<5x1xf32>
    %361 = tpu.reciprocal %360 {approx = true} : vector<5x1xf32> -> vector<5x1xf32>
    %362 = vector.broadcast %361 : vector<5x1xf32> to vector<5x5xf32>
    %363 = arith.mulf %358, %362 : vector<5x5xf32>
    %cst_141 = arith.constant dense<0.000000e+00> : vector<5x8xf32>
    %364 = tpu.matmul %363, %350, %cst_141 {dimension_numbers = #tpu.dot_dimension_numbers<[1], [0], [0], [1], [0, 0, 1, 1], [], []>} : vector<5x5xf32>, vector<5x8xf32>, vector<5x8xf32> -> vector<5x8xf32>
    %365 = vector.extract_strided_slice %345 {offsets = [0, 8], sizes = [5, 8], strides = [1, 1]} : vector<5x32xf32> to vector<5x8xf32>
    %366 = vector.extract_strided_slice %346 {offsets = [0, 8], sizes = [5, 8], strides = [1, 1]} : vector<5x32xf32> to vector<5x8xf32>
    %367 = vector.extract_strided_slice %347 {offsets = [0, 8], sizes = [5, 8], strides = [1, 1]} : vector<5x32xf32> to vector<5x8xf32>
    %cst_142 = arith.constant dense<0.000000e+00> : vector<5x5xf32>
    %368 = tpu.matmul %365, %366, %cst_142 {dimension_numbers = #tpu.dot_dimension_numbers<[1], [1], [0], [0], [0, 0, 1, 0], [], []>} : vector<5x8xf32>, vector<5x8xf32>, vector<5x5xf32> -> vector<5x5xf32>
    %cst_143 = arith.constant 0.353553385 : f32
    %369 = vector.broadcast %cst_143 : f32 to vector<5x5xf32>
    %370 = arith.mulf %368, %369 : vector<5x5xf32>
    %cst_144 = arith.constant dense<0xFF800000> : vector<5xf32>
    %371 = vector.multi_reduction <maximumf>, %370, %cst_144 [1] : vector<5x5xf32> to vector<5xf32>
    %372 = vector.shape_cast %371 : vector<5xf32> to vector<5x1xf32>
    %373 = vector.broadcast %372 : vector<5x1xf32> to vector<5x5xf32>
    %374 = arith.subf %370, %373 : vector<5x5xf32>
    %375 = math.exp %374 : vector<5x5xf32>
    %cst_145 = arith.constant dense<0.000000e+00> : vector<5xf32>
    %376 = vector.multi_reduction <add>, %375, %cst_145 [1] : vector<5x5xf32> to vector<5xf32>
    %377 = vector.shape_cast %376 : vector<5xf32> to vector<5x1xf32>
    %378 = tpu.reciprocal %377 {approx = true} : vector<5x1xf32> -> vector<5x1xf32>
    %379 = vector.broadcast %378 : vector<5x1xf32> to vector<5x5xf32>
    %380 = arith.mulf %375, %379 : vector<5x5xf32>
    %cst_146 = arith.constant dense<0.000000e+00> : vector<5x8xf32>
    %381 = tpu.matmul %380, %367, %cst_146 {dimension_numbers = #tpu.dot_dimension_numbers<[1], [0], [0], [1], [0, 0, 1, 1], [], []>} : vector<5x5xf32>, vector<5x8xf32>, vector<5x8xf32> -> vector<5x8xf32>
    %382 = vector.extract_strided_slice %345 {offsets = [0, 16], sizes = [5, 8], strides = [1, 1]} : vector<5x32xf32> to vector<5x8xf32>
    %383 = vector.extract_strided_slice %346 {offsets = [0, 16], sizes = [5, 8], strides = [1, 1]} : vector<5x32xf32> to vector<5x8xf32>
    %384 = vector.extract_strided_slice %347 {offsets = [0, 16], sizes = [5, 8], strides = [1, 1]} : vector<5x32xf32> to vector<5x8xf32>
    %cst_147 = arith.constant dense<0.000000e+00> : vector<5x5xf32>
    %385 = tpu.matmul %382, %383, %cst_147 {dimension_numbers = #tpu.dot_dimension_numbers<[1], [1], [0], [0], [0, 0, 1, 0], [], []>} : vector<5x8xf32>, vector<5x8xf32>, vector<5x5xf32> -> vector<5x5xf32>
    %cst_148 = arith.constant 0.353553385 : f32
    %386 = vector.broadcast %cst_148 : f32 to vector<5x5xf32>
    %387 = arith.mulf %385, %386 : vector<5x5xf32>
    %cst_149 = arith.constant dense<0xFF800000> : vector<5xf32>
    %388 = vector.multi_reduction <maximumf>, %387, %cst_149 [1] : vector<5x5xf32> to vector<5xf32>
    %389 = vector.shape_cast %388 : vector<5xf32> to vector<5x1xf32>
    %390 = vector.broadcast %389 : vector<5x1xf32> to vector<5x5xf32>
    %391 = arith.subf %387, %390 : vector<5x5xf32>
    %392 = math.exp %391 : vector<5x5xf32>
    %cst_150 = arith.constant dense<0.000000e+00> : vector<5xf32>
    %393 = vector.multi_reduction <add>, %392, %cst_150 [1] : vector<5x5xf32> to vector<5xf32>
    %394 = vector.shape_cast %393 : vector<5xf32> to vector<5x1xf32>
    %395 = tpu.reciprocal %394 {approx = true} : vector<5x1xf32> -> vector<5x1xf32>
    %396 = vector.broadcast %395 : vector<5x1xf32> to vector<5x5xf32>
    %397 = arith.mulf %392, %396 : vector<5x5xf32>
    %cst_151 = arith.constant dense<0.000000e+00> : vector<5x8xf32>
    %398 = tpu.matmul %397, %384, %cst_151 {dimension_numbers = #tpu.dot_dimension_numbers<[1], [0], [0], [1], [0, 0, 1, 1], [], []>} : vector<5x5xf32>, vector<5x8xf32>, vector<5x8xf32> -> vector<5x8xf32>
    %399 = vector.extract_strided_slice %345 {offsets = [0, 24], sizes = [5, 8], strides = [1, 1]} : vector<5x32xf32> to vector<5x8xf32>
    %400 = vector.extract_strided_slice %346 {offsets = [0, 24], sizes = [5, 8], strides = [1, 1]} : vector<5x32xf32> to vector<5x8xf32>
    %401 = vector.extract_strided_slice %347 {offsets = [0, 24], sizes = [5, 8], strides = [1, 1]} : vector<5x32xf32> to vector<5x8xf32>
    %cst_152 = arith.constant dense<0.000000e+00> : vector<5x5xf32>
    %402 = tpu.matmul %399, %400, %cst_152 {dimension_numbers = #tpu.dot_dimension_numbers<[1], [1], [0], [0], [0, 0, 1, 0], [], []>} : vector<5x8xf32>, vector<5x8xf32>, vector<5x5xf32> -> vector<5x5xf32>
    %cst_153 = arith.constant 0.353553385 : f32
    %403 = vector.broadcast %cst_153 : f32 to vector<5x5xf32>
    %404 = arith.mulf %402, %403 : vector<5x5xf32>
    %cst_154 = arith.constant dense<0xFF800000> : vector<5xf32>
    %405 = vector.multi_reduction <maximumf>, %404, %cst_154 [1] : vector<5x5xf32> to vector<5xf32>
    %406 = vector.shape_cast %405 : vector<5xf32> to vector<5x1xf32>
    %407 = vector.broadcast %406 : vector<5x1xf32> to vector<5x5xf32>
    %408 = arith.subf %404, %407 : vector<5x5xf32>
    %409 = math.exp %408 : vector<5x5xf32>
    %cst_155 = arith.constant dense<0.000000e+00> : vector<5xf32>
    %410 = vector.multi_reduction <add>, %409, %cst_155 [1] : vector<5x5xf32> to vector<5xf32>
    %411 = vector.shape_cast %410 : vector<5xf32> to vector<5x1xf32>
    %412 = tpu.reciprocal %411 {approx = true} : vector<5x1xf32> -> vector<5x1xf32>
    %413 = vector.broadcast %412 : vector<5x1xf32> to vector<5x5xf32>
    %414 = arith.mulf %409, %413 : vector<5x5xf32>
    %cst_156 = arith.constant dense<0.000000e+00> : vector<5x8xf32>
    %415 = tpu.matmul %414, %401, %cst_156 {dimension_numbers = #tpu.dot_dimension_numbers<[1], [0], [0], [1], [0, 0, 1, 1], [], []>} : vector<5x5xf32>, vector<5x8xf32>, vector<5x8xf32> -> vector<5x8xf32>
    %416 = tpu.concatenate %364, %381, %398, %415 in 1 : vector<5x8xf32>, vector<5x8xf32>, vector<5x8xf32>, vector<5x8xf32> -> vector<5x32xf32>
    %417 = tpu.concatenate %344, %416 in 0 : vector<5x32xf32>, vector<5x32xf32> -> vector<10x32xf32>
    %c1_157 = arith.constant 1 : index
    %c0_158 = arith.constant 0 : index
    %c0_159 = arith.constant 0 : index
    %418 = vector.load %arg8[%c1_157, %c0_158, %c0_159] : memref<4x32x32xf32, #tpu.memory_space<vmem>>, vector<1x32x32xf32>
    %419 = vector.shape_cast %418 : vector<1x32x32xf32> to vector<32x32xf32>
    %cst_160 = arith.constant dense<0.000000e+00> : vector<10x32xf32>
    %420 = tpu.matmul %417, %419, %cst_160 {dimension_numbers = #tpu.dot_dimension_numbers<[1], [0], [0], [1], [0, 0, 1, 1], [], []>} : vector<10x32xf32>, vector<32x32xf32>, vector<10x32xf32> -> vector<10x32xf32>
    %421 = arith.addf %241, %420 : vector<10x32xf32>
    %c1_161 = arith.constant 1 : index
    %c0_162 = arith.constant 0 : index
    %c0_163 = arith.constant 0 : index
    %422 = vector.load %arg9[%c1_161, %c0_162, %c0_163] : memref<4x1x32xf32, #tpu.memory_space<vmem>>, vector<1x1x32xf32>
    %423 = vector.shape_cast %422 : vector<1x1x32xf32> to vector<1x32xf32>
    %424 = vector.broadcast %423 : vector<1x32xf32> to vector<10x32xf32>
    %425 = arith.addf %421, %424 : vector<10x32xf32>
    %c1_164 = arith.constant 1 : index
    %c0_165 = arith.constant 0 : index
    %c0_166 = arith.constant 0 : index
    %426 = vector.load %arg10[%c1_164, %c0_165, %c0_166] : memref<4x1x32xf32, #tpu.memory_space<vmem>>, vector<1x1x32xf32>
    %427 = vector.shape_cast %426 : vector<1x1x32xf32> to vector<1x32xf32>
    %c1_167 = arith.constant 1 : index
    %c0_168 = arith.constant 0 : index
    %c0_169 = arith.constant 0 : index
    %428 = vector.load %arg11[%c1_167, %c0_168, %c0_169] : memref<4x1x32xf32, #tpu.memory_space<vmem>>, vector<1x1x32xf32>
    %429 = vector.shape_cast %428 : vector<1x1x32xf32> to vector<1x32xf32>
    %cst_170 = arith.constant dense<0.000000e+00> : vector<10xf32>
    %430 = vector.multi_reduction <add>, %425, %cst_170 [1] : vector<10x32xf32> to vector<10xf32>
    %431 = vector.shape_cast %430 : vector<10xf32> to vector<10x1xf32>
    %cst_171 = arith.constant 3.200000e+01 : f32
    %432 = vector.broadcast %cst_171 : f32 to vector<10x1xf32>
    %433 = arith.divf %431, %432 : vector<10x1xf32>
    %434 = vector.broadcast %433 : vector<10x1xf32> to vector<10x32xf32>
    %435 = arith.subf %425, %434 : vector<10x32xf32>
    %436 = arith.mulf %435, %435 : vector<10x32xf32>
    %cst_172 = arith.constant dense<0.000000e+00> : vector<10xf32>
    %437 = vector.multi_reduction <add>, %436, %cst_172 [1] : vector<10x32xf32> to vector<10xf32>
    %438 = vector.shape_cast %437 : vector<10xf32> to vector<10x1xf32>
    %cst_173 = arith.constant 3.200000e+01 : f32
    %439 = vector.broadcast %cst_173 : f32 to vector<10x1xf32>
    %440 = arith.divf %438, %439 : vector<10x1xf32>
    %cst_174 = arith.constant 9.99999997E-7 : f32
    %441 = vector.broadcast %cst_174 : f32 to vector<10x1xf32>
    %442 = arith.addf %440, %441 : vector<10x1xf32>
    %443 = math.rsqrt %442 : vector<10x1xf32>
    %444 = vector.broadcast %443 : vector<10x1xf32> to vector<10x32xf32>
    %445 = arith.mulf %435, %444 : vector<10x32xf32>
    %446 = vector.broadcast %427 : vector<1x32xf32> to vector<10x32xf32>
    %447 = arith.mulf %445, %446 : vector<10x32xf32>
    %448 = vector.broadcast %429 : vector<1x32xf32> to vector<10x32xf32>
    %449 = arith.addf %447, %448 : vector<10x32xf32>
    %c1_175 = arith.constant 1 : index
    %c0_176 = arith.constant 0 : index
    %c0_177 = arith.constant 0 : index
    %450 = vector.load %arg12[%c1_175, %c0_176, %c0_177] : memref<4x32x64xf32, #tpu.memory_space<vmem>>, vector<1x32x64xf32>
    %451 = vector.shape_cast %450 : vector<1x32x64xf32> to vector<32x64xf32>
    %cst_178 = arith.constant dense<0.000000e+00> : vector<10x64xf32>
    %452 = tpu.matmul %449, %451, %cst_178 {dimension_numbers = #tpu.dot_dimension_numbers<[1], [0], [0], [1], [0, 0, 1, 1], [], []>} : vector<10x32xf32>, vector<32x64xf32>, vector<10x64xf32> -> vector<10x64xf32>
    %c1_179 = arith.constant 1 : index
    %c0_180 = arith.constant 0 : index
    %c0_181 = arith.constant 0 : index
    %453 = vector.load %arg13[%c1_179, %c0_180, %c0_181] : memref<4x1x64xf32, #tpu.memory_space<vmem>>, vector<1x1x64xf32>
    %454 = vector.shape_cast %453 : vector<1x1x64xf32> to vector<1x64xf32>
    %455 = vector.broadcast %454 : vector<1x64xf32> to vector<10x64xf32>
    %456 = arith.addf %452, %455 : vector<10x64xf32>
    %457 = arith.mulf %456, %456 : vector<10x64xf32>
    %458 = arith.mulf %456, %457 : vector<10x64xf32>
    %cst_182 = arith.constant 4.471500e-02 : f32
    %459 = vector.broadcast %cst_182 : f32 to vector<10x64xf32>
    %460 = arith.mulf %459, %458 : vector<10x64xf32>
    %461 = arith.addf %456, %460 : vector<10x64xf32>
    %cst_183 = arith.constant 0.797884583 : f32
    %462 = vector.broadcast %cst_183 : f32 to vector<10x64xf32>
    %463 = arith.mulf %462, %461 : vector<10x64xf32>
    %464 = math.tanh %463 : vector<10x64xf32>
    %cst_184 = arith.constant 1.000000e+00 : f32
    %465 = vector.broadcast %cst_184 : f32 to vector<10x64xf32>
    %466 = arith.addf %465, %464 : vector<10x64xf32>
    %cst_185 = arith.constant 5.000000e-01 : f32
    %467 = vector.broadcast %cst_185 : f32 to vector<10x64xf32>
    %468 = arith.mulf %467, %466 : vector<10x64xf32>
    %469 = arith.mulf %456, %468 : vector<10x64xf32>
    %c1_186 = arith.constant 1 : index
    %c0_187 = arith.constant 0 : index
    %c0_188 = arith.constant 0 : index
    %470 = vector.load %arg14[%c1_186, %c0_187, %c0_188] : memref<4x64x32xf32, #tpu.memory_space<vmem>>, vector<1x64x32xf32>
    %471 = vector.shape_cast %470 : vector<1x64x32xf32> to vector<64x32xf32>
    %cst_189 = arith.constant dense<0.000000e+00> : vector<10x32xf32>
    %472 = tpu.matmul %469, %471, %cst_189 {dimension_numbers = #tpu.dot_dimension_numbers<[1], [0], [0], [1], [0, 0, 1, 1], [], []>} : vector<10x64xf32>, vector<64x32xf32>, vector<10x32xf32> -> vector<10x32xf32>
    %473 = arith.addf %425, %472 : vector<10x32xf32>
    %c1_190 = arith.constant 1 : index
    %c0_191 = arith.constant 0 : index
    %c0_192 = arith.constant 0 : index
    %474 = vector.load %arg15[%c1_190, %c0_191, %c0_192] : memref<4x1x32xf32, #tpu.memory_space<vmem>>, vector<1x1x32xf32>
    %475 = vector.shape_cast %474 : vector<1x1x32xf32> to vector<1x32xf32>
    %476 = vector.broadcast %475 : vector<1x32xf32> to vector<10x32xf32>
    %477 = arith.addf %473, %476 : vector<10x32xf32>
    %c2 = arith.constant 2 : index
    %c0_193 = arith.constant 0 : index
    %c0_194 = arith.constant 0 : index
    %478 = vector.load %arg4[%c2, %c0_193, %c0_194] : memref<4x1x32xf32, #tpu.memory_space<vmem>>, vector<1x1x32xf32>
    %479 = vector.shape_cast %478 : vector<1x1x32xf32> to vector<1x32xf32>
    %c2_195 = arith.constant 2 : index
    %c0_196 = arith.constant 0 : index
    %c0_197 = arith.constant 0 : index
    %480 = vector.load %arg5[%c2_195, %c0_196, %c0_197] : memref<4x1x32xf32, #tpu.memory_space<vmem>>, vector<1x1x32xf32>
    %481 = vector.shape_cast %480 : vector<1x1x32xf32> to vector<1x32xf32>
    %cst_198 = arith.constant dense<0.000000e+00> : vector<10xf32>
    %482 = vector.multi_reduction <add>, %477, %cst_198 [1] : vector<10x32xf32> to vector<10xf32>
    %483 = vector.shape_cast %482 : vector<10xf32> to vector<10x1xf32>
    %cst_199 = arith.constant 3.200000e+01 : f32
    %484 = vector.broadcast %cst_199 : f32 to vector<10x1xf32>
    %485 = arith.divf %483, %484 : vector<10x1xf32>
    %486 = vector.broadcast %485 : vector<10x1xf32> to vector<10x32xf32>
    %487 = arith.subf %477, %486 : vector<10x32xf32>
    %488 = arith.mulf %487, %487 : vector<10x32xf32>
    %cst_200 = arith.constant dense<0.000000e+00> : vector<10xf32>
    %489 = vector.multi_reduction <add>, %488, %cst_200 [1] : vector<10x32xf32> to vector<10xf32>
    %490 = vector.shape_cast %489 : vector<10xf32> to vector<10x1xf32>
    %cst_201 = arith.constant 3.200000e+01 : f32
    %491 = vector.broadcast %cst_201 : f32 to vector<10x1xf32>
    %492 = arith.divf %490, %491 : vector<10x1xf32>
    %cst_202 = arith.constant 9.99999997E-7 : f32
    %493 = vector.broadcast %cst_202 : f32 to vector<10x1xf32>
    %494 = arith.addf %492, %493 : vector<10x1xf32>
    %495 = math.rsqrt %494 : vector<10x1xf32>
    %496 = vector.broadcast %495 : vector<10x1xf32> to vector<10x32xf32>
    %497 = arith.mulf %487, %496 : vector<10x32xf32>
    %498 = vector.broadcast %479 : vector<1x32xf32> to vector<10x32xf32>
    %499 = arith.mulf %497, %498 : vector<10x32xf32>
    %500 = vector.broadcast %481 : vector<1x32xf32> to vector<10x32xf32>
    %501 = arith.addf %499, %500 : vector<10x32xf32>
    %c2_203 = arith.constant 2 : index
    %c0_204 = arith.constant 0 : index
    %c0_205 = arith.constant 0 : index
    %502 = vector.load %arg6[%c2_203, %c0_204, %c0_205] : memref<4x32x96xf32, #tpu.memory_space<vmem>>, vector<1x32x96xf32>
    %503 = vector.shape_cast %502 : vector<1x32x96xf32> to vector<32x96xf32>
    %cst_206 = arith.constant dense<0.000000e+00> : vector<10x96xf32>
    %504 = tpu.matmul %501, %503, %cst_206 {dimension_numbers = #tpu.dot_dimension_numbers<[1], [0], [0], [1], [0, 0, 1, 1], [], []>} : vector<10x32xf32>, vector<32x96xf32>, vector<10x96xf32> -> vector<10x96xf32>
    %c2_207 = arith.constant 2 : index
    %c0_208 = arith.constant 0 : index
    %c0_209 = arith.constant 0 : index
    %505 = vector.load %arg7[%c2_207, %c0_208, %c0_209] : memref<4x1x96xf32, #tpu.memory_space<vmem>>, vector<1x1x96xf32>
    %506 = vector.shape_cast %505 : vector<1x1x96xf32> to vector<1x96xf32>
    %507 = vector.broadcast %506 : vector<1x96xf32> to vector<10x96xf32>
    %508 = arith.addf %504, %507 : vector<10x96xf32>
    %509 = vector.extract_strided_slice %508 {offsets = [0, 0], sizes = [5, 32], strides = [1, 1]} : vector<10x96xf32> to vector<5x32xf32>
    %510 = vector.extract_strided_slice %508 {offsets = [0, 32], sizes = [5, 32], strides = [1, 1]} : vector<10x96xf32> to vector<5x32xf32>
    %511 = vector.extract_strided_slice %508 {offsets = [0, 64], sizes = [5, 32], strides = [1, 1]} : vector<10x96xf32> to vector<5x32xf32>
    %512 = vector.extract_strided_slice %509 {offsets = [0, 0], sizes = [5, 8], strides = [1, 1]} : vector<5x32xf32> to vector<5x8xf32>
    %513 = vector.extract_strided_slice %510 {offsets = [0, 0], sizes = [5, 8], strides = [1, 1]} : vector<5x32xf32> to vector<5x8xf32>
    %514 = vector.extract_strided_slice %511 {offsets = [0, 0], sizes = [5, 8], strides = [1, 1]} : vector<5x32xf32> to vector<5x8xf32>
    %cst_210 = arith.constant dense<0.000000e+00> : vector<5x5xf32>
    %515 = tpu.matmul %512, %513, %cst_210 {dimension_numbers = #tpu.dot_dimension_numbers<[1], [1], [0], [0], [0, 0, 1, 0], [], []>} : vector<5x8xf32>, vector<5x8xf32>, vector<5x5xf32> -> vector<5x5xf32>
    %cst_211 = arith.constant 0.353553385 : f32
    %516 = vector.broadcast %cst_211 : f32 to vector<5x5xf32>
    %517 = arith.mulf %515, %516 : vector<5x5xf32>
    %cst_212 = arith.constant dense<0xFF800000> : vector<5xf32>
    %518 = vector.multi_reduction <maximumf>, %517, %cst_212 [1] : vector<5x5xf32> to vector<5xf32>
    %519 = vector.shape_cast %518 : vector<5xf32> to vector<5x1xf32>
    %520 = vector.broadcast %519 : vector<5x1xf32> to vector<5x5xf32>
    %521 = arith.subf %517, %520 : vector<5x5xf32>
    %522 = math.exp %521 : vector<5x5xf32>
    %cst_213 = arith.constant dense<0.000000e+00> : vector<5xf32>
    %523 = vector.multi_reduction <add>, %522, %cst_213 [1] : vector<5x5xf32> to vector<5xf32>
    %524 = vector.shape_cast %523 : vector<5xf32> to vector<5x1xf32>
    %525 = tpu.reciprocal %524 {approx = true} : vector<5x1xf32> -> vector<5x1xf32>
    %526 = vector.broadcast %525 : vector<5x1xf32> to vector<5x5xf32>
    %527 = arith.mulf %522, %526 : vector<5x5xf32>
    %cst_214 = arith.constant dense<0.000000e+00> : vector<5x8xf32>
    %528 = tpu.matmul %527, %514, %cst_214 {dimension_numbers = #tpu.dot_dimension_numbers<[1], [0], [0], [1], [0, 0, 1, 1], [], []>} : vector<5x5xf32>, vector<5x8xf32>, vector<5x8xf32> -> vector<5x8xf32>
    %529 = vector.extract_strided_slice %509 {offsets = [0, 8], sizes = [5, 8], strides = [1, 1]} : vector<5x32xf32> to vector<5x8xf32>
    %530 = vector.extract_strided_slice %510 {offsets = [0, 8], sizes = [5, 8], strides = [1, 1]} : vector<5x32xf32> to vector<5x8xf32>
    %531 = vector.extract_strided_slice %511 {offsets = [0, 8], sizes = [5, 8], strides = [1, 1]} : vector<5x32xf32> to vector<5x8xf32>
    %cst_215 = arith.constant dense<0.000000e+00> : vector<5x5xf32>
    %532 = tpu.matmul %529, %530, %cst_215 {dimension_numbers = #tpu.dot_dimension_numbers<[1], [1], [0], [0], [0, 0, 1, 0], [], []>} : vector<5x8xf32>, vector<5x8xf32>, vector<5x5xf32> -> vector<5x5xf32>
    %cst_216 = arith.constant 0.353553385 : f32
    %533 = vector.broadcast %cst_216 : f32 to vector<5x5xf32>
    %534 = arith.mulf %532, %533 : vector<5x5xf32>
    %cst_217 = arith.constant dense<0xFF800000> : vector<5xf32>
    %535 = vector.multi_reduction <maximumf>, %534, %cst_217 [1] : vector<5x5xf32> to vector<5xf32>
    %536 = vector.shape_cast %535 : vector<5xf32> to vector<5x1xf32>
    %537 = vector.broadcast %536 : vector<5x1xf32> to vector<5x5xf32>
    %538 = arith.subf %534, %537 : vector<5x5xf32>
    %539 = math.exp %538 : vector<5x5xf32>
    %cst_218 = arith.constant dense<0.000000e+00> : vector<5xf32>
    %540 = vector.multi_reduction <add>, %539, %cst_218 [1] : vector<5x5xf32> to vector<5xf32>
    %541 = vector.shape_cast %540 : vector<5xf32> to vector<5x1xf32>
    %542 = tpu.reciprocal %541 {approx = true} : vector<5x1xf32> -> vector<5x1xf32>
    %543 = vector.broadcast %542 : vector<5x1xf32> to vector<5x5xf32>
    %544 = arith.mulf %539, %543 : vector<5x5xf32>
    %cst_219 = arith.constant dense<0.000000e+00> : vector<5x8xf32>
    %545 = tpu.matmul %544, %531, %cst_219 {dimension_numbers = #tpu.dot_dimension_numbers<[1], [0], [0], [1], [0, 0, 1, 1], [], []>} : vector<5x5xf32>, vector<5x8xf32>, vector<5x8xf32> -> vector<5x8xf32>
    %546 = vector.extract_strided_slice %509 {offsets = [0, 16], sizes = [5, 8], strides = [1, 1]} : vector<5x32xf32> to vector<5x8xf32>
    %547 = vector.extract_strided_slice %510 {offsets = [0, 16], sizes = [5, 8], strides = [1, 1]} : vector<5x32xf32> to vector<5x8xf32>
    %548 = vector.extract_strided_slice %511 {offsets = [0, 16], sizes = [5, 8], strides = [1, 1]} : vector<5x32xf32> to vector<5x8xf32>
    %cst_220 = arith.constant dense<0.000000e+00> : vector<5x5xf32>
    %549 = tpu.matmul %546, %547, %cst_220 {dimension_numbers = #tpu.dot_dimension_numbers<[1], [1], [0], [0], [0, 0, 1, 0], [], []>} : vector<5x8xf32>, vector<5x8xf32>, vector<5x5xf32> -> vector<5x5xf32>
    %cst_221 = arith.constant 0.353553385 : f32
    %550 = vector.broadcast %cst_221 : f32 to vector<5x5xf32>
    %551 = arith.mulf %549, %550 : vector<5x5xf32>
    %cst_222 = arith.constant dense<0xFF800000> : vector<5xf32>
    %552 = vector.multi_reduction <maximumf>, %551, %cst_222 [1] : vector<5x5xf32> to vector<5xf32>
    %553 = vector.shape_cast %552 : vector<5xf32> to vector<5x1xf32>
    %554 = vector.broadcast %553 : vector<5x1xf32> to vector<5x5xf32>
    %555 = arith.subf %551, %554 : vector<5x5xf32>
    %556 = math.exp %555 : vector<5x5xf32>
    %cst_223 = arith.constant dense<0.000000e+00> : vector<5xf32>
    %557 = vector.multi_reduction <add>, %556, %cst_223 [1] : vector<5x5xf32> to vector<5xf32>
    %558 = vector.shape_cast %557 : vector<5xf32> to vector<5x1xf32>
    %559 = tpu.reciprocal %558 {approx = true} : vector<5x1xf32> -> vector<5x1xf32>
    %560 = vector.broadcast %559 : vector<5x1xf32> to vector<5x5xf32>
    %561 = arith.mulf %556, %560 : vector<5x5xf32>
    %cst_224 = arith.constant dense<0.000000e+00> : vector<5x8xf32>
    %562 = tpu.matmul %561, %548, %cst_224 {dimension_numbers = #tpu.dot_dimension_numbers<[1], [0], [0], [1], [0, 0, 1, 1], [], []>} : vector<5x5xf32>, vector<5x8xf32>, vector<5x8xf32> -> vector<5x8xf32>
    %563 = vector.extract_strided_slice %509 {offsets = [0, 24], sizes = [5, 8], strides = [1, 1]} : vector<5x32xf32> to vector<5x8xf32>
    %564 = vector.extract_strided_slice %510 {offsets = [0, 24], sizes = [5, 8], strides = [1, 1]} : vector<5x32xf32> to vector<5x8xf32>
    %565 = vector.extract_strided_slice %511 {offsets = [0, 24], sizes = [5, 8], strides = [1, 1]} : vector<5x32xf32> to vector<5x8xf32>
    %cst_225 = arith.constant dense<0.000000e+00> : vector<5x5xf32>
    %566 = tpu.matmul %563, %564, %cst_225 {dimension_numbers = #tpu.dot_dimension_numbers<[1], [1], [0], [0], [0, 0, 1, 0], [], []>} : vector<5x8xf32>, vector<5x8xf32>, vector<5x5xf32> -> vector<5x5xf32>
    %cst_226 = arith.constant 0.353553385 : f32
    %567 = vector.broadcast %cst_226 : f32 to vector<5x5xf32>
    %568 = arith.mulf %566, %567 : vector<5x5xf32>
    %cst_227 = arith.constant dense<0xFF800000> : vector<5xf32>
    %569 = vector.multi_reduction <maximumf>, %568, %cst_227 [1] : vector<5x5xf32> to vector<5xf32>
    %570 = vector.shape_cast %569 : vector<5xf32> to vector<5x1xf32>
    %571 = vector.broadcast %570 : vector<5x1xf32> to vector<5x5xf32>
    %572 = arith.subf %568, %571 : vector<5x5xf32>
    %573 = math.exp %572 : vector<5x5xf32>
    %cst_228 = arith.constant dense<0.000000e+00> : vector<5xf32>
    %574 = vector.multi_reduction <add>, %573, %cst_228 [1] : vector<5x5xf32> to vector<5xf32>
    %575 = vector.shape_cast %574 : vector<5xf32> to vector<5x1xf32>
    %576 = tpu.reciprocal %575 {approx = true} : vector<5x1xf32> -> vector<5x1xf32>
    %577 = vector.broadcast %576 : vector<5x1xf32> to vector<5x5xf32>
    %578 = arith.mulf %573, %577 : vector<5x5xf32>
    %cst_229 = arith.constant dense<0.000000e+00> : vector<5x8xf32>
    %579 = tpu.matmul %578, %565, %cst_229 {dimension_numbers = #tpu.dot_dimension_numbers<[1], [0], [0], [1], [0, 0, 1, 1], [], []>} : vector<5x5xf32>, vector<5x8xf32>, vector<5x8xf32> -> vector<5x8xf32>
    %580 = tpu.concatenate %528, %545, %562, %579 in 1 : vector<5x8xf32>, vector<5x8xf32>, vector<5x8xf32>, vector<5x8xf32> -> vector<5x32xf32>
    %581 = vector.extract_strided_slice %508 {offsets = [5, 0], sizes = [5, 32], strides = [1, 1]} : vector<10x96xf32> to vector<5x32xf32>
    %582 = vector.extract_strided_slice %508 {offsets = [5, 32], sizes = [5, 32], strides = [1, 1]} : vector<10x96xf32> to vector<5x32xf32>
    %583 = vector.extract_strided_slice %508 {offsets = [5, 64], sizes = [5, 32], strides = [1, 1]} : vector<10x96xf32> to vector<5x32xf32>
    %584 = vector.extract_strided_slice %581 {offsets = [0, 0], sizes = [5, 8], strides = [1, 1]} : vector<5x32xf32> to vector<5x8xf32>
    %585 = vector.extract_strided_slice %582 {offsets = [0, 0], sizes = [5, 8], strides = [1, 1]} : vector<5x32xf32> to vector<5x8xf32>
    %586 = vector.extract_strided_slice %583 {offsets = [0, 0], sizes = [5, 8], strides = [1, 1]} : vector<5x32xf32> to vector<5x8xf32>
    %cst_230 = arith.constant dense<0.000000e+00> : vector<5x5xf32>
    %587 = tpu.matmul %584, %585, %cst_230 {dimension_numbers = #tpu.dot_dimension_numbers<[1], [1], [0], [0], [0, 0, 1, 0], [], []>} : vector<5x8xf32>, vector<5x8xf32>, vector<5x5xf32> -> vector<5x5xf32>
    %cst_231 = arith.constant 0.353553385 : f32
    %588 = vector.broadcast %cst_231 : f32 to vector<5x5xf32>
    %589 = arith.mulf %587, %588 : vector<5x5xf32>
    %cst_232 = arith.constant dense<0xFF800000> : vector<5xf32>
    %590 = vector.multi_reduction <maximumf>, %589, %cst_232 [1] : vector<5x5xf32> to vector<5xf32>
    %591 = vector.shape_cast %590 : vector<5xf32> to vector<5x1xf32>
    %592 = vector.broadcast %591 : vector<5x1xf32> to vector<5x5xf32>
    %593 = arith.subf %589, %592 : vector<5x5xf32>
    %594 = math.exp %593 : vector<5x5xf32>
    %cst_233 = arith.constant dense<0.000000e+00> : vector<5xf32>
    %595 = vector.multi_reduction <add>, %594, %cst_233 [1] : vector<5x5xf32> to vector<5xf32>
    %596 = vector.shape_cast %595 : vector<5xf32> to vector<5x1xf32>
    %597 = tpu.reciprocal %596 {approx = true} : vector<5x1xf32> -> vector<5x1xf32>
    %598 = vector.broadcast %597 : vector<5x1xf32> to vector<5x5xf32>
    %599 = arith.mulf %594, %598 : vector<5x5xf32>
    %cst_234 = arith.constant dense<0.000000e+00> : vector<5x8xf32>
    %600 = tpu.matmul %599, %586, %cst_234 {dimension_numbers = #tpu.dot_dimension_numbers<[1], [0], [0], [1], [0, 0, 1, 1], [], []>} : vector<5x5xf32>, vector<5x8xf32>, vector<5x8xf32> -> vector<5x8xf32>
    %601 = vector.extract_strided_slice %581 {offsets = [0, 8], sizes = [5, 8], strides = [1, 1]} : vector<5x32xf32> to vector<5x8xf32>
    %602 = vector.extract_strided_slice %582 {offsets = [0, 8], sizes = [5, 8], strides = [1, 1]} : vector<5x32xf32> to vector<5x8xf32>
    %603 = vector.extract_strided_slice %583 {offsets = [0, 8], sizes = [5, 8], strides = [1, 1]} : vector<5x32xf32> to vector<5x8xf32>
    %cst_235 = arith.constant dense<0.000000e+00> : vector<5x5xf32>
    %604 = tpu.matmul %601, %602, %cst_235 {dimension_numbers = #tpu.dot_dimension_numbers<[1], [1], [0], [0], [0, 0, 1, 0], [], []>} : vector<5x8xf32>, vector<5x8xf32>, vector<5x5xf32> -> vector<5x5xf32>
    %cst_236 = arith.constant 0.353553385 : f32
    %605 = vector.broadcast %cst_236 : f32 to vector<5x5xf32>
    %606 = arith.mulf %604, %605 : vector<5x5xf32>
    %cst_237 = arith.constant dense<0xFF800000> : vector<5xf32>
    %607 = vector.multi_reduction <maximumf>, %606, %cst_237 [1] : vector<5x5xf32> to vector<5xf32>
    %608 = vector.shape_cast %607 : vector<5xf32> to vector<5x1xf32>
    %609 = vector.broadcast %608 : vector<5x1xf32> to vector<5x5xf32>
    %610 = arith.subf %606, %609 : vector<5x5xf32>
    %611 = math.exp %610 : vector<5x5xf32>
    %cst_238 = arith.constant dense<0.000000e+00> : vector<5xf32>
    %612 = vector.multi_reduction <add>, %611, %cst_238 [1] : vector<5x5xf32> to vector<5xf32>
    %613 = vector.shape_cast %612 : vector<5xf32> to vector<5x1xf32>
    %614 = tpu.reciprocal %613 {approx = true} : vector<5x1xf32> -> vector<5x1xf32>
    %615 = vector.broadcast %614 : vector<5x1xf32> to vector<5x5xf32>
    %616 = arith.mulf %611, %615 : vector<5x5xf32>
    %cst_239 = arith.constant dense<0.000000e+00> : vector<5x8xf32>
    %617 = tpu.matmul %616, %603, %cst_239 {dimension_numbers = #tpu.dot_dimension_numbers<[1], [0], [0], [1], [0, 0, 1, 1], [], []>} : vector<5x5xf32>, vector<5x8xf32>, vector<5x8xf32> -> vector<5x8xf32>
    %618 = vector.extract_strided_slice %581 {offsets = [0, 16], sizes = [5, 8], strides = [1, 1]} : vector<5x32xf32> to vector<5x8xf32>
    %619 = vector.extract_strided_slice %582 {offsets = [0, 16], sizes = [5, 8], strides = [1, 1]} : vector<5x32xf32> to vector<5x8xf32>
    %620 = vector.extract_strided_slice %583 {offsets = [0, 16], sizes = [5, 8], strides = [1, 1]} : vector<5x32xf32> to vector<5x8xf32>
    %cst_240 = arith.constant dense<0.000000e+00> : vector<5x5xf32>
    %621 = tpu.matmul %618, %619, %cst_240 {dimension_numbers = #tpu.dot_dimension_numbers<[1], [1], [0], [0], [0, 0, 1, 0], [], []>} : vector<5x8xf32>, vector<5x8xf32>, vector<5x5xf32> -> vector<5x5xf32>
    %cst_241 = arith.constant 0.353553385 : f32
    %622 = vector.broadcast %cst_241 : f32 to vector<5x5xf32>
    %623 = arith.mulf %621, %622 : vector<5x5xf32>
    %cst_242 = arith.constant dense<0xFF800000> : vector<5xf32>
    %624 = vector.multi_reduction <maximumf>, %623, %cst_242 [1] : vector<5x5xf32> to vector<5xf32>
    %625 = vector.shape_cast %624 : vector<5xf32> to vector<5x1xf32>
    %626 = vector.broadcast %625 : vector<5x1xf32> to vector<5x5xf32>
    %627 = arith.subf %623, %626 : vector<5x5xf32>
    %628 = math.exp %627 : vector<5x5xf32>
    %cst_243 = arith.constant dense<0.000000e+00> : vector<5xf32>
    %629 = vector.multi_reduction <add>, %628, %cst_243 [1] : vector<5x5xf32> to vector<5xf32>
    %630 = vector.shape_cast %629 : vector<5xf32> to vector<5x1xf32>
    %631 = tpu.reciprocal %630 {approx = true} : vector<5x1xf32> -> vector<5x1xf32>
    %632 = vector.broadcast %631 : vector<5x1xf32> to vector<5x5xf32>
    %633 = arith.mulf %628, %632 : vector<5x5xf32>
    %cst_244 = arith.constant dense<0.000000e+00> : vector<5x8xf32>
    %634 = tpu.matmul %633, %620, %cst_244 {dimension_numbers = #tpu.dot_dimension_numbers<[1], [0], [0], [1], [0, 0, 1, 1], [], []>} : vector<5x5xf32>, vector<5x8xf32>, vector<5x8xf32> -> vector<5x8xf32>
    %635 = vector.extract_strided_slice %581 {offsets = [0, 24], sizes = [5, 8], strides = [1, 1]} : vector<5x32xf32> to vector<5x8xf32>
    %636 = vector.extract_strided_slice %582 {offsets = [0, 24], sizes = [5, 8], strides = [1, 1]} : vector<5x32xf32> to vector<5x8xf32>
    %637 = vector.extract_strided_slice %583 {offsets = [0, 24], sizes = [5, 8], strides = [1, 1]} : vector<5x32xf32> to vector<5x8xf32>
    %cst_245 = arith.constant dense<0.000000e+00> : vector<5x5xf32>
    %638 = tpu.matmul %635, %636, %cst_245 {dimension_numbers = #tpu.dot_dimension_numbers<[1], [1], [0], [0], [0, 0, 1, 0], [], []>} : vector<5x8xf32>, vector<5x8xf32>, vector<5x5xf32> -> vector<5x5xf32>
    %cst_246 = arith.constant 0.353553385 : f32
    %639 = vector.broadcast %cst_246 : f32 to vector<5x5xf32>
    %640 = arith.mulf %638, %639 : vector<5x5xf32>
    %cst_247 = arith.constant dense<0xFF800000> : vector<5xf32>
    %641 = vector.multi_reduction <maximumf>, %640, %cst_247 [1] : vector<5x5xf32> to vector<5xf32>
    %642 = vector.shape_cast %641 : vector<5xf32> to vector<5x1xf32>
    %643 = vector.broadcast %642 : vector<5x1xf32> to vector<5x5xf32>
    %644 = arith.subf %640, %643 : vector<5x5xf32>
    %645 = math.exp %644 : vector<5x5xf32>
    %cst_248 = arith.constant dense<0.000000e+00> : vector<5xf32>
    %646 = vector.multi_reduction <add>, %645, %cst_248 [1] : vector<5x5xf32> to vector<5xf32>
    %647 = vector.shape_cast %646 : vector<5xf32> to vector<5x1xf32>
    %648 = tpu.reciprocal %647 {approx = true} : vector<5x1xf32> -> vector<5x1xf32>
    %649 = vector.broadcast %648 : vector<5x1xf32> to vector<5x5xf32>
    %650 = arith.mulf %645, %649 : vector<5x5xf32>
    %cst_249 = arith.constant dense<0.000000e+00> : vector<5x8xf32>
    %651 = tpu.matmul %650, %637, %cst_249 {dimension_numbers = #tpu.dot_dimension_numbers<[1], [0], [0], [1], [0, 0, 1, 1], [], []>} : vector<5x5xf32>, vector<5x8xf32>, vector<5x8xf32> -> vector<5x8xf32>
    %652 = tpu.concatenate %600, %617, %634, %651 in 1 : vector<5x8xf32>, vector<5x8xf32>, vector<5x8xf32>, vector<5x8xf32> -> vector<5x32xf32>
    %653 = tpu.concatenate %580, %652 in 0 : vector<5x32xf32>, vector<5x32xf32> -> vector<10x32xf32>
    %c2_250 = arith.constant 2 : index
    %c0_251 = arith.constant 0 : index
    %c0_252 = arith.constant 0 : index
    %654 = vector.load %arg8[%c2_250, %c0_251, %c0_252] : memref<4x32x32xf32, #tpu.memory_space<vmem>>, vector<1x32x32xf32>
    %655 = vector.shape_cast %654 : vector<1x32x32xf32> to vector<32x32xf32>
    %cst_253 = arith.constant dense<0.000000e+00> : vector<10x32xf32>
    %656 = tpu.matmul %653, %655, %cst_253 {dimension_numbers = #tpu.dot_dimension_numbers<[1], [0], [0], [1], [0, 0, 1, 1], [], []>} : vector<10x32xf32>, vector<32x32xf32>, vector<10x32xf32> -> vector<10x32xf32>
    %657 = arith.addf %477, %656 : vector<10x32xf32>
    %c2_254 = arith.constant 2 : index
    %c0_255 = arith.constant 0 : index
    %c0_256 = arith.constant 0 : index
    %658 = vector.load %arg9[%c2_254, %c0_255, %c0_256] : memref<4x1x32xf32, #tpu.memory_space<vmem>>, vector<1x1x32xf32>
    %659 = vector.shape_cast %658 : vector<1x1x32xf32> to vector<1x32xf32>
    %660 = vector.broadcast %659 : vector<1x32xf32> to vector<10x32xf32>
    %661 = arith.addf %657, %660 : vector<10x32xf32>
    %c2_257 = arith.constant 2 : index
    %c0_258 = arith.constant 0 : index
    %c0_259 = arith.constant 0 : index
    %662 = vector.load %arg10[%c2_257, %c0_258, %c0_259] : memref<4x1x32xf32, #tpu.memory_space<vmem>>, vector<1x1x32xf32>
    %663 = vector.shape_cast %662 : vector<1x1x32xf32> to vector<1x32xf32>
    %c2_260 = arith.constant 2 : index
    %c0_261 = arith.constant 0 : index
    %c0_262 = arith.constant 0 : index
    %664 = vector.load %arg11[%c2_260, %c0_261, %c0_262] : memref<4x1x32xf32, #tpu.memory_space<vmem>>, vector<1x1x32xf32>
    %665 = vector.shape_cast %664 : vector<1x1x32xf32> to vector<1x32xf32>
    %cst_263 = arith.constant dense<0.000000e+00> : vector<10xf32>
    %666 = vector.multi_reduction <add>, %661, %cst_263 [1] : vector<10x32xf32> to vector<10xf32>
    %667 = vector.shape_cast %666 : vector<10xf32> to vector<10x1xf32>
    %cst_264 = arith.constant 3.200000e+01 : f32
    %668 = vector.broadcast %cst_264 : f32 to vector<10x1xf32>
    %669 = arith.divf %667, %668 : vector<10x1xf32>
    %670 = vector.broadcast %669 : vector<10x1xf32> to vector<10x32xf32>
    %671 = arith.subf %661, %670 : vector<10x32xf32>
    %672 = arith.mulf %671, %671 : vector<10x32xf32>
    %cst_265 = arith.constant dense<0.000000e+00> : vector<10xf32>
    %673 = vector.multi_reduction <add>, %672, %cst_265 [1] : vector<10x32xf32> to vector<10xf32>
    %674 = vector.shape_cast %673 : vector<10xf32> to vector<10x1xf32>
    %cst_266 = arith.constant 3.200000e+01 : f32
    %675 = vector.broadcast %cst_266 : f32 to vector<10x1xf32>
    %676 = arith.divf %674, %675 : vector<10x1xf32>
    %cst_267 = arith.constant 9.99999997E-7 : f32
    %677 = vector.broadcast %cst_267 : f32 to vector<10x1xf32>
    %678 = arith.addf %676, %677 : vector<10x1xf32>
    %679 = math.rsqrt %678 : vector<10x1xf32>
    %680 = vector.broadcast %679 : vector<10x1xf32> to vector<10x32xf32>
    %681 = arith.mulf %671, %680 : vector<10x32xf32>
    %682 = vector.broadcast %663 : vector<1x32xf32> to vector<10x32xf32>
    %683 = arith.mulf %681, %682 : vector<10x32xf32>
    %684 = vector.broadcast %665 : vector<1x32xf32> to vector<10x32xf32>
    %685 = arith.addf %683, %684 : vector<10x32xf32>
    %c2_268 = arith.constant 2 : index
    %c0_269 = arith.constant 0 : index
    %c0_270 = arith.constant 0 : index
    %686 = vector.load %arg12[%c2_268, %c0_269, %c0_270] : memref<4x32x64xf32, #tpu.memory_space<vmem>>, vector<1x32x64xf32>
    %687 = vector.shape_cast %686 : vector<1x32x64xf32> to vector<32x64xf32>
    %cst_271 = arith.constant dense<0.000000e+00> : vector<10x64xf32>
    %688 = tpu.matmul %685, %687, %cst_271 {dimension_numbers = #tpu.dot_dimension_numbers<[1], [0], [0], [1], [0, 0, 1, 1], [], []>} : vector<10x32xf32>, vector<32x64xf32>, vector<10x64xf32> -> vector<10x64xf32>
    %c2_272 = arith.constant 2 : index
    %c0_273 = arith.constant 0 : index
    %c0_274 = arith.constant 0 : index
    %689 = vector.load %arg13[%c2_272, %c0_273, %c0_274] : memref<4x1x64xf32, #tpu.memory_space<vmem>>, vector<1x1x64xf32>
    %690 = vector.shape_cast %689 : vector<1x1x64xf32> to vector<1x64xf32>
    %691 = vector.broadcast %690 : vector<1x64xf32> to vector<10x64xf32>
    %692 = arith.addf %688, %691 : vector<10x64xf32>
    %693 = arith.mulf %692, %692 : vector<10x64xf32>
    %694 = arith.mulf %692, %693 : vector<10x64xf32>
    %cst_275 = arith.constant 4.471500e-02 : f32
    %695 = vector.broadcast %cst_275 : f32 to vector<10x64xf32>
    %696 = arith.mulf %695, %694 : vector<10x64xf32>
    %697 = arith.addf %692, %696 : vector<10x64xf32>
    %cst_276 = arith.constant 0.797884583 : f32
    %698 = vector.broadcast %cst_276 : f32 to vector<10x64xf32>
    %699 = arith.mulf %698, %697 : vector<10x64xf32>
    %700 = math.tanh %699 : vector<10x64xf32>
    %cst_277 = arith.constant 1.000000e+00 : f32
    %701 = vector.broadcast %cst_277 : f32 to vector<10x64xf32>
    %702 = arith.addf %701, %700 : vector<10x64xf32>
    %cst_278 = arith.constant 5.000000e-01 : f32
    %703 = vector.broadcast %cst_278 : f32 to vector<10x64xf32>
    %704 = arith.mulf %703, %702 : vector<10x64xf32>
    %705 = arith.mulf %692, %704 : vector<10x64xf32>
    %c2_279 = arith.constant 2 : index
    %c0_280 = arith.constant 0 : index
    %c0_281 = arith.constant 0 : index
    %706 = vector.load %arg14[%c2_279, %c0_280, %c0_281] : memref<4x64x32xf32, #tpu.memory_space<vmem>>, vector<1x64x32xf32>
    %707 = vector.shape_cast %706 : vector<1x64x32xf32> to vector<64x32xf32>
    %cst_282 = arith.constant dense<0.000000e+00> : vector<10x32xf32>
    %708 = tpu.matmul %705, %707, %cst_282 {dimension_numbers = #tpu.dot_dimension_numbers<[1], [0], [0], [1], [0, 0, 1, 1], [], []>} : vector<10x64xf32>, vector<64x32xf32>, vector<10x32xf32> -> vector<10x32xf32>
    %709 = arith.addf %661, %708 : vector<10x32xf32>
    %c2_283 = arith.constant 2 : index
    %c0_284 = arith.constant 0 : index
    %c0_285 = arith.constant 0 : index
    %710 = vector.load %arg15[%c2_283, %c0_284, %c0_285] : memref<4x1x32xf32, #tpu.memory_space<vmem>>, vector<1x1x32xf32>
    %711 = vector.shape_cast %710 : vector<1x1x32xf32> to vector<1x32xf32>
    %712 = vector.broadcast %711 : vector<1x32xf32> to vector<10x32xf32>
    %713 = arith.addf %709, %712 : vector<10x32xf32>
    %c3 = arith.constant 3 : index
    %c0_286 = arith.constant 0 : index
    %c0_287 = arith.constant 0 : index
    %714 = vector.load %arg4[%c3, %c0_286, %c0_287] : memref<4x1x32xf32, #tpu.memory_space<vmem>>, vector<1x1x32xf32>
    %715 = vector.shape_cast %714 : vector<1x1x32xf32> to vector<1x32xf32>
    %c3_288 = arith.constant 3 : index
    %c0_289 = arith.constant 0 : index
    %c0_290 = arith.constant 0 : index
    %716 = vector.load %arg5[%c3_288, %c0_289, %c0_290] : memref<4x1x32xf32, #tpu.memory_space<vmem>>, vector<1x1x32xf32>
    %717 = vector.shape_cast %716 : vector<1x1x32xf32> to vector<1x32xf32>
    %cst_291 = arith.constant dense<0.000000e+00> : vector<10xf32>
    %718 = vector.multi_reduction <add>, %713, %cst_291 [1] : vector<10x32xf32> to vector<10xf32>
    %719 = vector.shape_cast %718 : vector<10xf32> to vector<10x1xf32>
    %cst_292 = arith.constant 3.200000e+01 : f32
    %720 = vector.broadcast %cst_292 : f32 to vector<10x1xf32>
    %721 = arith.divf %719, %720 : vector<10x1xf32>
    %722 = vector.broadcast %721 : vector<10x1xf32> to vector<10x32xf32>
    %723 = arith.subf %713, %722 : vector<10x32xf32>
    %724 = arith.mulf %723, %723 : vector<10x32xf32>
    %cst_293 = arith.constant dense<0.000000e+00> : vector<10xf32>
    %725 = vector.multi_reduction <add>, %724, %cst_293 [1] : vector<10x32xf32> to vector<10xf32>
    %726 = vector.shape_cast %725 : vector<10xf32> to vector<10x1xf32>
    %cst_294 = arith.constant 3.200000e+01 : f32
    %727 = vector.broadcast %cst_294 : f32 to vector<10x1xf32>
    %728 = arith.divf %726, %727 : vector<10x1xf32>
    %cst_295 = arith.constant 9.99999997E-7 : f32
    %729 = vector.broadcast %cst_295 : f32 to vector<10x1xf32>
    %730 = arith.addf %728, %729 : vector<10x1xf32>
    %731 = math.rsqrt %730 : vector<10x1xf32>
    %732 = vector.broadcast %731 : vector<10x1xf32> to vector<10x32xf32>
    %733 = arith.mulf %723, %732 : vector<10x32xf32>
    %734 = vector.broadcast %715 : vector<1x32xf32> to vector<10x32xf32>
    %735 = arith.mulf %733, %734 : vector<10x32xf32>
    %736 = vector.broadcast %717 : vector<1x32xf32> to vector<10x32xf32>
    %737 = arith.addf %735, %736 : vector<10x32xf32>
    %c3_296 = arith.constant 3 : index
    %c0_297 = arith.constant 0 : index
    %c0_298 = arith.constant 0 : index
    %738 = vector.load %arg6[%c3_296, %c0_297, %c0_298] : memref<4x32x96xf32, #tpu.memory_space<vmem>>, vector<1x32x96xf32>
    %739 = vector.shape_cast %738 : vector<1x32x96xf32> to vector<32x96xf32>
    %cst_299 = arith.constant dense<0.000000e+00> : vector<10x96xf32>
    %740 = tpu.matmul %737, %739, %cst_299 {dimension_numbers = #tpu.dot_dimension_numbers<[1], [0], [0], [1], [0, 0, 1, 1], [], []>} : vector<10x32xf32>, vector<32x96xf32>, vector<10x96xf32> -> vector<10x96xf32>
    %c3_300 = arith.constant 3 : index
    %c0_301 = arith.constant 0 : index
    %c0_302 = arith.constant 0 : index
    %741 = vector.load %arg7[%c3_300, %c0_301, %c0_302] : memref<4x1x96xf32, #tpu.memory_space<vmem>>, vector<1x1x96xf32>
    %742 = vector.shape_cast %741 : vector<1x1x96xf32> to vector<1x96xf32>
    %743 = vector.broadcast %742 : vector<1x96xf32> to vector<10x96xf32>
    %744 = arith.addf %740, %743 : vector<10x96xf32>
    %745 = vector.extract_strided_slice %744 {offsets = [0, 0], sizes = [5, 32], strides = [1, 1]} : vector<10x96xf32> to vector<5x32xf32>
    %746 = vector.extract_strided_slice %744 {offsets = [0, 32], sizes = [5, 32], strides = [1, 1]} : vector<10x96xf32> to vector<5x32xf32>
    %747 = vector.extract_strided_slice %744 {offsets = [0, 64], sizes = [5, 32], strides = [1, 1]} : vector<10x96xf32> to vector<5x32xf32>
    %748 = vector.extract_strided_slice %745 {offsets = [0, 0], sizes = [5, 8], strides = [1, 1]} : vector<5x32xf32> to vector<5x8xf32>
    %749 = vector.extract_strided_slice %746 {offsets = [0, 0], sizes = [5, 8], strides = [1, 1]} : vector<5x32xf32> to vector<5x8xf32>
    %750 = vector.extract_strided_slice %747 {offsets = [0, 0], sizes = [5, 8], strides = [1, 1]} : vector<5x32xf32> to vector<5x8xf32>
    %cst_303 = arith.constant dense<0.000000e+00> : vector<5x5xf32>
    %751 = tpu.matmul %748, %749, %cst_303 {dimension_numbers = #tpu.dot_dimension_numbers<[1], [1], [0], [0], [0, 0, 1, 0], [], []>} : vector<5x8xf32>, vector<5x8xf32>, vector<5x5xf32> -> vector<5x5xf32>
    %cst_304 = arith.constant 0.353553385 : f32
    %752 = vector.broadcast %cst_304 : f32 to vector<5x5xf32>
    %753 = arith.mulf %751, %752 : vector<5x5xf32>
    %cst_305 = arith.constant dense<0xFF800000> : vector<5xf32>
    %754 = vector.multi_reduction <maximumf>, %753, %cst_305 [1] : vector<5x5xf32> to vector<5xf32>
    %755 = vector.shape_cast %754 : vector<5xf32> to vector<5x1xf32>
    %756 = vector.broadcast %755 : vector<5x1xf32> to vector<5x5xf32>
    %757 = arith.subf %753, %756 : vector<5x5xf32>
    %758 = math.exp %757 : vector<5x5xf32>
    %cst_306 = arith.constant dense<0.000000e+00> : vector<5xf32>
    %759 = vector.multi_reduction <add>, %758, %cst_306 [1] : vector<5x5xf32> to vector<5xf32>
    %760 = vector.shape_cast %759 : vector<5xf32> to vector<5x1xf32>
    %761 = tpu.reciprocal %760 {approx = true} : vector<5x1xf32> -> vector<5x1xf32>
    %762 = vector.broadcast %761 : vector<5x1xf32> to vector<5x5xf32>
    %763 = arith.mulf %758, %762 : vector<5x5xf32>
    %cst_307 = arith.constant dense<0.000000e+00> : vector<5x8xf32>
    %764 = tpu.matmul %763, %750, %cst_307 {dimension_numbers = #tpu.dot_dimension_numbers<[1], [0], [0], [1], [0, 0, 1, 1], [], []>} : vector<5x5xf32>, vector<5x8xf32>, vector<5x8xf32> -> vector<5x8xf32>
    %765 = vector.extract_strided_slice %745 {offsets = [0, 8], sizes = [5, 8], strides = [1, 1]} : vector<5x32xf32> to vector<5x8xf32>
    %766 = vector.extract_strided_slice %746 {offsets = [0, 8], sizes = [5, 8], strides = [1, 1]} : vector<5x32xf32> to vector<5x8xf32>
    %767 = vector.extract_strided_slice %747 {offsets = [0, 8], sizes = [5, 8], strides = [1, 1]} : vector<5x32xf32> to vector<5x8xf32>
    %cst_308 = arith.constant dense<0.000000e+00> : vector<5x5xf32>
    %768 = tpu.matmul %765, %766, %cst_308 {dimension_numbers = #tpu.dot_dimension_numbers<[1], [1], [0], [0], [0, 0, 1, 0], [], []>} : vector<5x8xf32>, vector<5x8xf32>, vector<5x5xf32> -> vector<5x5xf32>
    %cst_309 = arith.constant 0.353553385 : f32
    %769 = vector.broadcast %cst_309 : f32 to vector<5x5xf32>
    %770 = arith.mulf %768, %769 : vector<5x5xf32>
    %cst_310 = arith.constant dense<0xFF800000> : vector<5xf32>
    %771 = vector.multi_reduction <maximumf>, %770, %cst_310 [1] : vector<5x5xf32> to vector<5xf32>
    %772 = vector.shape_cast %771 : vector<5xf32> to vector<5x1xf32>
    %773 = vector.broadcast %772 : vector<5x1xf32> to vector<5x5xf32>
    %774 = arith.subf %770, %773 : vector<5x5xf32>
    %775 = math.exp %774 : vector<5x5xf32>
    %cst_311 = arith.constant dense<0.000000e+00> : vector<5xf32>
    %776 = vector.multi_reduction <add>, %775, %cst_311 [1] : vector<5x5xf32> to vector<5xf32>
    %777 = vector.shape_cast %776 : vector<5xf32> to vector<5x1xf32>
    %778 = tpu.reciprocal %777 {approx = true} : vector<5x1xf32> -> vector<5x1xf32>
    %779 = vector.broadcast %778 : vector<5x1xf32> to vector<5x5xf32>
    %780 = arith.mulf %775, %779 : vector<5x5xf32>
    %cst_312 = arith.constant dense<0.000000e+00> : vector<5x8xf32>
    %781 = tpu.matmul %780, %767, %cst_312 {dimension_numbers = #tpu.dot_dimension_numbers<[1], [0], [0], [1], [0, 0, 1, 1], [], []>} : vector<5x5xf32>, vector<5x8xf32>, vector<5x8xf32> -> vector<5x8xf32>
    %782 = vector.extract_strided_slice %745 {offsets = [0, 16], sizes = [5, 8], strides = [1, 1]} : vector<5x32xf32> to vector<5x8xf32>
    %783 = vector.extract_strided_slice %746 {offsets = [0, 16], sizes = [5, 8], strides = [1, 1]} : vector<5x32xf32> to vector<5x8xf32>
    %784 = vector.extract_strided_slice %747 {offsets = [0, 16], sizes = [5, 8], strides = [1, 1]} : vector<5x32xf32> to vector<5x8xf32>
    %cst_313 = arith.constant dense<0.000000e+00> : vector<5x5xf32>
    %785 = tpu.matmul %782, %783, %cst_313 {dimension_numbers = #tpu.dot_dimension_numbers<[1], [1], [0], [0], [0, 0, 1, 0], [], []>} : vector<5x8xf32>, vector<5x8xf32>, vector<5x5xf32> -> vector<5x5xf32>
    %cst_314 = arith.constant 0.353553385 : f32
    %786 = vector.broadcast %cst_314 : f32 to vector<5x5xf32>
    %787 = arith.mulf %785, %786 : vector<5x5xf32>
    %cst_315 = arith.constant dense<0xFF800000> : vector<5xf32>
    %788 = vector.multi_reduction <maximumf>, %787, %cst_315 [1] : vector<5x5xf32> to vector<5xf32>
    %789 = vector.shape_cast %788 : vector<5xf32> to vector<5x1xf32>
    %790 = vector.broadcast %789 : vector<5x1xf32> to vector<5x5xf32>
    %791 = arith.subf %787, %790 : vector<5x5xf32>
    %792 = math.exp %791 : vector<5x5xf32>
    %cst_316 = arith.constant dense<0.000000e+00> : vector<5xf32>
    %793 = vector.multi_reduction <add>, %792, %cst_316 [1] : vector<5x5xf32> to vector<5xf32>
    %794 = vector.shape_cast %793 : vector<5xf32> to vector<5x1xf32>
    %795 = tpu.reciprocal %794 {approx = true} : vector<5x1xf32> -> vector<5x1xf32>
    %796 = vector.broadcast %795 : vector<5x1xf32> to vector<5x5xf32>
    %797 = arith.mulf %792, %796 : vector<5x5xf32>
    %cst_317 = arith.constant dense<0.000000e+00> : vector<5x8xf32>
    %798 = tpu.matmul %797, %784, %cst_317 {dimension_numbers = #tpu.dot_dimension_numbers<[1], [0], [0], [1], [0, 0, 1, 1], [], []>} : vector<5x5xf32>, vector<5x8xf32>, vector<5x8xf32> -> vector<5x8xf32>
    %799 = vector.extract_strided_slice %745 {offsets = [0, 24], sizes = [5, 8], strides = [1, 1]} : vector<5x32xf32> to vector<5x8xf32>
    %800 = vector.extract_strided_slice %746 {offsets = [0, 24], sizes = [5, 8], strides = [1, 1]} : vector<5x32xf32> to vector<5x8xf32>
    %801 = vector.extract_strided_slice %747 {offsets = [0, 24], sizes = [5, 8], strides = [1, 1]} : vector<5x32xf32> to vector<5x8xf32>
    %cst_318 = arith.constant dense<0.000000e+00> : vector<5x5xf32>
    %802 = tpu.matmul %799, %800, %cst_318 {dimension_numbers = #tpu.dot_dimension_numbers<[1], [1], [0], [0], [0, 0, 1, 0], [], []>} : vector<5x8xf32>, vector<5x8xf32>, vector<5x5xf32> -> vector<5x5xf32>
    %cst_319 = arith.constant 0.353553385 : f32
    %803 = vector.broadcast %cst_319 : f32 to vector<5x5xf32>
    %804 = arith.mulf %802, %803 : vector<5x5xf32>
    %cst_320 = arith.constant dense<0xFF800000> : vector<5xf32>
    %805 = vector.multi_reduction <maximumf>, %804, %cst_320 [1] : vector<5x5xf32> to vector<5xf32>
    %806 = vector.shape_cast %805 : vector<5xf32> to vector<5x1xf32>
    %807 = vector.broadcast %806 : vector<5x1xf32> to vector<5x5xf32>
    %808 = arith.subf %804, %807 : vector<5x5xf32>
    %809 = math.exp %808 : vector<5x5xf32>
    %cst_321 = arith.constant dense<0.000000e+00> : vector<5xf32>
    %810 = vector.multi_reduction <add>, %809, %cst_321 [1] : vector<5x5xf32> to vector<5xf32>
    %811 = vector.shape_cast %810 : vector<5xf32> to vector<5x1xf32>
    %812 = tpu.reciprocal %811 {approx = true} : vector<5x1xf32> -> vector<5x1xf32>
    %813 = vector.broadcast %812 : vector<5x1xf32> to vector<5x5xf32>
    %814 = arith.mulf %809, %813 : vector<5x5xf32>
    %cst_322 = arith.constant dense<0.000000e+00> : vector<5x8xf32>
    %815 = tpu.matmul %814, %801, %cst_322 {dimension_numbers = #tpu.dot_dimension_numbers<[1], [0], [0], [1], [0, 0, 1, 1], [], []>} : vector<5x5xf32>, vector<5x8xf32>, vector<5x8xf32> -> vector<5x8xf32>
    %816 = tpu.concatenate %764, %781, %798, %815 in 1 : vector<5x8xf32>, vector<5x8xf32>, vector<5x8xf32>, vector<5x8xf32> -> vector<5x32xf32>
    %817 = vector.extract_strided_slice %744 {offsets = [5, 0], sizes = [5, 32], strides = [1, 1]} : vector<10x96xf32> to vector<5x32xf32>
    %818 = vector.extract_strided_slice %744 {offsets = [5, 32], sizes = [5, 32], strides = [1, 1]} : vector<10x96xf32> to vector<5x32xf32>
    %819 = vector.extract_strided_slice %744 {offsets = [5, 64], sizes = [5, 32], strides = [1, 1]} : vector<10x96xf32> to vector<5x32xf32>
    %820 = vector.extract_strided_slice %817 {offsets = [0, 0], sizes = [5, 8], strides = [1, 1]} : vector<5x32xf32> to vector<5x8xf32>
    %821 = vector.extract_strided_slice %818 {offsets = [0, 0], sizes = [5, 8], strides = [1, 1]} : vector<5x32xf32> to vector<5x8xf32>
    %822 = vector.extract_strided_slice %819 {offsets = [0, 0], sizes = [5, 8], strides = [1, 1]} : vector<5x32xf32> to vector<5x8xf32>
    %cst_323 = arith.constant dense<0.000000e+00> : vector<5x5xf32>
    %823 = tpu.matmul %820, %821, %cst_323 {dimension_numbers = #tpu.dot_dimension_numbers<[1], [1], [0], [0], [0, 0, 1, 0], [], []>} : vector<5x8xf32>, vector<5x8xf32>, vector<5x5xf32> -> vector<5x5xf32>
    %cst_324 = arith.constant 0.353553385 : f32
    %824 = vector.broadcast %cst_324 : f32 to vector<5x5xf32>
    %825 = arith.mulf %823, %824 : vector<5x5xf32>
    %cst_325 = arith.constant dense<0xFF800000> : vector<5xf32>
    %826 = vector.multi_reduction <maximumf>, %825, %cst_325 [1] : vector<5x5xf32> to vector<5xf32>
    %827 = vector.shape_cast %826 : vector<5xf32> to vector<5x1xf32>
    %828 = vector.broadcast %827 : vector<5x1xf32> to vector<5x5xf32>
    %829 = arith.subf %825, %828 : vector<5x5xf32>
    %830 = math.exp %829 : vector<5x5xf32>
    %cst_326 = arith.constant dense<0.000000e+00> : vector<5xf32>
    %831 = vector.multi_reduction <add>, %830, %cst_326 [1] : vector<5x5xf32> to vector<5xf32>
    %832 = vector.shape_cast %831 : vector<5xf32> to vector<5x1xf32>
    %833 = tpu.reciprocal %832 {approx = true} : vector<5x1xf32> -> vector<5x1xf32>
    %834 = vector.broadcast %833 : vector<5x1xf32> to vector<5x5xf32>
    %835 = arith.mulf %830, %834 : vector<5x5xf32>
    %cst_327 = arith.constant dense<0.000000e+00> : vector<5x8xf32>
    %836 = tpu.matmul %835, %822, %cst_327 {dimension_numbers = #tpu.dot_dimension_numbers<[1], [0], [0], [1], [0, 0, 1, 1], [], []>} : vector<5x5xf32>, vector<5x8xf32>, vector<5x8xf32> -> vector<5x8xf32>
    %837 = vector.extract_strided_slice %817 {offsets = [0, 8], sizes = [5, 8], strides = [1, 1]} : vector<5x32xf32> to vector<5x8xf32>
    %838 = vector.extract_strided_slice %818 {offsets = [0, 8], sizes = [5, 8], strides = [1, 1]} : vector<5x32xf32> to vector<5x8xf32>
    %839 = vector.extract_strided_slice %819 {offsets = [0, 8], sizes = [5, 8], strides = [1, 1]} : vector<5x32xf32> to vector<5x8xf32>
    %cst_328 = arith.constant dense<0.000000e+00> : vector<5x5xf32>
    %840 = tpu.matmul %837, %838, %cst_328 {dimension_numbers = #tpu.dot_dimension_numbers<[1], [1], [0], [0], [0, 0, 1, 0], [], []>} : vector<5x8xf32>, vector<5x8xf32>, vector<5x5xf32> -> vector<5x5xf32>
    %cst_329 = arith.constant 0.353553385 : f32
    %841 = vector.broadcast %cst_329 : f32 to vector<5x5xf32>
    %842 = arith.mulf %840, %841 : vector<5x5xf32>
    %cst_330 = arith.constant dense<0xFF800000> : vector<5xf32>
    %843 = vector.multi_reduction <maximumf>, %842, %cst_330 [1] : vector<5x5xf32> to vector<5xf32>
    %844 = vector.shape_cast %843 : vector<5xf32> to vector<5x1xf32>
    %845 = vector.broadcast %844 : vector<5x1xf32> to vector<5x5xf32>
    %846 = arith.subf %842, %845 : vector<5x5xf32>
    %847 = math.exp %846 : vector<5x5xf32>
    %cst_331 = arith.constant dense<0.000000e+00> : vector<5xf32>
    %848 = vector.multi_reduction <add>, %847, %cst_331 [1] : vector<5x5xf32> to vector<5xf32>
    %849 = vector.shape_cast %848 : vector<5xf32> to vector<5x1xf32>
    %850 = tpu.reciprocal %849 {approx = true} : vector<5x1xf32> -> vector<5x1xf32>
    %851 = vector.broadcast %850 : vector<5x1xf32> to vector<5x5xf32>
    %852 = arith.mulf %847, %851 : vector<5x5xf32>
    %cst_332 = arith.constant dense<0.000000e+00> : vector<5x8xf32>
    %853 = tpu.matmul %852, %839, %cst_332 {dimension_numbers = #tpu.dot_dimension_numbers<[1], [0], [0], [1], [0, 0, 1, 1], [], []>} : vector<5x5xf32>, vector<5x8xf32>, vector<5x8xf32> -> vector<5x8xf32>
    %854 = vector.extract_strided_slice %817 {offsets = [0, 16], sizes = [5, 8], strides = [1, 1]} : vector<5x32xf32> to vector<5x8xf32>
    %855 = vector.extract_strided_slice %818 {offsets = [0, 16], sizes = [5, 8], strides = [1, 1]} : vector<5x32xf32> to vector<5x8xf32>
    %856 = vector.extract_strided_slice %819 {offsets = [0, 16], sizes = [5, 8], strides = [1, 1]} : vector<5x32xf32> to vector<5x8xf32>
    %cst_333 = arith.constant dense<0.000000e+00> : vector<5x5xf32>
    %857 = tpu.matmul %854, %855, %cst_333 {dimension_numbers = #tpu.dot_dimension_numbers<[1], [1], [0], [0], [0, 0, 1, 0], [], []>} : vector<5x8xf32>, vector<5x8xf32>, vector<5x5xf32> -> vector<5x5xf32>
    %cst_334 = arith.constant 0.353553385 : f32
    %858 = vector.broadcast %cst_334 : f32 to vector<5x5xf32>
    %859 = arith.mulf %857, %858 : vector<5x5xf32>
    %cst_335 = arith.constant dense<0xFF800000> : vector<5xf32>
    %860 = vector.multi_reduction <maximumf>, %859, %cst_335 [1] : vector<5x5xf32> to vector<5xf32>
    %861 = vector.shape_cast %860 : vector<5xf32> to vector<5x1xf32>
    %862 = vector.broadcast %861 : vector<5x1xf32> to vector<5x5xf32>
    %863 = arith.subf %859, %862 : vector<5x5xf32>
    %864 = math.exp %863 : vector<5x5xf32>
    %cst_336 = arith.constant dense<0.000000e+00> : vector<5xf32>
    %865 = vector.multi_reduction <add>, %864, %cst_336 [1] : vector<5x5xf32> to vector<5xf32>
    %866 = vector.shape_cast %865 : vector<5xf32> to vector<5x1xf32>
    %867 = tpu.reciprocal %866 {approx = true} : vector<5x1xf32> -> vector<5x1xf32>
    %868 = vector.broadcast %867 : vector<5x1xf32> to vector<5x5xf32>
    %869 = arith.mulf %864, %868 : vector<5x5xf32>
    %cst_337 = arith.constant dense<0.000000e+00> : vector<5x8xf32>
    %870 = tpu.matmul %869, %856, %cst_337 {dimension_numbers = #tpu.dot_dimension_numbers<[1], [0], [0], [1], [0, 0, 1, 1], [], []>} : vector<5x5xf32>, vector<5x8xf32>, vector<5x8xf32> -> vector<5x8xf32>
    %871 = vector.extract_strided_slice %817 {offsets = [0, 24], sizes = [5, 8], strides = [1, 1]} : vector<5x32xf32> to vector<5x8xf32>
    %872 = vector.extract_strided_slice %818 {offsets = [0, 24], sizes = [5, 8], strides = [1, 1]} : vector<5x32xf32> to vector<5x8xf32>
    %873 = vector.extract_strided_slice %819 {offsets = [0, 24], sizes = [5, 8], strides = [1, 1]} : vector<5x32xf32> to vector<5x8xf32>
    %cst_338 = arith.constant dense<0.000000e+00> : vector<5x5xf32>
    %874 = tpu.matmul %871, %872, %cst_338 {dimension_numbers = #tpu.dot_dimension_numbers<[1], [1], [0], [0], [0, 0, 1, 0], [], []>} : vector<5x8xf32>, vector<5x8xf32>, vector<5x5xf32> -> vector<5x5xf32>
    %cst_339 = arith.constant 0.353553385 : f32
    %875 = vector.broadcast %cst_339 : f32 to vector<5x5xf32>
    %876 = arith.mulf %874, %875 : vector<5x5xf32>
    %cst_340 = arith.constant dense<0xFF800000> : vector<5xf32>
    %877 = vector.multi_reduction <maximumf>, %876, %cst_340 [1] : vector<5x5xf32> to vector<5xf32>
    %878 = vector.shape_cast %877 : vector<5xf32> to vector<5x1xf32>
    %879 = vector.broadcast %878 : vector<5x1xf32> to vector<5x5xf32>
    %880 = arith.subf %876, %879 : vector<5x5xf32>
    %881 = math.exp %880 : vector<5x5xf32>
    %cst_341 = arith.constant dense<0.000000e+00> : vector<5xf32>
    %882 = vector.multi_reduction <add>, %881, %cst_341 [1] : vector<5x5xf32> to vector<5xf32>
    %883 = vector.shape_cast %882 : vector<5xf32> to vector<5x1xf32>
    %884 = tpu.reciprocal %883 {approx = true} : vector<5x1xf32> -> vector<5x1xf32>
    %885 = vector.broadcast %884 : vector<5x1xf32> to vector<5x5xf32>
    %886 = arith.mulf %881, %885 : vector<5x5xf32>
    %cst_342 = arith.constant dense<0.000000e+00> : vector<5x8xf32>
    %887 = tpu.matmul %886, %873, %cst_342 {dimension_numbers = #tpu.dot_dimension_numbers<[1], [0], [0], [1], [0, 0, 1, 1], [], []>} : vector<5x5xf32>, vector<5x8xf32>, vector<5x8xf32> -> vector<5x8xf32>
    %888 = tpu.concatenate %836, %853, %870, %887 in 1 : vector<5x8xf32>, vector<5x8xf32>, vector<5x8xf32>, vector<5x8xf32> -> vector<5x32xf32>
    %889 = tpu.concatenate %816, %888 in 0 : vector<5x32xf32>, vector<5x32xf32> -> vector<10x32xf32>
    %c3_343 = arith.constant 3 : index
    %c0_344 = arith.constant 0 : index
    %c0_345 = arith.constant 0 : index
    %890 = vector.load %arg8[%c3_343, %c0_344, %c0_345] : memref<4x32x32xf32, #tpu.memory_space<vmem>>, vector<1x32x32xf32>
    %891 = vector.shape_cast %890 : vector<1x32x32xf32> to vector<32x32xf32>
    %cst_346 = arith.constant dense<0.000000e+00> : vector<10x32xf32>
    %892 = tpu.matmul %889, %891, %cst_346 {dimension_numbers = #tpu.dot_dimension_numbers<[1], [0], [0], [1], [0, 0, 1, 1], [], []>} : vector<10x32xf32>, vector<32x32xf32>, vector<10x32xf32> -> vector<10x32xf32>
    %893 = arith.addf %713, %892 : vector<10x32xf32>
    %c3_347 = arith.constant 3 : index
    %c0_348 = arith.constant 0 : index
    %c0_349 = arith.constant 0 : index
    %894 = vector.load %arg9[%c3_347, %c0_348, %c0_349] : memref<4x1x32xf32, #tpu.memory_space<vmem>>, vector<1x1x32xf32>
    %895 = vector.shape_cast %894 : vector<1x1x32xf32> to vector<1x32xf32>
    %896 = vector.broadcast %895 : vector<1x32xf32> to vector<10x32xf32>
    %897 = arith.addf %893, %896 : vector<10x32xf32>
    %c3_350 = arith.constant 3 : index
    %c0_351 = arith.constant 0 : index
    %c0_352 = arith.constant 0 : index
    %898 = vector.load %arg10[%c3_350, %c0_351, %c0_352] : memref<4x1x32xf32, #tpu.memory_space<vmem>>, vector<1x1x32xf32>
    %899 = vector.shape_cast %898 : vector<1x1x32xf32> to vector<1x32xf32>
    %c3_353 = arith.constant 3 : index
    %c0_354 = arith.constant 0 : index
    %c0_355 = arith.constant 0 : index
    %900 = vector.load %arg11[%c3_353, %c0_354, %c0_355] : memref<4x1x32xf32, #tpu.memory_space<vmem>>, vector<1x1x32xf32>
    %901 = vector.shape_cast %900 : vector<1x1x32xf32> to vector<1x32xf32>
    %cst_356 = arith.constant dense<0.000000e+00> : vector<10xf32>
    %902 = vector.multi_reduction <add>, %897, %cst_356 [1] : vector<10x32xf32> to vector<10xf32>
    %903 = vector.shape_cast %902 : vector<10xf32> to vector<10x1xf32>
    %cst_357 = arith.constant 3.200000e+01 : f32
    %904 = vector.broadcast %cst_357 : f32 to vector<10x1xf32>
    %905 = arith.divf %903, %904 : vector<10x1xf32>
    %906 = vector.broadcast %905 : vector<10x1xf32> to vector<10x32xf32>
    %907 = arith.subf %897, %906 : vector<10x32xf32>
    %908 = arith.mulf %907, %907 : vector<10x32xf32>
    %cst_358 = arith.constant dense<0.000000e+00> : vector<10xf32>
    %909 = vector.multi_reduction <add>, %908, %cst_358 [1] : vector<10x32xf32> to vector<10xf32>
    %910 = vector.shape_cast %909 : vector<10xf32> to vector<10x1xf32>
    %cst_359 = arith.constant 3.200000e+01 : f32
    %911 = vector.broadcast %cst_359 : f32 to vector<10x1xf32>
    %912 = arith.divf %910, %911 : vector<10x1xf32>
    %cst_360 = arith.constant 9.99999997E-7 : f32
    %913 = vector.broadcast %cst_360 : f32 to vector<10x1xf32>
    %914 = arith.addf %912, %913 : vector<10x1xf32>
    %915 = math.rsqrt %914 : vector<10x1xf32>
    %916 = vector.broadcast %915 : vector<10x1xf32> to vector<10x32xf32>
    %917 = arith.mulf %907, %916 : vector<10x32xf32>
    %918 = vector.broadcast %899 : vector<1x32xf32> to vector<10x32xf32>
    %919 = arith.mulf %917, %918 : vector<10x32xf32>
    %920 = vector.broadcast %901 : vector<1x32xf32> to vector<10x32xf32>
    %921 = arith.addf %919, %920 : vector<10x32xf32>
    %c3_361 = arith.constant 3 : index
    %c0_362 = arith.constant 0 : index
    %c0_363 = arith.constant 0 : index
    %922 = vector.load %arg12[%c3_361, %c0_362, %c0_363] : memref<4x32x64xf32, #tpu.memory_space<vmem>>, vector<1x32x64xf32>
    %923 = vector.shape_cast %922 : vector<1x32x64xf32> to vector<32x64xf32>
    %cst_364 = arith.constant dense<0.000000e+00> : vector<10x64xf32>
    %924 = tpu.matmul %921, %923, %cst_364 {dimension_numbers = #tpu.dot_dimension_numbers<[1], [0], [0], [1], [0, 0, 1, 1], [], []>} : vector<10x32xf32>, vector<32x64xf32>, vector<10x64xf32> -> vector<10x64xf32>
    %c3_365 = arith.constant 3 : index
    %c0_366 = arith.constant 0 : index
    %c0_367 = arith.constant 0 : index
    %925 = vector.load %arg13[%c3_365, %c0_366, %c0_367] : memref<4x1x64xf32, #tpu.memory_space<vmem>>, vector<1x1x64xf32>
    %926 = vector.shape_cast %925 : vector<1x1x64xf32> to vector<1x64xf32>
    %927 = vector.broadcast %926 : vector<1x64xf32> to vector<10x64xf32>
    %928 = arith.addf %924, %927 : vector<10x64xf32>
    %929 = arith.mulf %928, %928 : vector<10x64xf32>
    %930 = arith.mulf %928, %929 : vector<10x64xf32>
    %cst_368 = arith.constant 4.471500e-02 : f32
    %931 = vector.broadcast %cst_368 : f32 to vector<10x64xf32>
    %932 = arith.mulf %931, %930 : vector<10x64xf32>
    %933 = arith.addf %928, %932 : vector<10x64xf32>
    %cst_369 = arith.constant 0.797884583 : f32
    %934 = vector.broadcast %cst_369 : f32 to vector<10x64xf32>
    %935 = arith.mulf %934, %933 : vector<10x64xf32>
    %936 = math.tanh %935 : vector<10x64xf32>
    %cst_370 = arith.constant 1.000000e+00 : f32
    %937 = vector.broadcast %cst_370 : f32 to vector<10x64xf32>
    %938 = arith.addf %937, %936 : vector<10x64xf32>
    %cst_371 = arith.constant 5.000000e-01 : f32
    %939 = vector.broadcast %cst_371 : f32 to vector<10x64xf32>
    %940 = arith.mulf %939, %938 : vector<10x64xf32>
    %941 = arith.mulf %928, %940 : vector<10x64xf32>
    %c3_372 = arith.constant 3 : index
    %c0_373 = arith.constant 0 : index
    %c0_374 = arith.constant 0 : index
    %942 = vector.load %arg14[%c3_372, %c0_373, %c0_374] : memref<4x64x32xf32, #tpu.memory_space<vmem>>, vector<1x64x32xf32>
    %943 = vector.shape_cast %942 : vector<1x64x32xf32> to vector<64x32xf32>
    %cst_375 = arith.constant dense<0.000000e+00> : vector<10x32xf32>
    %944 = tpu.matmul %941, %943, %cst_375 {dimension_numbers = #tpu.dot_dimension_numbers<[1], [0], [0], [1], [0, 0, 1, 1], [], []>} : vector<10x64xf32>, vector<64x32xf32>, vector<10x32xf32> -> vector<10x32xf32>
    %945 = arith.addf %897, %944 : vector<10x32xf32>
    %c3_376 = arith.constant 3 : index
    %c0_377 = arith.constant 0 : index
    %c0_378 = arith.constant 0 : index
    %946 = vector.load %arg15[%c3_376, %c0_377, %c0_378] : memref<4x1x32xf32, #tpu.memory_space<vmem>>, vector<1x1x32xf32>
    %947 = vector.shape_cast %946 : vector<1x1x32xf32> to vector<1x32xf32>
    %948 = vector.broadcast %947 : vector<1x32xf32> to vector<10x32xf32>
    %949 = arith.addf %945, %948 : vector<10x32xf32>
    %c0_379 = arith.constant 0 : index
    %c0_380 = arith.constant 0 : index
    %950 = vector.load %arg16[%c0_379, %c0_380] : memref<1x32xf32, #tpu.memory_space<vmem>>, vector<1x32xf32>
    %c0_381 = arith.constant 0 : index
    %c0_382 = arith.constant 0 : index
    %951 = vector.load %arg17[%c0_381, %c0_382] : memref<1x32xf32, #tpu.memory_space<vmem>>, vector<1x32xf32>
    %cst_383 = arith.constant dense<0.000000e+00> : vector<10xf32>
    %952 = vector.multi_reduction <add>, %949, %cst_383 [1] : vector<10x32xf32> to vector<10xf32>
    %953 = vector.shape_cast %952 : vector<10xf32> to vector<10x1xf32>
    %cst_384 = arith.constant 3.200000e+01 : f32
    %954 = vector.broadcast %cst_384 : f32 to vector<10x1xf32>
    %955 = arith.divf %953, %954 : vector<10x1xf32>
    %956 = vector.broadcast %955 : vector<10x1xf32> to vector<10x32xf32>
    %957 = arith.subf %949, %956 : vector<10x32xf32>
    %958 = arith.mulf %957, %957 : vector<10x32xf32>
    %cst_385 = arith.constant dense<0.000000e+00> : vector<10xf32>
    %959 = vector.multi_reduction <add>, %958, %cst_385 [1] : vector<10x32xf32> to vector<10xf32>
    %960 = vector.shape_cast %959 : vector<10xf32> to vector<10x1xf32>
    %cst_386 = arith.constant 3.200000e+01 : f32
    %961 = vector.broadcast %cst_386 : f32 to vector<10x1xf32>
    %962 = arith.divf %960, %961 : vector<10x1xf32>
    %cst_387 = arith.constant 9.99999997E-7 : f32
    %963 = vector.broadcast %cst_387 : f32 to vector<10x1xf32>
    %964 = arith.addf %962, %963 : vector<10x1xf32>
    %965 = math.rsqrt %964 : vector<10x1xf32>
    %966 = vector.broadcast %965 : vector<10x1xf32> to vector<10x32xf32>
    %967 = arith.mulf %957, %966 : vector<10x32xf32>
    %968 = vector.broadcast %950 : vector<1x32xf32> to vector<10x32xf32>
    %969 = arith.mulf %967, %968 : vector<10x32xf32>
    %970 = vector.broadcast %951 : vector<1x32xf32> to vector<10x32xf32>
    %971 = arith.addf %969, %970 : vector<10x32xf32>
    %972 = vector.extract_strided_slice %971 {offsets = [0, 0], sizes = [1, 32], strides = [1, 1]} : vector<10x32xf32> to vector<1x32xf32>
    %973 = vector.extract_strided_slice %971 {offsets = [5, 0], sizes = [1, 32], strides = [1, 1]} : vector<10x32xf32> to vector<1x32xf32>
    %974 = tpu.concatenate %972, %973 in 0 : vector<1x32xf32>, vector<1x32xf32> -> vector<2x32xf32>
    %c0_388 = arith.constant 0 : index
    %c0_389 = arith.constant 0 : index
    %975 = vector.load %arg18[%c0_388, %c0_389] : memref<32x32xf32, #tpu.memory_space<vmem>>, vector<32x32xf32>
    %cst_390 = arith.constant dense<0.000000e+00> : vector<2x32xf32>
    %976 = tpu.matmul %974, %975, %cst_390 {dimension_numbers = #tpu.dot_dimension_numbers<[1], [0], [0], [1], [0, 0, 1, 1], [], []>} : vector<2x32xf32>, vector<32x32xf32>, vector<2x32xf32> -> vector<2x32xf32>
    %c0_391 = arith.constant 0 : index
    %c0_392 = arith.constant 0 : index
    %977 = vector.load %arg19[%c0_391, %c0_392] : memref<1x32xf32, #tpu.memory_space<vmem>>, vector<1x32xf32>
    %978 = vector.broadcast %977 : vector<1x32xf32> to vector<2x32xf32>
    %979 = arith.addf %976, %978 : vector<2x32xf32>
    %c0_393 = arith.constant 0 : index
    %c0_394 = arith.constant 0 : index
    %980 = vector.load %arg20[%c0_393, %c0_394] : memref<1x32xf32, #tpu.memory_space<vmem>>, vector<1x32xf32>
    %981 = vector.broadcast %980 : vector<1x32xf32> to vector<2x32xf32>
    %982 = arith.mulf %979, %981 : vector<2x32xf32>
    %c0_395 = arith.constant 0 : index
    %c0_396 = arith.constant 0 : index
    %983 = vector.load %arg21[%c0_395, %c0_396] : memref<1x32xf32, #tpu.memory_space<vmem>>, vector<1x32xf32>
    %984 = vector.broadcast %983 : vector<1x32xf32> to vector<2x32xf32>
    %985 = arith.addf %982, %984 : vector<2x32xf32>
    %c0_397 = arith.constant 0 : index
    %c0_398 = arith.constant 0 : index
    %986 = vector.load %arg22[%c0_397, %c0_398] : memref<32x10xf32, #tpu.memory_space<vmem>>, vector<32x10xf32>
    %cst_399 = arith.constant dense<0.000000e+00> : vector<2x10xf32>
    %987 = tpu.matmul %985, %986, %cst_399 {dimension_numbers = #tpu.dot_dimension_numbers<[1], [0], [0], [1], [0, 0, 1, 1], [], []>} : vector<2x32xf32>, vector<32x10xf32>, vector<2x10xf32> -> vector<2x10xf32>
    %c0_400 = arith.constant 0 : index
    %c0_401 = arith.constant 0 : index
    %988 = vector.load %arg23[%c0_400, %c0_401] : memref<1x10xf32, #tpu.memory_space<vmem>>, vector<1x10xf32>
    %989 = vector.broadcast %988 : vector<1x10xf32> to vector<2x10xf32>
    %990 = arith.addf %987, %989 : vector<2x10xf32>
    %c0_402 = arith.constant 0 : index
    %c0_403 = arith.constant 0 : index
    %c0_404 = arith.constant 0 : index
    %991 = vector.load %arg24[%c0_402, %c0_403, %c0_404] : memref<1x2x10xf32, #tpu.memory_space<vmem>>, vector<1x2x10xf32>
    %992 = vector.shape_cast %991 : vector<1x2x10xf32> to vector<2x10xf32>
    %993 = vector.shape_cast %990 : vector<2x10xf32> to vector<1x2x10xf32>
    tpu.vector_store %arg24[%c0_402, %c0_403, %c0_404], %993 {strides = array<i32>} : memref<1x2x10xf32, #tpu.memory_space<vmem>>, vector<1x2x10xf32>,
    return
  }
  func.func @transform_0(%arg0: i32) -> (i32, i32, i32) {
    %c0_i32 = arith.constant 0 : i32
    %c0_i32_0 = arith.constant 0 : i32
    %c0_i32_1 = arith.constant 0 : i32
    return %arg0, %c0_i32, %c0_i32_0 : i32, i32, i32
  }
  func.func @transform_1(%arg0: i32) -> (i32, i32) {
    %c0_i32 = arith.constant 0 : i32
    %c0_i32_0 = arith.constant 0 : i32
    %c0_i32_1 = arith.constant 0 : i32
    return %c0_i32, %c0_i32_0 : i32, i32
  }
  func.func @transform_2(%arg0: i32) -> (i32, i32) {
    %c0_i32 = arith.constant 0 : i32
    %c0_i32_0 = arith.constant 0 : i32
    %c0_i32_1 = arith.constant 0 : i32
    return %c0_i32, %c0_i32_0 : i32, i32
  }
  func.func @transform_3(%arg0: i32) -> (i32, i32, i32) {
    %c0_i32 = arith.constant 0 : i32
    %c0_i32_0 = arith.constant 0 : i32
    %c0_i32_1 = arith.constant 0 : i32
    %c0_i32_2 = arith.constant 0 : i32
    return %c0_i32, %c0_i32_0, %c0_i32_1 : i32, i32, i32
  }
  func.func @transform_4(%arg0: i32) -> (i32, i32, i32) {
    %c0_i32 = arith.constant 0 : i32
    %c0_i32_0 = arith.constant 0 : i32
    %c0_i32_1 = arith.constant 0 : i32
    %c0_i32_2 = arith.constant 0 : i32
    return %c0_i32, %c0_i32_0, %c0_i32_1 : i32, i32, i32
  }
  func.func @transform_5(%arg0: i32) -> (i32, i32, i32) {
    %c0_i32 = arith.constant 0 : i32
    %c0_i32_0 = arith.constant 0 : i32
    %c0_i32_1 = arith.constant 0 : i32
    %c0_i32_2 = arith.constant 0 : i32
    return %c0_i32, %c0_i32_0, %c0_i32_1 : i32, i32, i32
  }
  func.func @transform_6(%arg0: i32) -> (i32, i32, i32) {
    %c0_i32 = arith.constant 0 : i32
    %c0_i32_0 = arith.constant 0 : i32
    %c0_i32_1 = arith.constant 0 : i32
    %c0_i32_2 = arith.constant 0 : i32
    return %c0_i32, %c0_i32_0, %c0_i32_1 : i32, i32, i32
  }
  func.func @transform_7(%arg0: i32) -> (i32, i32, i32) {
    %c0_i32 = arith.constant 0 : i32
    %c0_i32_0 = arith.constant 0 : i32
    %c0_i32_1 = arith.constant 0 : i32
    %c0_i32_2 = arith.constant 0 : i32
    return %c0_i32, %c0_i32_0, %c0_i32_1 : i32, i32, i32
  }
  func.func @transform_8(%arg0: i32) -> (i32, i32, i32) {
    %c0_i32 = arith.constant 0 : i32
    %c0_i32_0 = arith.constant 0 : i32
    %c0_i32_1 = arith.constant 0 : i32
    %c0_i32_2 = arith.constant 0 : i32
    return %c0_i32, %c0_i32_0, %c0_i32_1 : i32, i32, i32
  }
  func.func @transform_9(%arg0: i32) -> (i32, i32, i32) {
    %c0_i32 = arith.constant 0 : i32
    %c0_i32_0 = arith.constant 0 : i32
    %c0_i32_1 = arith.constant 0 : i32
    %c0_i32_2 = arith.constant 0 : i32
    return %c0_i32, %c0_i32_0, %c0_i32_1 : i32, i32, i32
  }
  func.func @transform_10(%arg0: i32) -> (i32, i32, i32) {
    %c0_i32 = arith.constant 0 : i32
    %c0_i32_0 = arith.constant 0 : i32
    %c0_i32_1 = arith.constant 0 : i32
    %c0_i32_2 = arith.constant 0 : i32
    return %c0_i32, %c0_i32_0, %c0_i32_1 : i32, i32, i32
  }
  func.func @transform_11(%arg0: i32) -> (i32, i32, i32) {
    %c0_i32 = arith.constant 0 : i32
    %c0_i32_0 = arith.constant 0 : i32
    %c0_i32_1 = arith.constant 0 : i32
    %c0_i32_2 = arith.constant 0 : i32
    return %c0_i32, %c0_i32_0, %c0_i32_1 : i32, i32, i32
  }
  func.func @transform_12(%arg0: i32) -> (i32, i32, i32) {
    %c0_i32 = arith.constant 0 : i32
    %c0_i32_0 = arith.constant 0 : i32
    %c0_i32_1 = arith.constant 0 : i32
    %c0_i32_2 = arith.constant 0 : i32
    return %c0_i32, %c0_i32_0, %c0_i32_1 : i32, i32, i32
  }
  func.func @transform_13(%arg0: i32) -> (i32, i32, i32) {
    %c0_i32 = arith.constant 0 : i32
    %c0_i32_0 = arith.constant 0 : i32
    %c0_i32_1 = arith.constant 0 : i32
    %c0_i32_2 = arith.constant 0 : i32
    return %c0_i32, %c0_i32_0, %c0_i32_1 : i32, i32, i32
  }
  func.func @transform_14(%arg0: i32) -> (i32, i32, i32) {
    %c0_i32 = arith.constant 0 : i32
    %c0_i32_0 = arith.constant 0 : i32
    %c0_i32_1 = arith.constant 0 : i32
    %c0_i32_2 = arith.constant 0 : i32
    return %c0_i32, %c0_i32_0, %c0_i32_1 : i32, i32, i32
  }
  func.func @transform_15(%arg0: i32) -> (i32, i32) {
    %c0_i32 = arith.constant 0 : i32
    %c0_i32_0 = arith.constant 0 : i32
    %c0_i32_1 = arith.constant 0 : i32
    return %c0_i32, %c0_i32_0 : i32, i32
  }
  func.func @transform_16(%arg0: i32) -> (i32, i32) {
    %c0_i32 = arith.constant 0 : i32
    %c0_i32_0 = arith.constant 0 : i32
    %c0_i32_1 = arith.constant 0 : i32
    return %c0_i32, %c0_i32_0 : i32, i32
  }
  func.func @transform_17(%arg0: i32) -> (i32, i32) {
    %c0_i32 = arith.constant 0 : i32
    %c0_i32_0 = arith.constant 0 : i32
    %c0_i32_1 = arith.constant 0 : i32
    return %c0_i32, %c0_i32_0 : i32, i32
  }
  func.func @transform_18(%arg0: i32) -> (i32, i32) {
    %c0_i32 = arith.constant 0 : i32
    %c0_i32_0 = arith.constant 0 : i32
    %c0_i32_1 = arith.constant 0 : i32
    return %c0_i32, %c0_i32_0 : i32, i32
  }
  func.func @transform_19(%arg0: i32) -> (i32, i32) {
    %c0_i32 = arith.constant 0 : i32
    %c0_i32_0 = arith.constant 0 : i32
    %c0_i32_1 = arith.constant 0 : i32
    return %c0_i32, %c0_i32_0 : i32, i32
  }
  func.func @transform_20(%arg0: i32) -> (i32, i32) {
    %c0_i32 = arith.constant 0 : i32
    %c0_i32_0 = arith.constant 0 : i32
    %c0_i32_1 = arith.constant 0 : i32
    return %c0_i32, %c0_i32_0 : i32, i32
  }
  func.func @transform_21(%arg0: i32) -> (i32, i32) {
    %c0_i32 = arith.constant 0 : i32
    %c0_i32_0 = arith.constant 0 : i32
    %c0_i32_1 = arith.constant 0 : i32
    return %c0_i32, %c0_i32_0 : i32, i32
  }
  func.func @transform_22(%arg0: i32) -> (i32, i32) {
    %c0_i32 = arith.constant 0 : i32
    %c0_i32_0 = arith.constant 0 : i32
    %c0_i32_1 = arith.constant 0 : i32
    return %c0_i32, %c0_i32_0 : i32, i32
  }
  func.func @transform_23(%arg0: i32) -> (i32, i32, i32) {
    %c0_i32 = arith.constant 0 : i32
    %c0_i32_0 = arith.constant 0 : i32
    %c0_i32_1 = arith.constant 0 : i32
    return %arg0, %c0_i32, %c0_i32_0 : i32, i32, i32
  }
}

</mosaic_0001>

<bundles_post_ra>
// kernel: tile.9
= control target key start
LH: loop header
LB: loop body
LE: loop exit
PB: predicated region body
PF: predicated region fallthrough
CT: control target
= control target key end

     0   :  { %vm3_vm0 = vcmask 261120   ;;  %s34_s0 = inlined_call_operand.vmem [shape: f32[2,5,32], index: 0, kind: input, shape index: {}]   ;;  %s35_s1 = inlined_call_operand.vmem [shape: f32[10,32], index: 1, kind: output, shape index: {}]  }
   0x1   :  { %v2_v0 = vld [vmem:[%s34_s0] sm:$0x1f]   ;;  %v10_v1 = vld [vmem:[%s34_s0 + $0x8] sm:$0x1f]  }
   0x2   :  { %4 = vst.msk [vmem:[%s35_s1] sm:$0x1f] %vm3_vm0, %v2_v0   ;;  %11 = vst.msk [vmem:[%s35_s1 + $0x5] sm:$0x1f] %vm3_vm0, %v10_v1  }

// kernel: transformer_forward.1
= control target key start
LH: loop header
LB: loop body
LE: loop exit
PB: predicated region body
PF: predicated region fallthrough
CT: control target
= control target key end

     0   :  { %s11581_s0 = inlined_call_operand.vmem [shape: f32[2,10,192], index: 0, kind: input, shape index: {}]   ;;  %s11582_s1 = inlined_call_operand.vmem [shape: f32[192,32], index: 1, kind: input, shape index: {}]   ;;  %s11583_s2 = inlined_call_operand.vmem [shape: f32[10,32], index: 2, kind: input, shape index: {}]   ;;  %s11584_s3 = inlined_call_operand.vmem [shape: f32[4,1,32], index: 3, kind: input, shape index: {}]   ;;  %s11585_s4 = inlined_call_operand.vmem [shape: f32[4,1,32], index: 4, kind: input, shape index: {}]   ;;  %s11586_s5 = inlined_call_operand.vmem [shape: f32[4,32,96], index: 5, kind: input, shape index: {}]   ;;  %s11587_s6 = inlined_call_operand.vmem [shape: f32[4,1,96], index: 6, kind: input, shape index: {}]   ;;  %s11588_s7 = inlined_call_operand.vmem [shape: f32[4,32,32], index: 7, kind: input, shape index: {}]   ;;  %s11589_s8 = inlined_call_operand.vmem [shape: f32[4,1,32], index: 8, kind: input, shape index: {}]   ;;  %s11590_s9 = inlined_call_operand.vmem [shape: f32[4,1,32], index: 9, kind: input, shape index: {}]   ;;  %s11591_s10 = inlined_call_operand.vmem [shape: f32[4,1,32], index: 10, kind: input, shape index: {}]   ;;  %s11592_s11 = inlined_call_operand.vmem [shape: f32[4,32,64], index: 11, kind: input, shape index: {}]   ;;  %s11593_s12 = inlined_call_operand.vmem [shape: f32[4,1,64], index: 12, kind: input, shape index: {}]   ;;  %s11594_s13 = inlined_call_operand.vmem [shape: f32[4,64,32], index: 13, kind: input, shape index: {}]   ;;  %s11595_s14 = inlined_call_operand.vmem [shape: f32[4,1,32], index: 14, kind: input, shape index: {}]   ;;  %s11596_s15 = inlined_call_operand.vmem [shape: f32[1,32], index: 15, kind: input, shape index: {}]   ;;  %s11597_s16 = inlined_call_operand.vmem [shape: f32[1,32], index: 16, kind: input, shape index: {}]   ;;  %s11598_s17 = inlined_call_operand.vmem [shape: f32[32,32], index: 17, kind: input, shape index: {}]   ;;  %s11599_s18 = inlined_call_operand.vmem [shape: f32[1,32], index: 18, kind: input, shape index: {}]   ;;  %s11600_s19 = inlined_call_operand.vmem [shape: f32[1,32], index: 19, kind: input, shape index: {}]   ;;  %s11601_s20 = inlined_call_operand.vmem [shape: f32[1,32], index: 20, kind: input, shape index: {}]   ;;  %s11602_s21 = inlined_call_operand.vmem [shape: f32[32,10], index: 21, kind: input, shape index: {}]   ;;  %s11603_s22 = inlined_call_operand.vmem [shape: f32[1,10], index: 22, kind: input, shape index: {}]   ;;  %s11604_s23 = inlined_call_operand.hbm [shape: f32[2,2,10], index: 23, kind: output, shape index: {}]  }
   0x1   :  { %11660 = sst [smem:[#allocation14_spill]] %s11581_s0 }
   0x2   :  { %11661 = sst [smem:[#allocation15_spill]] %s11582_s1 }
   0x3   :  { %11662 = sst [smem:[#allocation16_spill]] %s11583_s2 }
   0x4   :  { %11663 = sst [smem:[#allocation17_spill]] %s11584_s3 }
   0x5   :  { %11664 = sst [smem:[#allocation18_spill]] %s11585_s4 }
   0x6   :  { %11665 = sst [smem:[#allocation19_spill]] %s11586_s5 }
   0x7   :  { %11666 = sst [smem:[#allocation20_spill]] %s11587_s6 }
   0x8   :  { %11667 = sst [smem:[#allocation21_spill]] %s11588_s7 }
   0x9   :  { %11668 = sst [smem:[#allocation22_spill]] %s11589_s8 }
   0xa   :  { %11669 = sst [smem:[#allocation23_spill]] %s11596_s15 }
   0xb   :  { %11670 = sst [smem:[#allocation24_spill]] %s11597_s16 }
   0xc   :  { %11671 = sst [smem:[#allocation25_spill]] %s11598_s17 }
   0xd   :  { %11672 = sst [smem:[#allocation26_spill]] %s11599_s18 }
   0xe   :  { %11673 = sst [smem:[#allocation27_spill]] %s11600_s19 }
   0xf   :  { %11674 = sst [smem:[#allocation28_spill]] %s11601_s20 }
  0x10   :  { %11675 = sst [smem:[#allocation29_spill]] %s11602_s21 }
  0x11   :  { %11676 = sst [smem:[#allocation30_spill]] %s11603_s22 }
  0x12   :  { %11677 = sst [smem:[#allocation31_spill]] %s11604_s23 }
  0x13   :  { %28 = vsyncpa [#allocation3], 0 }
  0x14   :  { %30 = vsyncpa [#allocation3 + $0x1], 0  ;;  %s10111_s4 = smov 0   ;;  %s10113_s30 = smov 0  }
  0x15   :  { %s10115_s24 = smov 0   ;;  %s10117_s25 = smov 0  }
  0x16 LB: > { %11678 = sst [smem:[#allocation5_spill]] %s9960_s4  ;;  %s10132_s5 = sadd.s32 4294967295, %s9972_s25   ;;  %s9972_s25 = sphi %s10117_s25, %s11733_s25   ;;  %s9968_s24 = sphi %s10115_s24, %s11736_s24   ;;  %s9964_s30 = sphi %s10113_s30, %s11735_s30   ;;  %s9960_s4 = sphi %s10111_s4, %s11734_s4  }
  0x17   : > { %11679 = sst [smem:[#allocation6_spill]] %s9964_s30  ;;  %s8581_s1 = sadd.s32 4294967294, %s9972_s25  }
  0x18   : > { %11680 = sst [smem:[#allocation7_spill]] %s9968_s24  ;;  %s10136_s26 = sadd.s32 1, %s9972_s25  }
  0x19   : > { %11681 = sst [smem:[#allocation8_spill]] %s9972_s25  ;;  %s531_s2 = sadd.s32 1, %s9968_s24 }
  0x1a   : > { %11682 = sst [smem:[#allocation9_spill]] %s10132_s5  ;;  %s528_s6 = ssub.s32 %s9972_s25, %s10136_s26 }
  0x1b   : > { %11683 = sst [smem:[#allocation10_spill]] %s10136_s26  ;;  %p541_p0 = scmp.ne.s32.totalorder %s9968_s24, %s9964_s30 }
  0x1c   : > { %p529_p1 = scmp.eq.s32.totalorder %s528_s6, 0  ;;  %p542_p2 = scmp.eq.s32.totalorder %s10132_s5, 1 }
  0x1d   : > { %p547_p3 = scmp.ne.s32.totalorder %s9964_s30, %s9960_s4  ;;  %p548_p4 = scmp.eq.s32.totalorder %s8581_s1, 1 }
  0x1e   : > { %s10147_s27 = scalar_select %p529_p1, %s9968_s24, %s531_s2  }
  0x1f   : > { %p10149_p5 = por %p542_p2, %p541_p0  ;;  %p10153_p6 = por %p548_p4, %p547_p3 }
  0x20   : > { %11684 = sst [smem:[#allocation11_spill]] %s10147_s27  ;;  %p8584_p7 = scmp.ge.s32.totalorder %s9972_s25, 1 }
  0x21   : > { %s11685_s7 = scalar_select %p10149_p5, 1, 0 }
  0x22   : > { %s11687_s28 = scalar_select %p10153_p6, 1, 0 }
  0x23   : > { %11686 = sst [smem:[#allocation12_spill]] %s11685_s7  ;;  %p640_p8 = scmp.lt.s32.totalorder %s9972_s25, 3 }
  0x24   : > { %11688 = sst [smem:[#allocation13_spill]] %s11687_s28 }
  0x25   : > { %p641_p9 = pnand %p8584_p7, %p640_p8 }
  0x26   : > { %s11689_s0 = sld [smem:[#allocation15_spill]] (!%p641_p9)  ;;  %p704_p10 = scmp.lt.s32.totalorder (!%p641_p9), %s10132_s5, 1 }
  0x27   : > { %644 = sbr.rel (%p641_p9) target bundleno = 13327 (0x340f), region = 112  ;;  %s11690_s1 = sld [smem:[#allocation14_spill]] (!%p641_p9) }
  0x28   : > { %s11692_s27 = sld [smem:[#allocation19_spill]] (!%p641_p9)  ;;  %s11629_s24 = smov (!%p641_p9), 96  }
  0x29   : > { %s11693_s26 = sld [smem:[#allocation17_spill]] (!%p641_p9)  ;;  %s11619_s4 = smov (!%p641_p9), 64  }
  0x2a   : > { %s11694_s28 = sld [smem:[#allocation18_spill]] (!%p641_p9)  ;;  %s11617_s3 = smov (!%p641_p9), 120  }
  0x2b   : > { %s11703_s25 = smov (!%p641_p9), 48   ;;  %s11645_s23 = smov (!%p641_p9), 8  }
  0x2c   : > { %v728_v0 = vld [vmem:[%s11689_s0 + $0x78] sm:$0xff]  ;;  %v9974_v1 = vmov 0.0   ;;  %v727_v2 = vld [vmem:[%s11689_s0 + $0x70] sm:$0xff]  ;;  %s705_s6 = scalar_select %p704_p10, %s10132_s5, 1  ;;  %v726_v3 = vld [vmem:[%s11689_s0 + $0x68] sm:$0xff]  ;;  %vm739_vm0 = vcmask 523264  }
  0x2d   : > { %746 = vmatprep.subr.mxu0 %v9974_v1  ;;  %v725_v4 = vld [vmem:[%s11689_s0 + $0x60] sm:$0xff]  ;;  %v724_v5 = vld [vmem:[%s11689_s0 + $0x58] sm:$0xff]  ;;  %v723_v7 = vld [vmem:[%s11689_s0 + $0x50] sm:$0xff]  ;;  %vm823_vm1 = vcmask 261120   ;;  %vm827_vm2 = vcmask 254976   ;;  %vm9975_vm3 = vmmov 0  }
  0x2e   : > { %747 = vmatpush1.msra.mxu0 %v728_v0  ;;  %s8878_s29 = sshll.u32 %s705_s6, 5  ;;  %v722_v8 = vld [vmem:[%s11689_s0 + $0x48] sm:$0xff]  ;;  %v721_v9 = vld [vmem:[%s11689_s0 + $0x40] sm:$0xff]  ;;  %v720_v10 = vld [vmem:[%s11689_s0 + $0x38] sm:$0xff]  ;;  %s11631_s6 = smov 88   ;;  %vm963_vm4 = vcmask 64512  }
  0x2f   : > { %748 = vmatprep.subr.mxu0 %v9974_v1  ;;  %s10179_s2 = scalar_lea.vmem %s11690_s1, %s8878_s29  ;;  %v719_v11 = vld [vmem:[%s11689_s0 + $0x30] sm:$0xff]  ;;  %v718_v12 = vld [vmem:[%s11689_s0 + $0x28] sm:$0xff]  ;;  %v717_v13 = vld [vmem:[%s11689_s0 + $0x20] sm:$0xff]  ;;  %s11691_s29 = sld [smem:[#allocation16_spill]]  ;;  %vm1039_vm5 = vcmask 36864   ;;  %vm1057_vm6 = vcmask 1044480  }
  0x30   : > { %749 = vmatpush1.msra.mxu0 %v727_v2  ;;  %v710_v6 = vld [vmem:[%s10179_s2 + $0x8] sm:$0xff]  ;;  %v716_v14 = vld [vmem:[%s11689_s0 + $0x18] sm:$0xff]  ;;  %v715_v15 = vld [vmem:[%s11689_s0 + $0x10] sm:$0xff]  ;;  %vm1053_vm7 = vcmask 39936   ;;  %s11621_s1 = smov 56   ;;  %vm1649_vm8 = vcmask 1042432  }
  0x31   : > { %750 = vmatprep.subr.mxu0 %v9974_v1  ;;  %8588 = vmatprep.mubr.msk.f32.mxu0 %vm739_vm0, %v710_v6  ;;  %v714_v16 = vld [vmem:[%s11689_s0 + $0x8] sm:$0xff]  ;;  %v713_v17 = vld [vmem:[%s11689_s0] sm:$0xff]  ;;  %v736_v18 = vld [vmem:[%s11689_s0 + $0xb8] sm:$0xff]  ;;  %s11643_s22 = smov 16   ;;  %s11704_s7 = sld [smem:[#allocation21_spill]]  ;;  %vm1646_vm9 = vcmask 195584  }
  0x32   : > { %751 = vmatpush1.msra.mxu0 %v726_v3  ;;  %v735_v19 = vld [vmem:[%s11689_s0 + $0xb0] sm:$0xff]  ;;  %v734_v20 = vld [vmem:[%s11689_s0 + $0xa8] sm:$0xff]  ;;  %v733_v21 = vld [vmem:[%s11689_s0 + $0xa0] sm:$0xff]  ;;  %s11706_s19 = smov 16   ;;  %s11652_s18 = smov 24   ;;  %vm1644_vm10 = vcmask 130048  }
  0x33   : > { %752 = vmatprep.subr.mxu0 %v9974_v1  ;;  %v732_v22 = vld [vmem:[%s11689_s0 + $0x98] sm:$0xff]  ;;  %v731_v23 = vld [vmem:[%s11689_s0 + $0x90] sm:$0xff]  ;;  %v730_v24 = vld [vmem:[%s11689_s0 + $0x88] sm:$0xff]  ;;  %s11707_s8 = sld [smem:[#allocation22_spill]]  ;;  %s11708_s20 = smov 88   ;;  %vm8320_vm11 = vcmask 1040384  }
  0x34   : > { %753 = vmatpush1.msra.mxu0 %v725_v4  ;;  %v729_v25 = vld [vmem:[%s11689_s0 + $0x80] sm:$0xff]  ;;  %v712_v27 = vld [vmem:[%s10179_s2 + $0x18] sm:$0x3]  ;;  %v711_v28 = vld [vmem:[%s10179_s2 + $0x10] sm:$0x3]  ;;  %s11700_s0 = smov 72  }
  0x35   : > { %754 = vmatprep.subr.mxu0 %v9974_v1  ;;  %v709_v26 = vld [vmem:[%s10179_s2] sm:$0xff]  ;;  %v738_v33 = vld [vmem:[%s11691_s29 + $0x8] sm:$0x3]  ;;  %v871_v49 = vld [vmem:[%s11692_s27 + $0x18] sm:$0xff]  ;;  %s11695_s2 = sld [smem:[#allocation20_spill]]  ;;  %s11709_s21 = smov 96  }
  0x36   : > { %755 = vmatpush1.msra.mxu0 %v724_v5  ;;  %v737_v29 = vld [vmem:[%s11691_s29] sm:$0xff]  ;;  %v870_v50 = vld [vmem:[%s11692_s27 + $0x10] sm:$0xff]  ;;  %9129 = vmatprep.subr.mxu1 %v871_v49  ;;  %v869_v51 = vld [vmem:[%s11692_s27 + $0x8] sm:$0xff]  ;;  %s11702_s29 = smov 40   ;;  %s11711_s17 = smov 24   ;;  %vm8506_vm12 = vcmask 74752  }
  0x37   : > { %756 = vmatprep.subr.mxu0 %v9974_v1  ;;  %9130 = vmatpush3.msra.mxu1 %v871_v49  ;;  %v868_v52 = vld [vmem:[%s11692_s27] sm:$0xff]  ;;  %s11713_s5 = smov 24   ;;  %s11717_s15 = sld [smem:[#allocation22_spill]] }
  0x38   : > { %757 = vmatpush1.msra.mxu0 %v723_v7  ;;  %9131 = vmatprep.subr.mxu1 %v870_v50  ;;  %v8590_v60 = vld [vmem:[%s11693_s26] ss:$0 sm:$0xff]  ;;  %s11725_s30 = sld [smem:[#allocation27_spill]] }
  0x39   : > { %758 = vmatprep.subr.mxu0 %v9974_v1  ;;  %9132 = vmatpush3.msra.mxu1 %v870_v50  ;;  %v8591_v62 = vld [vmem:[%s11694_s28] ss:$0 sm:$0xff] }
  0x3a   : > { %759 = vmatpush1.msra.mxu0 %v722_v8  ;;  %9133 = vmatprep.subr.mxu1 %v869_v51 }
  0x3b   : > { %760 = vmatprep.subr.mxu0 %v9974_v1  ;;  %9134 = vmatpush3.msra.mxu1 %v869_v51  ;;  %v8592_v6 = vld [vmem:[%s11695_s2] ss:$0 sm:$0xff] }
  0x3c   : > { %761 = vmatpush1.msra.mxu0 %v721_v9  ;;  %9135 = vmatprep.subr.mxu1 %v868_v52 }
  0x3d   : > { %762 = vmatprep.subr.mxu0 %v9974_v1  ;;  %9136 = vmatpush3.msra.mxu1 %v868_v52 }
  0x3e   : > { %763 = vmatpush1.msra.mxu0 %v720_v10  ;;  %9140 = vmatprep.subr.mxu1 %v9974_v1 }
  0x3f   : > { %764 = vmatprep.subr.mxu0 %v9974_v1 }
  0x40   : > { %765 = vmatpush1.msra.mxu0 %v719_v11 }
  0x41   : > { %766 = vmatprep.subr.mxu0 %v9974_v1 }
  0x42   : > { %767 = vmatpush1.msra.mxu0 %v718_v12 }
  0x43   : > { %768 = vmatprep.subr.mxu0 %v9974_v1 }
  0x44   : > { %769 = vmatpush1.msra.mxu0 %v717_v13 }
  0x45   : > { %770 = vmatprep.subr.mxu0 %v9974_v1 }
  0x46   : > { %771 = vmatpush1.msra.mxu0 %v716_v14 }
  0x47   : > { %772 = vmatprep.subr.mxu0 %v9974_v1 }
  0x48   : > { %773 = vmatpush1.msra.mxu0 %v715_v15 }
  0x49   : > { %774 = vmatprep.subr.mxu0 %v9974_v1 }
  0x4a   : > { %775 = vmatpush1.msra.mxu0 %v714_v16 }
  0x4b   : > { %776 = vmatprep.subr.mxu0 %v9974_v1 }
  0x4c   : > { %777 = vmatpush1.msra.mxu0 %v713_v17 }
  0x4d   : > { %794 = vmatprep.subr.mxu0 %v9974_v1 }
  0x4e   : > { %795 = vmatpush2.msra.mxu0 %v736_v18 }
  0x4f   : > { %796 = vmatprep.subr.mxu0 %v9974_v1 }
  0x50   : > { %797 = vmatpush2.msra.mxu0 %v735_v19 }
  0x51   : > { %798 = vmatprep.subr.mxu0 %v9974_v1 }
  0x52   : > { %799 = vmatpush2.msra.mxu0 %v734_v20 }
  0x53   : > { %800 = vmatprep.subr.mxu0 %v9974_v1 }
  0x54   : > { %801 = vmatpush2.msra.mxu0 %v733_v21 }
  0x55   : > { %802 = vmatprep.subr.mxu0 %v9974_v1 }
  0x56   : > { %803 = vmatpush2.msra.mxu0 %v732_v22 }
  0x57   : > { %804 = vmatprep.subr.mxu0 %v9974_v1 }
  0x58   : > { %805 = vmatpush2.msra.mxu0 %v731_v23 }
  0x59   : > { %806 = vmatprep.subr.mxu0 %v9974_v1 }
  0x5a   : > { %807 = vmatpush2.msra.mxu0 %v730_v24 }
  0x5b   : > { %808 = vmatprep.subr.mxu0 %v9974_v1 }
  0x5c   : > { %809 = vmatpush2.msra.mxu0 %v729_v25 }
  0x5d   : > { %811 = vmatmul.mubr.f32.vlgmr.msra.gmra.mxu0 %v709_v26  ;;  %9195 = vmatprep.subr.mxu0 %v9974_v1 }
  0x5e   : > { %8589 = vmatprep.mubr.msk.f32.mxu0 %vm739_vm0, %v712_v27 }
  0x61   : > { %816 = vmatmul.mubr.f32.gmra.mxu0 %v711_v28 }
  0x62   : > { %9197 = vmatprep.mubr.msk.f32.mxu0 %vm9975_vm3, %v9974_v1 }
 0x11d   : > { %v812_v30 = vpop.f32.mrf.mxu0 }
 0x11e   : > { %v10272_v31 = vadd.f32 %v812_v30, %v737_v29 }
 0x11f   : > { %v814_v32 = vpop.f32.mrf.mxu0 }
 0x120   : > { %v824_v34 = vsel %vm823_vm1, %v10272_v31, 0.0 }
 0x121   : > { %v817_v35 = vpop.f32.mrf.mxu0  ;;  %825 = vadd.xlane.f32.xlu0 %v824_v34 }
 0x122   : > { %v10279_v36 = vadd.f32 %v817_v35, %v738_v33 }
 0x123   : > { %v819_v37 = vpop.f32.mrf.mxu0 }
 0x124   : > { %v828_v38 = vsel %vm827_vm2, %v10279_v36, 0.0 }
 0x125   : > { %829 = vadd.xlane.f32.xlu0 %v828_v38 }
 0x1aa   : > { %v826_v39 = vpop.xlane.xlu0 %825 }
 0x1ab   : > { %v832_v40 = vmul.f32 0.03125, %v826_v39 }
 0x1ad   : > { %v834_v41 = vsub.f32 %v10272_v31, %v832_v40 }
 0x1ae   : > { %v830_v42 = vpop.xlane.xlu0 %829 }
 0x1af   : > { %v833_v43 = vmul.f32 0.03125, %v830_v42  ;;  %v836_v44 = vmul.f32 %v834_v41, %v834_v41 }
 0x1b1   : > { %v835_v45 = vsub.f32 %v10279_v36, %v833_v43  ;;  %v838_v46 = vsel %vm823_vm1, %v836_v44, 0.0 }
 0x1b2   : > { %839 = vadd.xlane.f32.xlu1 %v838_v46 }
 0x1b3   : > { %v837_v47 = vmul.f32 %v835_v45, %v835_v45 }
 0x1b5   : > { %v841_v48 = vsel %vm827_vm2, %v837_v47, 0.0 }
 0x1b6   : > { %842 = vadd.xlane.f32.xlu1 %v841_v48 }
 0x23b   : > { %v840_v53 = vpop.xlane.xlu1 %839 }
 0x23c   : > { %v844_v54 = vmul.f32 0.03125, %v840_v53 }
 0x23e   : > { %v846_v55 = vadd.f32 1e-06, %v844_v54 }
 0x23f   : > { %v843_v56 = vpop.xlane.xlu1 %842 }
 0x240   : > { %9734 = vrsqrt.f32 %v846_v55  ;;  %v845_v57 = vmul.f32 0.03125, %v843_v56 }
 0x242   : > { %v847_v58 = vadd.f32 1e-06, %v845_v57 }
 0x244   : > { %9736 = vrsqrt.f32 %v847_v58 }
 0x24d   : > { %v9735_v59 = vpop.eup %9734 }
 0x24e   : > { %v850_v61 = vmul.f32 %v9735_v59, %v834_v41 }
 0x250   : > { %v858_v63 = vmul.f32 %v8590_v60, %v850_v61 }
 0x251   : > { %v9737_v0 = vpop.eup %9736 }
 0x252   : > { %v851_v2 = vmul.f32 %v9737_v0, %v835_v45  ;;  %v866_v3 = vadd.f32 %v8591_v62, %v858_v63 }
 0x254   : > { %v859_v4 = vmul.f32 %v8590_v60, %v851_v2  ;;  %9137 = vmatprep.mubr.msk.f32.mxu1 %vm823_vm1, %v866_v3 }
 0x256   : > { %v867_v5 = vadd.f32 %v8591_v62, %v859_v4 }
 0x258   : > { %9138 = vmatmul.mubr.msk.f32.vlgmr.msra.gmra.mxu1 %vm823_vm1, %v867_v5 }
 0x259   : > { %9142 = vmatprep.mubr.msk.f32.mxu1 %vm9975_vm3, %v9974_v1 }
 0x318   : > { %v9139_v7 = vpop.f32.mrf.mxu1 }
 0x319   : > { %v10315_v8 = vadd.f32 %v9139_v7, %v8592_v6 }
 0x31a   : > { %v951_v9 = vpop.f32.mrf.mxu1 }
 0x31b   : > { %v10317_v10 = vadd.f32 %v8592_v6, %v951_v9 }
 0x31d   : > { %961 = vrot.lane.b32.xlu0 %v10317_v10, %s11629_s24 }
 0x321   : > { %1132 = vrot.lane.b32.xlu0 %v10317_v10, %s11631_s6 }
 0x38f   : > { %v962_v11 = vpop.permute.xlu0 %961 }
 0x390   : > { %9141 = vmatpush3.xpose.msk.msra.mxu1 %vm963_vm4, %v962_v11 }
 0x391   : > { %9145 = vmatprep.subr.mxu1 %v9974_v1 }
 0x393   : > { %9143 = vmatmul.mubr.msk.f32.vlgmr.msra.gmra.mxu1 %vm963_vm4, %v10317_v10  ;;  %v1133_v25 = vpop.permute.xlu0 %1132 }
 0x394   : > { %9147 = vmatprep.mubr.msk.f32.mxu1 %vm9975_vm3, %v9974_v1 }
 0x453   : > { %v1034_v12 = vpop.f32.mrf.mxu1 }
 0x454   : > { %v1038_v13 = vmul.f32 0.35355338, %v1034_v12 }
 0x455   : > { %v9144_v14 = vpop.f32.mrf.mxu1 }
 0x456   : > { %v1040_v15 = vsel %vm1039_vm5, %v1038_v13, -inf  ;;  %v1650_v14 = vrot.slane %v10317_v10, 5 }
 0x457   : > { %1041 = vmax.xlane.f32.xlu1 %v1040_v15  ;;  %v1651_v15 = vrot.slane %v10315_v8, 5 }
 0x468   : > { %1051 = vrot.lane.b32.xlu1 %v10317_v10, %s11619_s4  ;;  %s11623_s4 = smov 80  }
 0x4e0   : > { %v1042_v16 = vpop.xlane.xlu1 %1041 }
 0x4e1   : > { %v1043_v17 = vsub.f32 %v1038_v13, %v1042_v16  ;;  %v10396_v16 = vsel %vm1649_vm8, %v1650_v14, %v1651_v15 }
 0x4e3   : > { %v1044_v18 = vmul.f32 1.442695, %v1043_v17 }
 0x4e4   : > { %v1052_v19 = vpop.permute.xlu1 %1051 }
 0x4e5   : > { %9738 = vpow2.f32 %v1044_v18  ;;  %9146 = vmatpush3.msk.msra.mxu1 %vm1057_vm6, %v1052_v19 }
 0x4e6   : > { %9150 = vmatprep.subr.mxu1 %v9974_v1 }
 0x4f2   : > { %v9739_v20 = vpop.eup %9738 }
 0x4f3   : > { %v1046_v21 = vsel %vm1039_vm5, %v9739_v20, 0.0 }
 0x4f4   : > { %1047 = vadd.xlane.f32.xlu1 %v1046_v21 }
 0x505   : > { %1130 = vrot.lane.b32.xlu1 %v10317_v10, %s11617_s3  ;;  %s11625_s3 = smov 112  }
 0x57d   : > { %v1048_v22 = vpop.xlane.xlu1 %1047 }
 0x57e   : > { %9740 = vrcp.f32 %v1048_v22 }
 0x581   : > { %v1131_v26 = vpop.permute.xlu1 %1130 }
 0x58b   : > { %v9741_v23 = vpop.eup %9740 }
 0x58c   : > { %v1050_v24 = vmul.f32 %v9741_v23, %v9739_v20 }
 0x58e   : > { %9148 = vmatmul.mubr.msk.f32.vlgmr.msra.gmra.mxu1 %vm1053_vm7, %v1050_v24 }
 0x58f   : > { %9151 = vmatpush3.xpose.msk.msra.mxu1 %vm963_vm4, %v1133_v25  ;;  %9152 = vmatprep.mubr.msk.f32.mxu1 %vm9975_vm3, %v9974_v1 }
 0x590   : > { %9155 = vmatprep.subr.mxu1 %v9974_v1 }
 0x592   : > { %9153 = vmatmul.mubr.msk.f32.vlgmr.msra.gmra.mxu1 %vm963_vm4, %v1131_v26 }
 0x593   : > { %9157 = vmatprep.mubr.msk.f32.mxu1 %vm9975_vm3, %v9974_v1 }
 0x64e   : > { %v10345_v27 = vpop.f32.mrf.mxu1 }
 0x650   : > { %v9149_v28 = vpop.f32.mrf.mxu1 }
 0x652   : > { %v1204_v29 = vpop.f32.mrf.mxu1 }
 0x653   : > { %v1208_v30 = vmul.f32 0.35355338, %v1204_v29 }
 0x654   : > { %v9154_v32 = vpop.f32.mrf.mxu1 }
 0x655   : > { %v1209_v33 = vsel %vm1039_vm5, %v1208_v30, -inf }
 0x656   : > { %1210 = vmax.xlane.f32.xlu0 %v1209_v33 }
 0x66c   : > { %1220 = vrot.lane.b32.xlu0 %v10317_v10, %s11621_s1  ;;  %s11635_s1 = smov 72  }
 0x670   : > { %1297 = vrot.lane.b32.xlu0 %v10317_v10, %s11625_s3  ;;  %s11627_s3 = smov 48  }
 0x6df   : > { %v1211_v34 = vpop.xlane.xlu0 %1210 }
 0x6e0   : > { %v1212_v35 = vsub.f32 %v1208_v30, %v1211_v34 }
 0x6e2   : > { %v1213_v37 = vmul.f32 1.442695, %v1212_v35 }
 0x6e3   : > { %v1221_v38 = vpop.permute.xlu0 %1220 }
 0x6e4   : > { %9742 = vpow2.f32 %v1213_v37  ;;  %9156 = vmatpush3.msk.msra.mxu1 %vm1057_vm6, %v1221_v38 }
 0x6e5   : > { %9160 = vmatprep.subr.mxu1 %v9974_v1 }
 0x6e7   : > { %v1298_v45 = vpop.permute.xlu0 %1297 }
 0x6f1   : > { %v9743_v39 = vpop.eup %9742 }
 0x6f2   : > { %v1215_v40 = vsel %vm1039_vm5, %v9743_v39, 0.0 }
 0x6f3   : > { %1216 = vadd.xlane.f32.xlu1 %v1215_v40 }
 0x704   : > { %1299 = vrot.lane.b32.xlu1 %v10317_v10, %s11623_s4  ;;  %s11638_s4 = smov 104  }
 0x77c   : > { %v1217_v41 = vpop.xlane.xlu1 %1216 }
 0x77d   : > { %9744 = vrcp.f32 %v1217_v41 }
 0x780   : > { %v1300_v44 = vpop.permute.xlu1 %1299 }
 0x78a   : > { %v9745_v42 = vpop.eup %9744 }
 0x78b   : > { %v1219_v43 = vmul.f32 %v9745_v42, %v9743_v39 }
 0x78d   : > { %9158 = vmatmul.mubr.msk.f32.vlgmr.msra.gmra.mxu1 %vm1053_vm7, %v1219_v43 }
 0x78e   : > { %9161 = vmatpush3.xpose.msk.msra.mxu1 %vm963_vm4, %v1300_v44  ;;  %9162 = vmatprep.mubr.msk.f32.mxu1 %vm9975_vm3, %v9974_v1 }
 0x78f   : > { %9165 = vmatprep.subr.mxu1 %v9974_v1 }
 0x791   : > { %9163 = vmatmul.mubr.msk.f32.vlgmr.msra.gmra.mxu1 %vm963_vm4, %v1298_v45 }
 0x792   : > { %9167 = vmatprep.mubr.msk.f32.mxu1 %vm9975_vm3, %v9974_v1 }
 0x84d   : > { %v10365_v46 = vpop.f32.mrf.mxu1 }
 0x84f   : > { %v9159_v47 = vpop.f32.mrf.mxu1 }
 0x851   : > { %v1371_v48 = vpop.f32.mrf.mxu1 }
 0x852   : > { %v1375_v49 = vmul.f32 0.35355338, %v1371_v48 }
 0x853   : > { %v9164_v50 = vpop.f32.mrf.mxu1 }
 0x854   : > { %v1376_v51 = vsel %vm1039_vm5, %v1375_v49, -inf }
 0x855   : > { %1377 = vmax.xlane.f32.xlu1 %v1376_v51 }
 0x866   : > { %1466 = vrot.lane.b32.xlu1 %v10317_v10, %s11635_s1  ;;  %s11699_s1 = smov 80  }
 0x86a   : > { %1464 = vrot.lane.b32.xlu1 %v10317_v10, %s11638_s4 }
 0x8de   : > { %v1378_v52 = vpop.xlane.xlu1 %1377 }
 0x8df   : > { %v1379_v53 = vsub.f32 %v1375_v49, %v1378_v52 }
 0x8e1   : > { %v1380_v54 = vmul.f32 1.442695, %v1379_v53 }
 0x8e2   : > { %v1467_v60 = vpop.permute.xlu1 %1466 }
 0x8e3   : > { %9746 = vpow2.f32 %v1380_v54 }
 0x8e6   : > { %v1465_v62 = vpop.permute.xlu1 %1464 }
 0x8f0   : > { %v9747_v55 = vpop.eup %9746 }
 0x8f1   : > { %v1382_v56 = vsel %vm1039_vm5, %v9747_v55, 0.0 }
 0x8f2   : > { %1383 = vadd.xlane.f32.xlu0 %v1382_v56 }
 0x908   : > { %1387 = vrot.lane.b32.xlu0 %v10317_v10, %s11627_s3  ;;  %s11633_s3 = smov 40  }
 0x97b   : > { %v1384_v57 = vpop.xlane.xlu0 %1383 }
 0x97c   : > { %9748 = vrcp.f32 %v1384_v57 }
 0x97f   : > { %v1388_v58 = vpop.permute.xlu0 %1387 }
 0x980   : > { %9166 = vmatpush3.msk.msra.mxu1 %vm1057_vm6, %v1388_v58 }
 0x981   : > { %9170 = vmatprep.subr.mxu1 %v9974_v1 }
 0x989   : > { %v9749_v59 = vpop.eup %9748 }
 0x98a   : > { %v1386_v61 = vmul.f32 %v9749_v59, %v9747_v55 }
 0x98c   : > { %9168 = vmatmul.mubr.msk.f32.vlgmr.msra.gmra.mxu1 %vm1053_vm7, %v1386_v61 }
 0x98d   : > { %9171 = vmatpush3.xpose.msk.msra.mxu1 %vm963_vm4, %v1467_v60  ;;  %9172 = vmatprep.mubr.msk.f32.mxu1 %vm9975_vm3, %v9974_v1 }
 0x98e   : > { %9175 = vmatprep.subr.mxu1 %v9974_v1 }
 0x990   : > { %9173 = vmatmul.mubr.msk.f32.vlgmr.msra.gmra.mxu1 %vm963_vm4, %v1465_v62 }
 0x991   : > { %9177 = vmatprep.mubr.msk.f32.mxu1 %vm9975_vm3, %v9974_v1 }
 0xa4c   : > { %v10385_v63 = vpop.f32.mrf.mxu1 }
 0xa4e   : > { %v9169_v0 = vpop.f32.mrf.mxu1 }
 0xa50   : > { %v1538_v2 = vpop.f32.mrf.mxu1 }
 0xa51   : > { %v1542_v3 = vmul.f32 0.35355338, %v1538_v2 }
 0xa52   : > { %v9174_v4 = vpop.f32.mrf.mxu1 }
 0xa53   : > { %v1543_v5 = vsel %vm1039_vm5, %v1542_v3, -inf }
 0xa54   : > { %1544 = vmax.xlane.f32.xlu0 %v1543_v5 }
 0xa6a   : > { %1554 = vrot.lane.b32.xlu0 %v10317_v10, %s11633_s3  ;;  %s11698_s3 = smov 112  }
 0xadd   : > { %v1545_v6 = vpop.xlane.xlu0 %1544 }
 0xade   : > { %v1546_v7 = vsub.f32 %v1542_v3, %v1545_v6 }
 0xae0   : > { %v1547_v9 = vmul.f32 1.442695, %v1546_v7 }
 0xae1   : > { %v1555_v11 = vpop.permute.xlu0 %1554 }
 0xae2   : > { %9750 = vpow2.f32 %v1547_v9  ;;  %9176 = vmatpush3.msk.msra.mxu1 %vm1057_vm6, %v1555_v11 }
 0xae3   : > { %9180 = vmatprep.subr.mxu1 %v9974_v1 }
 0xaef   : > { %v9751_v12 = vpop.eup %9750 }
 0xaf0   : > { %v1549_v13 = vsel %vm1039_vm5, %v9751_v12, 0.0 }
 0xaf1   : > { %1550 = vadd.xlane.f32.xlu1 %v1549_v13 }
 0xb02   : > { %1653 = vrot.lane.b32.xlu1 %v10396_v16, %s11629_s24  ;;  %s11696_s24 = smov 64  }
 0xb06   : > { %1820 = vrot.lane.b32.xlu1 %v10396_v16, %s11631_s6  ;;  %s11697_s6 = smov 120  }
 0xb7a   : > { %v1551_v17 = vpop.xlane.xlu1 %1550 }
 0xb7b   : > { %9752 = vrcp.f32 %v1551_v17 }
 0xb7e   : > { %v1654_v20 = vpop.permute.xlu1 %1653 }
 0xb82   : > { %v1821_v33 = vpop.permute.xlu1 %1820 }
 0xb88   : > { %v9753_v18 = vpop.eup %9752 }
 0xb89   : > { %v1553_v19 = vmul.f32 %v9753_v18, %v9751_v12 }
 0xb8b   : > { %9178 = vmatmul.mubr.msk.f32.vlgmr.msra.gmra.mxu1 %vm1053_vm7, %v1553_v19 }
 0xb8c   : > { %9181 = vmatpush3.xpose.msk.msra.mxu1 %vm963_vm4, %v1654_v20  ;;  %9182 = vmatprep.mubr.msk.f32.mxu1 %vm9975_vm3, %v9974_v1 }
 0xb8d   : > { %9185 = vmatprep.subr.mxu1 %v9974_v1 }
 0xb8f   : > { %9183 = vmatmul.mubr.msk.f32.vlgmr.msra.gmra.mxu1 %vm963_vm4, %v10396_v16 }
 0xb90   : > { %9187 = vmatprep.mubr.msk.f32.mxu1 %vm9975_vm3, %v9974_v1 }
 0xc4b   : > { %v10411_v8 = vpop.f32.mrf.mxu1 }
 0xc4d   : > { %v9179_v10 = vpop.f32.mrf.mxu1 }
 0xc4f   : > { %v1725_v21 = vpop.f32.mrf.mxu1 }
 0xc50   : > { %v1729_v22 = vmul.f32 0.35355338, %v1725_v21 }
 0xc51   : > { %v9184_v23 = vpop.f32.mrf.mxu1 }
 0xc52   : > { %v1730_v24 = vsel %vm1039_vm5, %v1729_v22, -inf  ;;  %v2340_v23 = vld [vmem:[%s11704_s7 + $0x10] sm:$0xff] }
 0xc53   : > { %1731 = vmax.xlane.f32.xlu0 %v1730_v24  ;;  %v2339_v24 = vld [vmem:[%s11704_s7 + $0x8] sm:$0xff] }
 0xc69   : > { %1741 = vrot.lane.b32.xlu0 %v10396_v16, %s11696_s24 }
 0xc6d   : > { %1818 = vrot.lane.b32.xlu0 %v10396_v16, %s11697_s6 }
 0xc71   : > { %1985 = vrot.lane.b32.xlu0 %v10396_v16, %s11698_s3 }
 0xc75   : > { %2152 = vrot.lane.b32.xlu0 %v10396_v16, %s11638_s4  ;;  %s11701_s4 = smov 56  }
 0xcdc   : > { %v1732_v25 = vpop.xlane.xlu0 %1731 }
 0xcdd   : > { %v1733_v26 = vsub.f32 %v1729_v22, %v1732_v25  ;;  %v2341_v22 = vld [vmem:[%s11704_s7 + $0x18] sm:$0xff] }
 0xcdf   : > { %v1734_v28 = vmul.f32 1.442695, %v1733_v26  ;;  %v2338_v26 = vld [vmem:[%s11704_s7] sm:$0xff] }
 0xce0   : > { %v1742_v29 = vpop.permute.xlu0 %1741 }
 0xce1   : > { %9754 = vpow2.f32 %v1734_v28  ;;  %9186 = vmatpush3.msk.msra.mxu1 %vm1057_vm6, %v1742_v29 }
 0xce2   : > { %9190 = vmatprep.subr.mxu1 %v9974_v1 }
 0xce4   : > { %v1819_v38 = vpop.permute.xlu0 %1818 }
 0xce8   : > { %v1986_v40 = vpop.permute.xlu0 %1985 }
 0xcec   : > { %v2153_v42 = vpop.permute.xlu0 %2152 }
 0xcee   : > { %v9755_v30 = vpop.eup %9754 }
 0xcef   : > { %v1736_v32 = vsel %vm1039_vm5, %v9755_v30, 0.0 }
 0xcf0   : > { %1737 = vadd.xlane.f32.xlu1 %v1736_v32 }
 0xd01   : > { %1987 = vrot.lane.b32.xlu1 %v10396_v16, %s11699_s1 }
 0xd05   : > { %2154 = vrot.lane.b32.xlu1 %v10396_v16, %s11700_s0 }
 0xd79   : > { %v1738_v34 = vpop.xlane.xlu1 %1737 }
 0xd7a   : > { %9756 = vrcp.f32 %v1738_v34 }
 0xd7d   : > { %v1988_v39 = vpop.permute.xlu1 %1987 }
 0xd81   : > { %v2155_v41 = vpop.permute.xlu1 %2154 }
 0xd87   : > { %v9757_v35 = vpop.eup %9756 }
 0xd88   : > { %v1740_v37 = vmul.f32 %v9757_v35, %v9755_v30 }
 0xd8a   : > { %9188 = vmatmul.mubr.msk.f32.vlgmr.msra.gmra.mxu1 %vm1053_vm7, %v1740_v37 }
 0xd8b   : > { %9191 = vmatpush3.xpose.msk.msra.mxu1 %vm963_vm4, %v1821_v33  ;;  %9192 = vmatprep.mubr.msk.f32.mxu1 %vm9975_vm3, %v9974_v1 }
 0xd8c   : > { %9200 = vmatprep.subr.mxu1 %v9974_v1 }
 0xd8e   : > { %9193 = vmatmul.mubr.msk.f32.vlgmr.msra.gmra.mxu1 %vm963_vm4, %v1819_v38 }
 0xd8f   : > { %9201 = vmatpush3.xpose.msk.msra.mxu1 %vm963_vm4, %v1988_v39  ;;  %9202 = vmatprep.mubr.msk.f32.mxu1 %vm9975_vm3, %v9974_v1 }
 0xd90   : > { %9210 = vmatprep.subr.mxu1 %v9974_v1 }
 0xd92   : > { %9203 = vmatmul.mubr.msk.f32.vlgmr.msra.gmra.mxu1 %vm963_vm4, %v1986_v40 }
 0xd93   : > { %9211 = vmatpush3.xpose.msk.msra.mxu1 %vm963_vm4, %v2155_v41  ;;  %9212 = vmatprep.mubr.msk.f32.mxu1 %vm9975_vm3, %v9974_v1 }
 0xd94   : > { %9220 = vmatprep.subr.mxu1 %v2341_v22 }
 0xd96   : > { %9213 = vmatmul.mubr.msk.f32.vlgmr.msra.gmra.mxu1 %vm963_vm4, %v2153_v42 }
 0xd97   : > { %9221 = vmatpush3.msra.mxu1 %v2341_v22  ;;  %v2594_v22 = vld [vmem:[%s11594_s13 + $0x38] sm:$0xff] }
 0xd98   : > { %9222 = vmatprep.subr.mxu1 %v2340_v23 }
 0xd99   : > { %9223 = vmatpush3.msra.mxu1 %v2340_v23  ;;  %v2593_v23 = vld [vmem:[%s11594_s13 + $0x30] sm:$0xff] }
 0xd9a   : > { %9224 = vmatprep.subr.mxu1 %v2339_v24 }
 0xd9b   : > { %9225 = vmatpush3.msra.mxu1 %v2339_v24  ;;  %v2592_v24 = vld [vmem:[%s11594_s13 + $0x28] sm:$0xff] }
 0xd9c   : > { %9226 = vmatprep.subr.mxu1 %v2338_v26 }
 0xd9d   : > { %9227 = vmatpush3.msra.mxu1 %v2338_v26  ;;  %v2590_v26 = vld [vmem:[%s11594_s13 + $0x18] sm:$0xff] }
 0xd9e   : > { %9242 = vmatprep.subr.mxu1 %v2594_v22 }
 0xe4a   : > { %v10444_v43 = vpop.f32.mrf.mxu1 }
 0xe4c   : > { %v9189_v44 = vpop.f32.mrf.mxu1 }
 0xe4e   : > { %v1892_v45 = vpop.f32.mrf.mxu1 }
 0xe4f   : > { %v1896_v47 = vmul.f32 0.35355338, %v1892_v45 }
 0xe50   : > { %v9194_v48 = vpop.f32.mrf.mxu1 }
 0xe51   : > { %v1897_v49 = vsel %vm1039_vm5, %v1896_v47, -inf }
 0xe52   : > { %1898 = vmax.xlane.f32.xlu1 %v1897_v49  ;;  %v2059_v50 = vpop.f32.mrf.mxu1 }
 0xe53   : > { %v2063_v51 = vmul.f32 0.35355338, %v2059_v50  ;;  %v8629_v50 = vld [vmem:[%s11707_s8] ss:$0 sm:$0xff] }
 0xe54   : > { %v9204_v52 = vpop.f32.mrf.mxu1 }
 0xe55   : > { %v2064_v53 = vsel %vm1039_vm5, %v2063_v51, -inf }
 0xe56   : > { %2065 = vmax.xlane.f32.xlu0 %v2064_v53  ;;  %v2226_v54 = vpop.f32.mrf.mxu1 }
 0xe57   : > { %v2230_v55 = vmul.f32 0.35355338, %v2226_v54 }
 0xe58   : > { %v9214_v56 = vpop.f32.mrf.mxu1 }
 0xe59   : > { %v2231_v57 = vsel %vm1039_vm5, %v2230_v55, -inf }
 0xe5a   : > { %2232 = vmax.xlane.f32.xlu0 %v2231_v57 }
 0xe63   : > { %1908 = vrot.lane.b32.xlu1 %v10396_v16, %s11701_s4 }
 0xedb   : > { %v1899_v58 = vpop.xlane.xlu1 %1898 }
 0xedc   : > { %v1900_v59 = vsub.f32 %v1896_v47, %v1899_v58 }
 0xede   : > { %v1901_v60 = vmul.f32 1.442695, %v1900_v59 }
 0xedf   : > { %v2066_v61 = vpop.xlane.xlu0 %2065  ;;  %v1909_v62 = vpop.permute.xlu1 %1908 }
 0xee0   : > { %9758 = vpow2.f32 %v1901_v60  ;;  %v2067_v0 = vsub.f32 %v2063_v51, %v2066_v61  ;;  %9196 = vmatpush3.msk.msra.mxu0 %vm1057_vm6, %v1909_v62 }
 0xee1   : > { %9205 = vmatprep.subr.mxu0 %v9974_v1 }
 0xee2   : > { %v2068_v2 = vmul.f32 1.442695, %v2067_v0 }
 0xee3   : > { %v2233_v3 = vpop.xlane.xlu0 %2232 }
 0xee4   : > { %9760 = vpow2.f32 %v2068_v2  ;;  %v2234_v4 = vsub.f32 %v2230_v55, %v2233_v3  ;;  %v2480_v3 = vld [vmem:[%s11592_s11 + $0x18] sm:$0xff] }
 0xee6   : > { %v2235_v5 = vmul.f32 1.442695, %v2234_v4  ;;  %v2479_v4 = vld [vmem:[%s11592_s11 + $0x10] sm:$0xff] }
 0xee8   : > { %9762 = vpow2.f32 %v2235_v5  ;;  %v2478_v5 = vld [vmem:[%s11592_s11 + $0x8] sm:$0xff] }
 0xeed   : > { %v9759_v6 = vpop.eup %9758 }
 0xeee   : > { %v1903_v7 = vsel %vm1039_vm5, %v9759_v6, 0.0 }
 0xeef   : > { %1904 = vadd.xlane.f32.xlu0 %v1903_v7 }
 0xef1   : > { %v9761_v9 = vpop.eup %9760 }
 0xef2   : > { %v2070_v11 = vsel %vm1039_vm5, %v9761_v9, 0.0 }
 0xef3   : > { %2071 = vadd.xlane.f32.xlu1 %v2070_v11 }
 0xef5   : > { %v9763_v12 = vpop.eup %9762 }
 0xef6   : > { %v2237_v13 = vsel %vm1039_vm5, %v9763_v12, 0.0 }
 0xef7   : > { %2238 = vadd.xlane.f32.xlu0 %v2237_v13 }
 0xf04   : > { %2242 = vrot.lane.b32.xlu1 %v10396_v16, %s11702_s29 }
 0xf0d   : > { %2075 = vrot.lane.b32.xlu0 %v10396_v16, %s11703_s25 }
 0xf11   : > { %1632 = vrot.lane.b32.xlu0 %v10365_v46, %s11645_s23  ;;  %s11714_s23 = sld [smem:[#allocation22_spill]] }
 0xf15   : > { %1636 = vrot.lane.b32.xlu0 %v10385_v63, %s11643_s22  ;;  %s11705_s22 = smov 8  }
 0xf78   : > { %v1905_v14 = vpop.xlane.xlu0 %1904 }
 0xf79   : > { %9764 = vrcp.f32 %v1905_v14 }
 0xf7c   : > { %v2072_v15 = vpop.xlane.xlu1 %2071 }
 0xf7d   : > { %9766 = vrcp.f32 %v2072_v15 }
 0xf80   : > { %v2239_v17 = vpop.xlane.xlu0 %2238  ;;  %v2243_v63 = vpop.permute.xlu1 %2242 }
 0xf81   : > { %9768 = vrcp.f32 %v2239_v17  ;;  %v8630_v17 = vld [vmem:[%s11590_s9] ss:$0 sm:$0xff] }
 0xf84   : > { %v2076_v20 = vpop.permute.xlu0 %2075 }
 0xf86   : > { %v9765_v18 = vpop.eup %9764 }
 0xf87   : > { %v1907_v19 = vmul.f32 %v9765_v18, %v9759_v6  ;;  %v2477_v6 = vld [vmem:[%s11592_s11] sm:$0xff] }
 0xf88   : > { %v1633_v35 = vpop.permute.xlu0 %1632 }
 0xf89   : > { %9198 = vmatmul.mubr.msk.f32.vlgmr.msra.gmra.mxu0 %vm1053_vm7, %v1907_v19  ;;  %v1643_v44 = vsel %vm963_vm4, %v10345_v27, %v1633_v35  ;;  %v8631_v19 = vld [vmem:[%s11591_s10] ss:$0 sm:$0xff] }
 0xf8a   : > { %v9767_v16 = vpop.eup %9766  ;;  %9206 = vmatpush3.msk.msra.mxu0 %vm1057_vm6, %v2076_v20  ;;  %9207 = vmatprep.mubr.msk.f32.mxu0 %vm9975_vm3, %v9974_v1 }
 0xf8b   : > { %9215 = vmatprep.subr.mxu0 %v9974_v1  ;;  %v2074_v46 = vmul.f32 %v9767_v16, %v9761_v9 }
 0xf8c   : > { %v1637_v41 = vpop.permute.xlu0 %1636 }
 0xf8d   : > { %9208 = vmatmul.mubr.msk.f32.vlgmr.msra.gmra.mxu0 %vm1053_vm7, %v2074_v46  ;;  %v1645_v45 = vsel %vm1644_vm10, %v1643_v44, %v1637_v41 }
 0xf8e   : > { %v9769_v10 = vpop.eup %9768  ;;  %9216 = vmatpush3.msk.msra.mxu0 %vm1057_vm6, %v2243_v63  ;;  %9217 = vmatprep.mubr.msk.f32.mxu0 %vm9975_vm3, %v9974_v1 }
 0xf8f   : > { %v2241_v21 = vmul.f32 %v9769_v10, %v9763_v12  ;;  %9231 = vmatprep.subr.mxu0 %v2480_v3 }
 0xf91   : > { %9218 = vmatmul.mubr.msk.f32.vlgmr.msra.gmra.mxu0 %vm1053_vm7, %v2241_v21 }
 0xf92   : > { %9232 = vmatpush3.msra.mxu0 %v2480_v3 }
 0xf93   : > { %9233 = vmatprep.subr.mxu0 %v2479_v4 }
 0xf94   : > { %9234 = vmatpush3.msra.mxu0 %v2479_v4 }
 0xf95   : > { %9235 = vmatprep.subr.mxu0 %v2478_v5 }
 0xf96   : > { %9236 = vmatpush3.msra.mxu0 %v2478_v5 }
 0xf97   : > { %9237 = vmatprep.subr.mxu0 %v2477_v6 }
 0xf98   : > { %9238 = vmatpush3.msra.mxu0 %v2477_v6 }
0x1049   : > { %v1981_v25 = vpop.f32.mrf.mxu0 }
0x104a   : > { %2320 = vrot.lane.b32.xlu1 %v1981_v25, %s11705_s22  ;;  %v2591_v25 = vld [vmem:[%s11594_s13 + $0x20] sm:$0xff] }
0x104b   : > { %v9199_v28 = vpop.f32.mrf.mxu0 }
0x104c   : > { %v2589_v28 = vld [vmem:[%s11594_s13 + $0x10] sm:$0xff] }
0x104d   : > { %v2148_v29 = vpop.f32.mrf.mxu0 }
0x104e   : > { %2324 = vrot.lane.b32.xlu1 %v2148_v29, %s11706_s19  ;;  %v2588_v29 = vld [vmem:[%s11594_s13 + $0x8] sm:$0xff] }
0x104f   : > { %v9209_v30 = vpop.f32.mrf.mxu0 }
0x1050   : > { %v2587_v30 = vld [vmem:[%s11594_s13] sm:$0xff] }
0x1051   : > { %v2315_v32 = vpop.f32.mrf.mxu0 }
0x1052   : > { %2328 = vrot.lane.b32.xlu1 %v2315_v32, %s11652_s18  ;;  %v8632_v32 = vld [vmem:[%s11593_s12] ss:$0 sm:$0xff] }
0x1053   : > { %v9219_v33 = vpop.f32.mrf.mxu0 }
0x1056   : > { %1640 = vrot.lane.b32.xlu1 %v10411_v8, %s11652_s18  ;;  %s11710_s18 = smov 104  }
0x10bc   : > { %v2321_v34 = vpop.permute.xlu1 %2320 }
0x10bd   : > { %v2331_v38 = vsel %vm963_vm4, %v10444_v43, %v2321_v34 }
0x10c0   : > { %v2325_v37 = vpop.permute.xlu1 %2324 }
0x10c1   : > { %v2332_v39 = vsel %vm1644_vm10, %v2331_v38, %v2325_v37 }
0x10c4   : > { %v2329_v40 = vpop.permute.xlu1 %2328 }
0x10c5   : > { %v2333_v42 = vsel %vm1646_vm9, %v2332_v39, %v2329_v40 }
0x10c6   : > { %v2335_v8 = vrot.slane %v2333_v42, 3 }
0x10c8   : > { %v1641_v47 = vpop.permute.xlu1 %1640 }
0x10c9   : > { %v1647_v48 = vsel %vm1646_vm9, %v1645_v45, %v1641_v47 }
0x10ca   : > { %v2337_v49 = vsel %vm1057_vm6, %v1647_v48, %v2335_v8 }
0x10cb   : > { %9228 = vmatprep.mubr.msk.f32.mxu1 %vm823_vm1, %v2337_v49 }
0x10cc   : > { %9229 = vmatmul.mubr.msk.f32.vlgmr.msra.gmra.mxu1 %vm823_vm1, %v2335_v8 }
0x10cd   : > { %9243 = vmatpush3.msra.mxu1 %v2594_v22 }
0x10ce   : > { %9244 = vmatprep.subr.mxu1 %v2593_v23 }
0x10cf   : > { %9245 = vmatpush3.msra.mxu1 %v2593_v23 }
0x10d0   : > { %9246 = vmatprep.subr.mxu1 %v2592_v24 }
0x10d1   : > { %9247 = vmatpush3.msra.mxu1 %v2592_v24 }
0x10d2   : > { %9248 = vmatprep.subr.mxu1 %v2591_v25 }
0x10d3   : > { %9249 = vmatpush3.msra.mxu1 %v2591_v25  ;;  %v8641_v25 = vld [vmem:[%s11694_s28 + $0x1] ss:$0 sm:$0xff] }
0x10d4   : > { %9250 = vmatprep.subr.mxu1 %v2590_v26 }
0x10d5   : > { %9251 = vmatpush3.msra.mxu1 %v2590_v26 }
0x10d6   : > { %9252 = vmatprep.subr.mxu1 %v2589_v28 }
0x10d7   : > { %9253 = vmatpush3.msra.mxu1 %v2589_v28 }
0x10d8   : > { %9254 = vmatprep.subr.mxu1 %v2588_v29 }
0x10d9   : > { %9255 = vmatpush3.msra.mxu1 %v2588_v29 }
0x10da   : > { %9256 = vmatprep.subr.mxu1 %v2587_v30 }
0x10db   : > { %9257 = vmatpush3.msra.mxu1 %v2587_v30 }
0x10dc   : > { %9282 = vmatprep.subr.mxu1 %v9974_v1 }
0x118c   : > { %v9230_v43 = vpop.f32.mrf.mxu1 }
0x118d   : > { %v2423_v51 = vadd.f32 %v9230_v43, %v10279_v36 }
0x118e   : > { %v2413_v27 = vpop.f32.mrf.mxu1 }
0x118f   : > { %v10506_v52 = vadd.f32 %v8629_v50, %v2423_v51  ;;  %v2422_v53 = vadd.f32 %v2413_v27, %v10272_v31 }
0x1191   : > { %v10509_v54 = vadd.f32 %v8629_v50, %v2422_v53  ;;  %v2438_v55 = vsel %vm827_vm2, %v10506_v52, 0.0 }
0x1192   : > { %2439 = vadd.xlane.f32.xlu1 %v2438_v55 }
0x1193   : > { %v2435_v56 = vsel %vm823_vm1, %v10509_v54, 0.0 }
0x1194   : > { %2436 = vadd.xlane.f32.xlu0 %v2435_v56 }
0x121b   : > { %v2440_v57 = vpop.xlane.xlu1 %2439 }
0x121c   : > { %v2442_v58 = vmul.f32 0.03125, %v2440_v57 }
0x121d   : > { %v2437_v59 = vpop.xlane.xlu0 %2436 }
0x121e   : > { %v2441_v60 = vmul.f32 0.03125, %v2437_v59  ;;  %v2444_v36 = vsub.f32 %v10506_v52, %v2442_v58  ;;  %v8637_v58 = vld [vmem:[%s11595_s14] ss:$0 sm:$0xff] }
0x1220   : > { %v2443_v61 = vsub.f32 %v10509_v54, %v2441_v60  ;;  %v2446_v0 = vmul.f32 %v2444_v36, %v2444_v36 }
0x1222   : > { %v2445_v62 = vmul.f32 %v2443_v61, %v2443_v61  ;;  %v2450_v2 = vsel %vm827_vm2, %v2446_v0, 0.0 }
0x1224   : > { %v2447_v31 = vsel %vm823_vm1, %v2445_v62, 0.0 }
0x1225   : > { %2448 = vadd.xlane.f32.xlu0 %v2447_v31 }
0x1229   : > { %2451 = vadd.xlane.f32.xlu0 %v2450_v2 }
0x12ae   : > { %v2449_v7 = vpop.xlane.xlu0 %2448 }
0x12af   : > { %v2453_v9 = vmul.f32 0.03125, %v2449_v7 }
0x12b1   : > { %v2455_v11 = vadd.f32 1e-06, %v2453_v9 }
0x12b2   : > { %v2452_v12 = vpop.xlane.xlu0 %2451 }
0x12b3   : > { %9770 = vrsqrt.f32 %v2455_v11  ;;  %v2454_v13 = vmul.f32 0.03125, %v2452_v12  ;;  %v8645_v12 = vld [vmem:[%s11692_s27 + $0x38] sm:$0xff] }
0x12b4   : > { %9261 = vmatprep.subr.mxu0 %v8645_v12 }
0x12b5   : > { %v2456_v14 = vadd.f32 1e-06, %v2454_v13  ;;  %v8644_v13 = vld [vmem:[%s11692_s27 + $0x30] sm:$0xff] }
0x12b7   : > { %9772 = vrsqrt.f32 %v2456_v14  ;;  %v8643_v14 = vld [vmem:[%s11692_s27 + $0x28] sm:$0xff] }
0x12c0   : > { %v9771_v15 = vpop.eup %9770 }
0x12c1   : > { %v2459_v18 = vmul.f32 %v9771_v15, %v2443_v61  ;;  %v8642_v15 = vld [vmem:[%s11692_s27 + $0x20] sm:$0xff] }
0x12c3   : > { %v2467_v20 = vmul.f32 %v8630_v17, %v2459_v18 }
0x12c4   : > { %v9773_v16 = vpop.eup %9772 }
0x12c5   : > { %v2460_v46 = vmul.f32 %v9773_v16, %v2444_v36  ;;  %v2475_v63 = vadd.f32 %v8631_v19, %v2467_v20 }
0x12c7   : > { %v2468_v10 = vmul.f32 %v8630_v17, %v2460_v46  ;;  %9239 = vmatprep.mubr.msk.f32.mxu0 %vm823_vm1, %v2475_v63 }
0x12c9   : > { %v2476_v21 = vadd.f32 %v8631_v19, %v2468_v10  ;;  %v8640_v10 = vld [vmem:[%s11693_s26 + $0x1] ss:$0 sm:$0xff] }
0x12cb   : > { %9240 = vmatmul.mubr.msk.f32.vlgmr.msra.gmra.mxu0 %vm823_vm1, %v2476_v21 }
0x12cc   : > { %9262 = vmatpush3.msra.mxu0 %v8645_v12 }
0x12cd   : > { %9263 = vmatprep.subr.mxu0 %v8644_v13 }
0x12ce   : > { %9264 = vmatpush3.msra.mxu0 %v8644_v13 }
0x12cf   : > { %9265 = vmatprep.subr.mxu0 %v8643_v14 }
0x12d0   : > { %9266 = vmatpush3.msra.mxu0 %v8643_v14 }
0x12d1   : > { %9267 = vmatprep.subr.mxu0 %v8642_v15 }
0x12d2   : > { %9268 = vmatpush3.msra.mxu0 %v8642_v15 }
0x12d3   : > { %9272 = vmatprep.subr.mxu0 %v9974_v1 }
0x138b   : > { %v9241_v33 = vpop.f32.mrf.mxu0 }
0x138c   : > { %v2566_v34 = vadd.f32 %v9241_v33, %v8632_v32 }
0x138d   : > { %v2560_v35 = vpop.f32.mrf.mxu0 }
0x138e   : > { %v2570_v37 = vmul.f32 %v2566_v34, %v2566_v34  ;;  %v2561_v38 = vadd.f32 %v8632_v32, %v2560_v35  ;;  %v8647_v32 = vld [vmem:[%s11695_s2 + $0x1] ss:$0 sm:$0xff] }
0x1390   : > { %v2572_v39 = vmul.f32 %v2570_v37, %v2566_v34  ;;  %v2569_v40 = vmul.f32 %v2561_v38, %v2561_v38 }
0x1392   : > { %v2574_v41 = vmul.f32 0.044715, %v2572_v39  ;;  %v2571_v42 = vmul.f32 %v2569_v40, %v2561_v38 }
0x1394   : > { %v2576_v44 = vadd.f32 %v2574_v41, %v2566_v34  ;;  %v2573_v45 = vmul.f32 0.044715, %v2571_v42 }
0x1396   : > { %v2578_v8 = vmul.f32 0.7978846, %v2576_v44  ;;  %v2575_v47 = vadd.f32 %v2573_v45, %v2561_v38 }
0x1398   : > { %9774 = vtanh.f32 %v2578_v8  ;;  %v2577_v48 = vmul.f32 0.7978846, %v2575_v47 }
0x139a   : > { %9776 = vtanh.f32 %v2577_v48 }
0x13a5   : > { %v9775_v49 = vpop.eup %9774 }
0x13a6   : > { %v2582_v43 = vadd.f32 1.0, %v9775_v49 }
0x13a7   : > { %v9777_v50 = vpop.eup %9776 }
0x13a8   : > { %v2581_v51 = vadd.f32 1.0, %v9777_v50  ;;  %v2584_v27 = vmul.f32 0.5, %v2582_v43 }
0x13aa   : > { %v2583_v53 = vmul.f32 0.5, %v2581_v51  ;;  %v2586_v56 = vmul.f32 %v2584_v27, %v2566_v34 }
0x13ac   : > { %v2585_v55 = vmul.f32 %v2583_v53, %v2561_v38 }
0x13ae   : > { %9258 = vmatprep.mubr.msk.f32.mxu1 %vm739_vm0, %v2585_v55 }
0x13af   : > { %9259 = vmatmul.mubr.msk.f32.vlgmr.msra.gmra.mxu1 %vm739_vm0, %v2586_v56 }
0x13b0   : > { %9284 = vmatprep.mubr.msk.f32.mxu1 %vm9975_vm3, %v9974_v1 }
0x146f   : > { %v9260_v57 = vpop.f32.mrf.mxu1 }
0x1470   : > { %v2677_v59 = vadd.f32 %v9260_v57, %v10506_v52 }
0x1471   : > { %v2667_v60 = vpop.f32.mrf.mxu1 }
0x1472   : > { %v10575_v36 = vadd.f32 %v8637_v58, %v2677_v59  ;;  %v2676_v61 = vadd.f32 %v2667_v60, %v10509_v54 }
0x1474   : > { %v10578_v62 = vadd.f32 %v8637_v58, %v2676_v61  ;;  %v2694_v31 = vsel %vm827_vm2, %v10575_v36, 0.0 }
0x1475   : > { %2695 = vadd.xlane.f32.xlu1 %v2694_v31 }
0x1476   : > { %v2691_v0 = vsel %vm823_vm1, %v10578_v62, 0.0 }
0x1477   : > { %2692 = vadd.xlane.f32.xlu0 %v2691_v0 }
0x14fe   : > { %v2696_v2 = vpop.xlane.xlu1 %2695 }
0x14ff   : > { %v2698_v3 = vmul.f32 0.03125, %v2696_v2 }
0x1500   : > { %v2693_v4 = vpop.xlane.xlu0 %2692 }
0x1501   : > { %v2700_v52 = vsub.f32 %v10575_v36, %v2698_v3  ;;  %v2697_v5 = vmul.f32 0.03125, %v2693_v4 }
0x1503   : > { %v2699_v6 = vsub.f32 %v10578_v62, %v2697_v5  ;;  %v2702_v7 = vmul.f32 %v2700_v52, %v2700_v52 }
0x1505   : > { %v2706_v54 = vsel %vm827_vm2, %v2702_v7, 0.0  ;;  %v2701_v9 = vmul.f32 %v2699_v6, %v2699_v6 }
0x1506   : > { %2707 = vadd.xlane.f32.xlu1 %v2706_v54 }
0x1507   : > { %v2703_v11 = vsel %vm823_vm1, %v2701_v9, 0.0 }
0x1508   : > { %2704 = vadd.xlane.f32.xlu0 %v2703_v11 }
0x158f   : > { %v2708_v17 = vpop.xlane.xlu1 %2707 }
0x1590   : > { %v2710_v18 = vmul.f32 0.03125, %v2708_v17 }
0x1591   : > { %v2705_v19 = vpop.xlane.xlu0 %2704 }
0x1592   : > { %v2712_v20 = vadd.f32 1e-06, %v2710_v18  ;;  %v2709_v16 = vmul.f32 0.03125, %v2705_v19 }
0x1594   : > { %9778 = vrsqrt.f32 %v2712_v20  ;;  %v2711_v46 = vadd.f32 1e-06, %v2709_v16 }
0x1596   : > { %9780 = vrsqrt.f32 %v2711_v46 }
0x15a1   : > { %v9779_v63 = vpop.eup %9778 }
0x15a2   : > { %v2716_v21 = vmul.f32 %v9779_v63, %v2700_v52 }
0x15a3   : > { %v9781_v22 = vpop.eup %9780 }
0x15a4   : > { %v2715_v23 = vmul.f32 %v9781_v22, %v2699_v6  ;;  %v2724_v24 = vmul.f32 %v8640_v10, %v2716_v21 }
0x15a6   : > { %v2723_v26 = vmul.f32 %v8640_v10, %v2715_v23  ;;  %v2732_v29 = vadd.f32 %v8641_v25, %v2724_v24 }
0x15a8   : > { %v2731_v28 = vadd.f32 %v8641_v25, %v2723_v26 }
0x15aa   : > { %9269 = vmatprep.mubr.msk.f32.mxu0 %vm823_vm1, %v2731_v28 }
0x15ab   : > { %9270 = vmatmul.mubr.msk.f32.vlgmr.msra.gmra.mxu0 %vm823_vm1, %v2732_v29 }
0x15ac   : > { %9274 = vmatprep.mubr.msk.f32.mxu0 %vm9975_vm3, %v9974_v1 }
0x166b   : > { %v9271_v30 = vpop.f32.mrf.mxu0 }
0x166c   : > { %v2824_v35 = vadd.f32 %v9271_v30, %v8647_v32 }
0x166d   : > { %v2818_v33 = vpop.f32.mrf.mxu0 }
0x166e   : > { %v10614_v34 = vadd.f32 %v8647_v32, %v2818_v33  ;;  %v3511_v38 = vrot.slane %v2824_v35, 5 }
0x1670   : > { %2995 = vrot.lane.b32.xlu1 %v10614_v34, %s11708_s20  ;;  %2828 = vrot.lane.b32.xlu0 %v10614_v34, %s11709_s21  ;;  %v3510_v37 = vrot.slane %v10614_v34, 5 }
0x1672   : > { %v10630_v39 = vsel %vm1649_vm8, %v3510_v37, %v3511_v38 }
0x1674   : > { %2993 = vrot.lane.b32.xlu1 %v10614_v34, %s11697_s6  ;;  %3160 = vrot.lane.b32.xlu0 %v10614_v34, %s11698_s3 }
0x1678   : > { %3162 = vrot.lane.b32.xlu1 %v10614_v34, %s11699_s1  ;;  %3327 = vrot.lane.b32.xlu0 %v10614_v34, %s11710_s18 }
0x167c   : > { %3329 = vrot.lane.b32.xlu1 %v10614_v34, %s11700_s0  ;;  %3680 = vrot.lane.b32.xlu0 %v10630_v39, %s11708_s20 }
0x1680   : > { %3847 = vrot.lane.b32.xlu0 %v10630_v39, %s11699_s1  ;;  %3513 = vrot.lane.b32.xlu1 %v10630_v39, %s11709_s21 }
0x1684   : > { %4014 = vrot.lane.b32.xlu0 %v10630_v39, %s11700_s0  ;;  %3678 = vrot.lane.b32.xlu1 %v10630_v39, %s11697_s6 }
0x1688   : > { %3845 = vrot.lane.b32.xlu1 %v10630_v39, %s11698_s3 }
0x168c   : > { %4012 = vrot.lane.b32.xlu1 %v10630_v39, %s11710_s18 }
0x16e2   : > { %v2996_v40 = vpop.permute.xlu1 %2995  ;;  %v2829_v41 = vpop.permute.xlu0 %2828 }
0x16e3   : > { %9273 = vmatpush3.xpose.msk.msra.mxu0 %vm963_vm4, %v2829_v41  ;;  %9283 = vmatpush3.xpose.msk.msra.mxu1 %vm963_vm4, %v2996_v40 }
0x16e4   : > { %9292 = vmatprep.subr.mxu1 %v9974_v1  ;;  %9277 = vmatprep.subr.mxu0 %v9974_v1 }
0x16e6   : > { %v2994_v42 = vpop.permute.xlu1 %2993  ;;  %9275 = vmatmul.mubr.msk.f32.vlgmr.msra.gmra.mxu0 %vm963_vm4, %v10614_v34  ;;  %v3161_v44 = vpop.permute.xlu0 %3160 }
0x16e7   : > { %9285 = vmatmul.mubr.msk.f32.vlgmr.msra.gmra.mxu1 %vm963_vm4, %v2994_v42  ;;  %9279 = vmatprep.mubr.msk.f32.mxu0 %vm9975_vm3, %v9974_v1 }
0x16e8   : > { %9294 = vmatprep.mubr.msk.f32.mxu1 %vm9975_vm3, %v9974_v1 }
0x16ea   : > { %v3163_v45 = vpop.permute.xlu1 %3162  ;;  %v3328_v8 = vpop.permute.xlu0 %3327 }
0x16eb   : > { %9293 = vmatpush3.xpose.msk.msra.mxu1 %vm963_vm4, %v3163_v45 }
0x16ec   : > { %9302 = vmatprep.subr.mxu1 %v9974_v1 }
0x16ee   : > { %v3330_v47 = vpop.permute.xlu1 %3329  ;;  %9295 = vmatmul.mubr.msk.f32.vlgmr.msra.gmra.mxu1 %vm963_vm4, %v3161_v44  ;;  %v3681_v48 = vpop.permute.xlu0 %3680 }
0x16ef   : > { %9303 = vmatpush3.xpose.msk.msra.mxu1 %vm963_vm4, %v3330_v47  ;;  %9304 = vmatprep.mubr.msk.f32.mxu1 %vm9975_vm3, %v9974_v1 }
0x16f0   : > { %9312 = vmatprep.subr.mxu1 %v9974_v1 }
0x16f2   : > { %9305 = vmatmul.mubr.msk.f32.vlgmr.msra.gmra.mxu1 %vm963_vm4, %v3328_v8  ;;  %v3514_v49 = vpop.permute.xlu1 %3513  ;;  %v3848_v50 = vpop.permute.xlu0 %3847 }
0x16f3   : > { %9313 = vmatpush3.xpose.msk.msra.mxu1 %vm963_vm4, %v3514_v49  ;;  %9314 = vmatprep.mubr.msk.f32.mxu1 %vm9975_vm3, %v9974_v1 }
0x16f4   : > { %9322 = vmatprep.subr.mxu1 %v9974_v1 }
0x16f6   : > { %9315 = vmatmul.mubr.msk.f32.vlgmr.msra.gmra.mxu1 %vm963_vm4, %v10630_v39  ;;  %v3679_v43 = vpop.permute.xlu1 %3678  ;;  %v4015_v27 = vpop.permute.xlu0 %4014 }
0x16f7   : > { %9323 = vmatpush3.xpose.msk.msra.mxu1 %vm963_vm4, %v3681_v48  ;;  %9324 = vmatprep.mubr.msk.f32.mxu1 %vm9975_vm3, %v9974_v1 }
0x16f8   : > { %9332 = vmatprep.subr.mxu1 %v9974_v1 }
0x16fa   : > { %9325 = vmatmul.mubr.msk.f32.vlgmr.msra.gmra.mxu1 %vm963_vm4, %v3679_v43  ;;  %v3846_v51 = vpop.permute.xlu1 %3845 }
0x16fb   : > { %9333 = vmatpush3.xpose.msk.msra.mxu1 %vm963_vm4, %v3848_v50  ;;  %9334 = vmatprep.mubr.msk.f32.mxu1 %vm9975_vm3, %v9974_v1 }
0x16fc   : > { %9342 = vmatprep.subr.mxu1 %v9974_v1 }
0x16fe   : > { %9335 = vmatmul.mubr.msk.f32.vlgmr.msra.gmra.mxu1 %vm963_vm4, %v3846_v51  ;;  %v4013_v53 = vpop.permute.xlu1 %4012 }
0x16ff   : > { %9343 = vmatpush3.xpose.msk.msra.mxu1 %vm963_vm4, %v4015_v27  ;;  %9344 = vmatprep.mubr.msk.f32.mxu1 %vm9975_vm3, %v9974_v1 }
0x1702   : > { %9345 = vmatmul.mubr.msk.f32.vlgmr.msra.gmra.mxu1 %vm963_vm4, %v4013_v53 }
0x17a6   : > { %v2900_v55 = vpop.f32.mrf.mxu0 }
0x17a7   : > { %v2904_v56 = vmul.f32 0.35355338, %v2900_v55  ;;  %v3067_v57 = vpop.f32.mrf.mxu1 }
0x17a8   : > { %v3071_v58 = vmul.f32 0.35355338, %v3067_v57  ;;  %v9276_v59 = vpop.f32.mrf.mxu0 }
0x17a9   : > { %v9286_v60 = vpop.f32.mrf.mxu1  ;;  %v2905_v61 = vsel %vm1039_vm5, %v2904_v56, -inf }
0x17aa   : > { %2906 = vmax.xlane.f32.xlu0 %v2905_v61  ;;  %v3072_v31 = vsel %vm1039_vm5, %v3071_v58, -inf }
0x17ab   : > { %3073 = vmax.xlane.f32.xlu1 %v3072_v31 }
0x17ae   : > { %v3234_v0 = vpop.f32.mrf.mxu1 }
0x17af   : > { %v10689_v2 = vmul.f32 0.35355338, %v3234_v0 }
0x17b0   : > { %v9296_v3 = vpop.f32.mrf.mxu1 }
0x17b1   : > { %v3239_v4 = vsel %vm1039_vm5, %v10689_v2, -inf }
0x17b2   : > { %v3401_v52 = vpop.f32.mrf.mxu1  ;;  %3240 = vmax.xlane.f32.xlu0 %v3239_v4 }
0x17b3   : > { %v3405_v5 = vmul.f32 0.35355338, %v3401_v52 }
0x17b4   : > { %v9306_v6 = vpop.f32.mrf.mxu1 }
0x17b5   : > { %v3406_v7 = vsel %vm1039_vm5, %v3405_v5, -inf }
0x17b6   : > { %3407 = vmax.xlane.f32.xlu0 %v3406_v7  ;;  %v3585_v54 = vpop.f32.mrf.mxu1 }
0x17b7   : > { %v3589_v9 = vmul.f32 0.35355338, %v3585_v54 }
0x17b8   : > { %v9316_v11 = vpop.f32.mrf.mxu1 }
0x17b9   : > { %v3590_v12 = vsel %vm1039_vm5, %v3589_v9, -inf }
0x17ba   : > { %3591 = vmax.xlane.f32.xlu0 %v3590_v12  ;;  %v3752_v13 = vpop.f32.mrf.mxu1 }
0x17bb   : > { %v3756_v14 = vmul.f32 0.35355338, %v3752_v13 }
0x17bc   : > { %v9326_v15 = vpop.f32.mrf.mxu1 }
0x17bd   : > { %v3757_v17 = vsel %vm1039_vm5, %v3756_v14, -inf }
0x17be   : > { %3758 = vmax.xlane.f32.xlu1 %v3757_v17  ;;  %v3919_v18 = vpop.f32.mrf.mxu1 }
0x17bf   : > { %v3923_v19 = vmul.f32 0.35355338, %v3919_v18 }
0x17c0   : > { %v9336_v20 = vpop.f32.mrf.mxu1 }
0x17c1   : > { %v3924_v16 = vsel %vm1039_vm5, %v3923_v19, -inf }
0x17c2   : > { %3925 = vmax.xlane.f32.xlu0 %v3924_v16  ;;  %v4086_v46 = vpop.f32.mrf.mxu1 }
0x17c3   : > { %v4090_v10 = vmul.f32 0.35355338, %v4086_v46 }
0x17c4   : > { %v9346_v63 = vpop.f32.mrf.mxu1 }
0x17c5   : > { %v4091_v21 = vsel %vm1039_vm5, %v4090_v10, -inf }
0x17cf   : > { %2916 = vrot.lane.b32.xlu1 %v10614_v34, %s11696_s24 }
0x17f3   : > { %4092 = vmax.xlane.f32.xlu1 %v4091_v21 }
0x1804   : > { %3250 = vrot.lane.b32.xlu1 %v10614_v34, %s11703_s25 }
0x1808   : > { %3417 = vrot.lane.b32.xlu1 %v10614_v34, %s11702_s29 }
0x180c   : > { %3601 = vrot.lane.b32.xlu1 %v10630_v39, %s11696_s24 }
0x1833   : > { %v2907_v22 = vpop.xlane.xlu0 %2906 }
0x1834   : > { %v2908_v23 = vsub.f32 %v2904_v56, %v2907_v22  ;;  %v3074_v24 = vpop.xlane.xlu1 %3073 }
0x1835   : > { %v3075_v25 = vsub.f32 %v3071_v58, %v3074_v24 }
0x1836   : > { %v2909_v26 = vmul.f32 1.442695, %v2908_v23 }
0x1837   : > { %v3076_v28 = vmul.f32 1.442695, %v3075_v25 }
0x1838   : > { %9782 = vpow2.f32 %v2909_v26 }
0x1839   : > { %9784 = vpow2.f32 %v3076_v28 }
0x183b   : > { %v3241_v29 = vpop.xlane.xlu0 %3240 }
0x183c   : > { %v3242_v8 = vsub.f32 %v10689_v2, %v3241_v29 }
0x183e   : > { %v3243_v48 = vmul.f32 1.442695, %v3242_v8  ;;  %v8685_v8 = vld [vmem:[%s11704_s7 + $0x38] sm:$0xff] }
0x183f   : > { %v3408_v30 = vpop.xlane.xlu0 %3407  ;;  %9352 = vmatprep.subr.mxu1 %v8685_v8 }
0x1840   : > { %v3409_v32 = vsub.f32 %v3405_v5, %v3408_v30  ;;  %9353 = vmatpush3.msra.mxu1 %v8685_v8 }
0x1842   : > { %v3410_v33 = vmul.f32 1.442695, %v3409_v32 }
0x1843   : > { %v3592_v47 = vpop.xlane.xlu0 %3591 }
0x1844   : > { %9786 = vpow2.f32 %v3410_v33  ;;  %v3593_v49 = vsub.f32 %v3589_v9, %v3592_v47 }
0x1845   : > { %v9783_v35 = vpop.eup %9782  ;;  %9788 = vpow2.f32 %v3243_v48 }
0x1846   : > { %v10706_v37 = vpop.eup %9784  ;;  %v2911_v38 = vsel %vm1039_vm5, %v9783_v35, 0.0  ;;  %v3594_v50 = vmul.f32 1.442695, %v3593_v49  ;;  %v8684_v49 = vld [vmem:[%s11704_s7 + $0x30] sm:$0xff] }
0x1847   : > { %2912 = vadd.xlane.f32.xlu0 %v2911_v38  ;;  %v3759_v40 = vpop.xlane.xlu1 %3758  ;;  %v3078_v41 = vsel %vm1039_vm5, %v10706_v37, 0.0  ;;  %9354 = vmatprep.subr.mxu1 %v8684_v49 }
0x1848   : > { %3079 = vadd.xlane.f32.xlu1 %v3078_v41  ;;  %9790 = vpow2.f32 %v3594_v50  ;;  %v3760_v27 = vsub.f32 %v3756_v14, %v3759_v40  ;;  %9355 = vmatpush3.msra.mxu1 %v8684_v49  ;;  %v8709_v49 = vld [vmem:[%s11594_s13 + $0x78] sm:$0xff] }
0x184a   : > { %v3761_v55 = vmul.f32 1.442695, %v3760_v27  ;;  %v8682_v27 = vld [vmem:[%s11704_s7 + $0x20] sm:$0xff] }
0x184b   : > { %v2917_v42 = vpop.permute.xlu1 %2916  ;;  %v3926_v43 = vpop.xlane.xlu0 %3925 }
0x184c   : > { %9278 = vmatpush3.msk.msra.mxu0 %vm1057_vm6, %v2917_v42  ;;  %v3927_v51 = vsub.f32 %v3923_v19, %v3926_v43  ;;  %v8683_v43 = vld [vmem:[%s11704_s7 + $0x28] sm:$0xff] }
0x184d   : > { %9287 = vmatprep.subr.mxu0 %v9974_v1  ;;  %9356 = vmatprep.subr.mxu1 %v8683_v43 }
0x184e   : > { %v3928_v53 = vmul.f32 1.442695, %v3927_v51  ;;  %9357 = vmatpush3.msra.mxu1 %v8683_v43  ;;  %v8708_v43 = vld [vmem:[%s11594_s13 + $0x70] sm:$0xff] }
0x184f   : > { %9358 = vmatprep.subr.mxu1 %v8682_v27 }
0x1850   : > { %9792 = vpow2.f32 %v3928_v53  ;;  %9359 = vmatpush3.msra.mxu1 %v8682_v27  ;;  %v8705_v27 = vld [vmem:[%s11594_s13 + $0x58] sm:$0xff] }
0x1851   : > { %v10713_v44 = vpop.eup %9786  ;;  %9794 = vpow2.f32 %v3761_v55  ;;  %9374 = vmatprep.subr.mxu1 %v8709_v49 }
0x1852   : > { %v3412_v45 = vsel %vm1039_vm5, %v10713_v44, 0.0  ;;  %v9789_v56 = vpop.eup %9788 }
0x1853   : > { %3413 = vadd.xlane.f32.xlu1 %v3412_v45 }
0x1855   : > { %v10723_v57 = vpop.eup %9790 }
0x1856   : > { %v3596_v61 = vsel %vm1039_vm5, %v10723_v57, 0.0 }
0x185d   : > { %3083 = vrot.lane.b32.xlu0 %v10614_v34, %s11701_s4  ;;  %v3245_v34 = vsel %vm1039_vm5, %v9789_v56, 0.0  ;;  %v10727_v31 = vpop.eup %9792 }
0x185e   : > { %v3930_v0 = vsel %vm1039_vm5, %v10727_v31, 0.0  ;;  %v9795_v2 = vpop.eup %9794 }
0x185f   : > { %v3763_v3 = vsel %vm1039_vm5, %v9795_v2, 0.0 }
0x1864   : > { %3768 = vrot.lane.b32.xlu1 %v10630_v39, %s11701_s4  ;;  %s11712_s4 = smov 56  }
0x187c   : > { %3246 = vadd.xlane.f32.xlu0 %v3245_v34  ;;  %v4093_v58 = vpop.xlane.xlu1 %4092 }
0x187d   : > { %v4094_v59 = vsub.f32 %v4090_v10, %v4093_v58 }
0x187f   : > { %v4095_v60 = vmul.f32 1.442695, %v4094_v59 }
0x1880   : > { %3597 = vadd.xlane.f32.xlu0 %v3596_v61  ;;  %v3251_v5 = vpop.permute.xlu1 %3250 }
0x1881   : > { %9796 = vpow2.f32 %v4095_v60 }
0x1884   : > { %3931 = vadd.xlane.f32.xlu0 %v3930_v0  ;;  %v3418_v6 = vpop.permute.xlu1 %3417 }
0x1888   : > { %3764 = vadd.xlane.f32.xlu1 %v3763_v3  ;;  %v3602_v7 = vpop.permute.xlu1 %3601 }
0x188e   : > { %v10732_v4 = vpop.eup %9796 }
0x188f   : > { %v4097_v52 = vsel %vm1039_vm5, %v10732_v4, 0.0 }
0x1890   : > { %4098 = vadd.xlane.f32.xlu0 %v4097_v52 }
0x1899   : > { %4102 = vrot.lane.b32.xlu1 %v10630_v39, %s11702_s29 }
0x18a6   : > { %3935 = vrot.lane.b32.xlu0 %v10630_v39, %s11703_s25 }
0x18d0   : > { %v2913_v54 = vpop.xlane.xlu0 %2912 }
0x18d1   : > { %9798 = vrcp.f32 %v2913_v54  ;;  %v3080_v9 = vpop.xlane.xlu1 %3079 }
0x18d2   : > { %9800 = vrcp.f32 %v3080_v9 }
0x18d4   : > { %v3084_v14 = vpop.permute.xlu0 %3083 }
0x18dc   : > { %v3414_v15 = vpop.xlane.xlu1 %3413 }
0x18de   : > { %v9799_v11 = vpop.eup %9798 }
0x18df   : > { %v2915_v12 = vmul.f32 %v9799_v11, %v9783_v35  ;;  %v9801_v13 = vpop.eup %9800  ;;  %v8689_v11 = vld [vmem:[%s11707_s8 + $0x1] ss:$0 sm:$0xff] }
0x18e0   : > { %v3082_v39 = vmul.f32 %v9801_v13, %v10706_v37  ;;  %v3769_v19 = vpop.permute.xlu1 %3768 }
0x18e1   : > { %9280 = vmatmul.mubr.msk.f32.vlgmr.msra.gmra.mxu0 %vm1053_vm7, %v2915_v12 }
0x18e2   : > { %9288 = vmatpush3.msk.msra.mxu0 %vm1057_vm6, %v3084_v14  ;;  %9289 = vmatprep.mubr.msk.f32.mxu0 %vm9975_vm3, %v9974_v1 }
0x18e3   : > { %9297 = vmatprep.subr.mxu0 %v9974_v1 }
0x18e5   : > { %9290 = vmatmul.mubr.msk.f32.vlgmr.msra.gmra.mxu0 %vm1053_vm7, %v3082_v39 }
0x18e6   : > { %9298 = vmatpush3.msk.msra.mxu0 %vm1057_vm6, %v3251_v5  ;;  %9299 = vmatprep.mubr.msk.f32.mxu0 %vm9975_vm3, %v9974_v1 }
0x18e7   : > { %9307 = vmatprep.subr.mxu0 %v9974_v1 }
0x1905   : > { %v3247_v17 = vpop.xlane.xlu0 %3246 }
0x1906   : > { %9802 = vrcp.f32 %v3247_v17 }
0x1907   : > { %9804 = vrcp.f32 %v3414_v15 }
0x1909   : > { %v3598_v18 = vpop.xlane.xlu0 %3597 }
0x190a   : > { %9806 = vrcp.f32 %v3598_v18 }
0x190d   : > { %v3932_v20 = vpop.xlane.xlu0 %3931 }
0x1911   : > { %v3765_v16 = vpop.xlane.xlu1 %3764 }
0x1912   : > { %9808 = vrcp.f32 %v3765_v16 }
0x1913   : > { %v9803_v46 = vpop.eup %9802  ;;  %9810 = vrcp.f32 %v3932_v20 }
0x1914   : > { %v3249_v63 = vmul.f32 %v9803_v46, %v9789_v56  ;;  %v9805_v10 = vpop.eup %9804 }
0x1915   : > { %v3416_v21 = vmul.f32 %v9805_v10, %v10713_v44  ;;  %v4103_v32 = vpop.permute.xlu1 %4102 }
0x1916   : > { %9300 = vmatmul.mubr.msk.f32.vlgmr.msra.gmra.mxu0 %vm1053_vm7, %v3249_v63 }
0x1917   : > { %9308 = vmatpush3.msk.msra.mxu0 %vm1057_vm6, %v3418_v6  ;;  %9309 = vmatprep.mubr.msk.f32.mxu0 %vm9975_vm3, %v9974_v1  ;;  %v9807_v22 = vpop.eup %9806 }
0x1918   : > { %9317 = vmatprep.subr.mxu0 %v9974_v1  ;;  %v3600_v24 = vmul.f32 %v9807_v22, %v10723_v57 }
0x1919   : > { %v4099_v23 = vpop.xlane.xlu0 %4098 }
0x191a   : > { %9812 = vrcp.f32 %v4099_v23  ;;  %9310 = vmatmul.mubr.msk.f32.vlgmr.msra.gmra.mxu0 %vm1053_vm7, %v3416_v21  ;;  %v8697_v23 = vld [vmem:[%s11592_s11 + $0x38] sm:$0xff] }
0x191b   : > { %9318 = vmatpush3.msk.msra.mxu0 %vm1057_vm6, %v3602_v7  ;;  %9319 = vmatprep.mubr.msk.f32.mxu0 %vm9975_vm3, %v9974_v1 }
0x191c   : > { %9327 = vmatprep.subr.mxu0 %v9974_v1 }
0x191d   : > { %v3936_v29 = vpop.permute.xlu0 %3935 }
0x191e   : > { %9320 = vmatmul.mubr.msk.f32.vlgmr.msra.gmra.mxu0 %vm1053_vm7, %v3600_v24  ;;  %v8696_v24 = vld [vmem:[%s11592_s11 + $0x30] sm:$0xff] }
0x191f   : > { %v9809_v25 = vpop.eup %9808  ;;  %9328 = vmatpush3.msk.msra.mxu0 %vm1057_vm6, %v3769_v19  ;;  %9329 = vmatprep.mubr.msk.f32.mxu0 %vm9975_vm3, %v9974_v1 }
0x1920   : > { %9337 = vmatprep.subr.mxu0 %v9974_v1  ;;  %v3767_v26 = vmul.f32 %v9809_v25, %v9795_v2  ;;  %v9811_v28 = vpop.eup %9810  ;;  %v8695_v25 = vld [vmem:[%s11592_s11 + $0x28] sm:$0xff] }
0x1921   : > { %v3934_v30 = vmul.f32 %v9811_v28, %v10727_v31 }
0x1922   : > { %9330 = vmatmul.mubr.msk.f32.vlgmr.msra.gmra.mxu0 %vm1053_vm7, %v3767_v26  ;;  %v8694_v26 = vld [vmem:[%s11592_s11 + $0x20] sm:$0xff] }
0x1923   : > { %9338 = vmatpush3.msk.msra.mxu0 %vm1057_vm6, %v3936_v29  ;;  %9339 = vmatprep.mubr.msk.f32.mxu0 %vm9975_vm3, %v9974_v1 }
0x1924   : > { %9347 = vmatprep.subr.mxu0 %v9974_v1 }
0x1926   : > { %9340 = vmatmul.mubr.msk.f32.vlgmr.msra.gmra.mxu0 %vm1053_vm7, %v3934_v30 }
0x1927   : > { %v9813_v33 = vpop.eup %9812  ;;  %9348 = vmatpush3.msk.msra.mxu0 %vm1057_vm6, %v4103_v32  ;;  %9349 = vmatprep.mubr.msk.f32.mxu0 %vm9975_vm3, %v9974_v1 }
0x1928   : > { %v4101_v35 = vmul.f32 %v9813_v33, %v10732_v4  ;;  %9363 = vmatprep.subr.mxu0 %v8697_v23 }
0x192a   : > { %9350 = vmatmul.mubr.msk.f32.vlgmr.msra.gmra.mxu0 %vm1053_vm7, %v4101_v35 }
0x192b   : > { %9364 = vmatpush3.msra.mxu0 %v8697_v23 }
0x192c   : > { %9365 = vmatprep.subr.mxu0 %v8696_v24 }
0x192d   : > { %9366 = vmatpush3.msra.mxu0 %v8696_v24 }
0x192e   : > { %9367 = vmatprep.subr.mxu0 %v8695_v25 }
0x192f   : > { %9368 = vmatpush3.msra.mxu0 %v8695_v25 }
0x1930   : > { %9369 = vmatprep.subr.mxu0 %v8694_v26 }
0x1931   : > { %9370 = vmatpush3.msra.mxu0 %v8694_v26 }
0x19a1   : > { %v2989_v37 = vpop.f32.mrf.mxu0 }
0x19a3   : > { %v9281_v38 = vpop.f32.mrf.mxu0 }
0x19a4   : > { %v8692_v38 = vld [vmem:[%s11590_s9 + $0x1] ss:$0 sm:$0xff] }
0x19a5   : > { %v3156_v40 = vpop.f32.mrf.mxu0 }
0x19a6   : > { %3495 = vrot.lane.b32.xlu0 %v3156_v40, %s11705_s22 }
0x19a7   : > { %v9291_v41 = vpop.f32.mrf.mxu0 }
0x19a8   : > { %v8693_v41 = vld [vmem:[%s11591_s10 + $0x1] ss:$0 sm:$0xff] }
0x19d6   : > { %v3323_v42 = vpop.f32.mrf.mxu0 }
0x19d8   : > { %v9301_v44 = vpop.f32.mrf.mxu0 }
0x19da   : > { %v3490_v45 = vpop.f32.mrf.mxu0 }
0x19dc   : > { %v9311_v47 = vpop.f32.mrf.mxu0 }
0x19de   : > { %v3674_v48 = vpop.f32.mrf.mxu0 }
0x19e0   : > { %v9321_v50 = vpop.f32.mrf.mxu0 }
0x19e1   : > { %v8707_v50 = vld [vmem:[%s11594_s13 + $0x68] sm:$0xff] }
0x19e2   : > { %v3841_v51 = vpop.f32.mrf.mxu0 }
0x19e3   : > { %4180 = vrot.lane.b32.xlu0 %v3841_v51, %s11705_s22  ;;  %v8706_v51 = vld [vmem:[%s11594_s13 + $0x60] sm:$0xff] }
0x19e4   : > { %v9331_v53 = vpop.f32.mrf.mxu0 }
0x19e5   : > { %v8704_v53 = vld [vmem:[%s11594_s13 + $0x50] sm:$0xff] }
0x19e6   : > { %v4008_v55 = vpop.f32.mrf.mxu0 }
0x19e7   : > { %3499 = vrot.lane.b32.xlu0 %v3323_v42, %s11706_s19  ;;  %4184 = vrot.lane.b32.xlu1 %v4008_v55, %s11706_s19  ;;  %v8703_v55 = vld [vmem:[%s11594_s13 + $0x48] sm:$0xff] }
0x19e8   : > { %v9341_v56 = vpop.f32.mrf.mxu0 }
0x19e9   : > { %v8702_v56 = vld [vmem:[%s11594_s13 + $0x40] sm:$0xff] }
0x19ea   : > { %v4175_v34 = vpop.f32.mrf.mxu0 }
0x19eb   : > { %4188 = vrot.lane.b32.xlu1 %v4175_v34, %s11711_s17  ;;  %v8699_v34 = vld [vmem:[%s11593_s12 + $0x1] ss:$0 sm:$0xff] }
0x19ec   : > { %v9351_v57 = vpop.f32.mrf.mxu0 }
0x19ef   : > { %3503 = vrot.lane.b32.xlu1 %v3490_v45, %s11711_s17  ;;  %s11719_s17 = sld [smem:[#allocation23_spill]] }
0x1a18   : > { %v3496_v58 = vpop.permute.xlu0 %3495 }
0x1a19   : > { %v3506_v4 = vsel %vm963_vm4, %v2989_v37, %v3496_v58 }
0x1a55   : > { %v4181_v59 = vpop.permute.xlu0 %4180 }
0x1a56   : > { %v4191_v61 = vsel %vm963_vm4, %v3674_v48, %v4181_v59 }
0x1a59   : > { %v4185_v60 = vpop.permute.xlu1 %4184  ;;  %v3500_v2 = vpop.permute.xlu0 %3499 }
0x1a5a   : > { %v4192_v31 = vsel %vm1644_vm10, %v4191_v61, %v4185_v60  ;;  %v3507_v52 = vsel %vm1644_vm10, %v3506_v4, %v3500_v2 }
0x1a5d   : > { %v4189_v0 = vpop.permute.xlu1 %4188 }
0x1a5e   : > { %v4193_v3 = vsel %vm1646_vm9, %v4192_v31, %v4189_v0 }
0x1a5f   : > { %v4195_v5 = vrot.slane %v4193_v3, 3 }
0x1a61   : > { %v3504_v6 = vpop.permute.xlu1 %3503 }
0x1a62   : > { %v3508_v7 = vsel %vm1646_vm9, %v3507_v52, %v3504_v6 }
0x1a63   : > { %v4197_v54 = vsel %vm1057_vm6, %v3508_v7, %v4195_v5 }
0x1a64   : > { %9360 = vmatprep.mubr.msk.f32.mxu1 %vm823_vm1, %v4197_v54 }
0x1a65   : > { %9361 = vmatmul.mubr.msk.f32.vlgmr.msra.gmra.mxu1 %vm823_vm1, %v4195_v5 }
0x1a66   : > { %9375 = vmatpush3.msra.mxu1 %v8709_v49 }
0x1a67   : > { %9376 = vmatprep.subr.mxu1 %v8708_v43 }
0x1a68   : > { %9377 = vmatpush3.msra.mxu1 %v8708_v43 }
0x1a69   : > { %9378 = vmatprep.subr.mxu1 %v8707_v50 }
0x1a6a   : > { %9379 = vmatpush3.msra.mxu1 %v8707_v50 }
0x1a6b   : > { %9380 = vmatprep.subr.mxu1 %v8706_v51 }
0x1a6c   : > { %9381 = vmatpush3.msra.mxu1 %v8706_v51  ;;  %v8717_v51 = vld [vmem:[%s11694_s28 + $0x2] ss:$0 sm:$0xff] }
0x1a6d   : > { %9382 = vmatprep.subr.mxu1 %v8705_v27 }
0x1a6e   : > { %9383 = vmatpush3.msra.mxu1 %v8705_v27 }
0x1a6f   : > { %9384 = vmatprep.subr.mxu1 %v8704_v53 }
0x1a70   : > { %9385 = vmatpush3.msra.mxu1 %v8704_v53 }
0x1a71   : > { %9386 = vmatprep.subr.mxu1 %v8703_v55 }
0x1a72   : > { %9387 = vmatpush3.msra.mxu1 %v8703_v55 }
0x1a73   : > { %9388 = vmatprep.subr.mxu1 %v8702_v56 }
0x1a74   : > { %9389 = vmatpush3.msra.mxu1 %v8702_v56 }
0x1a75   : > { %9414 = vmatprep.subr.mxu1 %v9974_v1 }
0x1b25   : > { %v9362_v9 = vpop.f32.mrf.mxu1 }
0x1b26   : > { %v4284_v12 = vadd.f32 %v9362_v9, %v10575_v36 }
0x1b27   : > { %v4274_v13 = vpop.f32.mrf.mxu1 }
0x1b28   : > { %v10811_v14 = vadd.f32 %v8689_v11, %v4284_v12  ;;  %v4283_v39 = vadd.f32 %v4274_v13, %v10578_v62 }
0x1b2a   : > { %v10814_v15 = vadd.f32 %v8689_v11, %v4283_v39  ;;  %v4302_v17 = vsel %vm827_vm2, %v10811_v14, 0.0 }
0x1b2b   : > { %4303 = vadd.xlane.f32.xlu1 %v4302_v17 }
0x1b2c   : > { %v4299_v18 = vsel %vm823_vm1, %v10814_v15, 0.0 }
0x1b2d   : > { %4300 = vadd.xlane.f32.xlu0 %v4299_v18 }
0x1bb4   : > { %v4304_v19 = vpop.xlane.xlu1 %4303 }
0x1bb5   : > { %v4306_v20 = vmul.f32 0.03125, %v4304_v19 }
0x1bb6   : > { %v4301_v16 = vpop.xlane.xlu0 %4300 }
0x1bb7   : > { %v4305_v46 = vmul.f32 0.03125, %v4301_v16  ;;  %v4308_v36 = vsub.f32 %v10811_v14, %v4306_v20  ;;  %v8713_v20 = vld [vmem:[%s11595_s14 + $0x1] ss:$0 sm:$0xff] }
0x1bb9   : > { %v4307_v63 = vsub.f32 %v10814_v15, %v4305_v46  ;;  %v4310_v21 = vmul.f32 %v4308_v36, %v4308_v36 }
0x1bbb   : > { %v4309_v10 = vmul.f32 %v4307_v63, %v4307_v63  ;;  %v4314_v22 = vsel %vm827_vm2, %v4310_v21, 0.0 }
0x1bbd   : > { %v4311_v62 = vsel %vm823_vm1, %v4309_v10, 0.0 }
0x1bbe   : > { %4312 = vadd.xlane.f32.xlu0 %v4311_v62 }
0x1bc2   : > { %4315 = vadd.xlane.f32.xlu0 %v4314_v22 }
0x1c47   : > { %v4313_v28 = vpop.xlane.xlu0 %4312 }
0x1c48   : > { %v4317_v29 = vmul.f32 0.03125, %v4313_v28 }
0x1c4a   : > { %v4319_v30 = vadd.f32 1e-06, %v4317_v29 }
0x1c4b   : > { %v4316_v32 = vpop.xlane.xlu0 %4315 }
0x1c4c   : > { %9814 = vrsqrt.f32 %v4319_v30  ;;  %v4318_v33 = vmul.f32 0.03125, %v4316_v32  ;;  %v8721_v32 = vld [vmem:[%s11692_s27 + $0x58] sm:$0xff] }
0x1c4d   : > { %9393 = vmatprep.subr.mxu0 %v8721_v32 }
0x1c4e   : > { %v4320_v35 = vadd.f32 1e-06, %v4318_v33  ;;  %v8720_v33 = vld [vmem:[%s11692_s27 + $0x50] sm:$0xff] }
0x1c50   : > { %9816 = vrsqrt.f32 %v4320_v35  ;;  %v8719_v35 = vld [vmem:[%s11692_s27 + $0x48] sm:$0xff] }
0x1c59   : > { %v9815_v37 = vpop.eup %9814 }
0x1c5a   : > { %v4323_v40 = vmul.f32 %v9815_v37, %v4307_v63  ;;  %v8718_v37 = vld [vmem:[%s11692_s27 + $0x40] sm:$0xff] }
0x1c5c   : > { %v4331_v42 = vmul.f32 %v8692_v38, %v4323_v40 }
0x1c5d   : > { %v9817_v44 = vpop.eup %9816 }
0x1c5e   : > { %v4324_v45 = vmul.f32 %v9817_v44, %v4308_v36  ;;  %v4339_v8 = vadd.f32 %v8693_v41, %v4331_v42 }
0x1c60   : > { %v4332_v47 = vmul.f32 %v8692_v38, %v4324_v45  ;;  %9371 = vmatprep.mubr.msk.f32.mxu0 %vm823_vm1, %v4339_v8 }
0x1c62   : > { %v4340_v48 = vadd.f32 %v8693_v41, %v4332_v47  ;;  %v8716_v47 = vld [vmem:[%s11693_s26 + $0x2] ss:$0 sm:$0xff] }
0x1c64   : > { %9372 = vmatmul.mubr.msk.f32.vlgmr.msra.gmra.mxu0 %vm823_vm1, %v4340_v48 }
0x1c65   : > { %9394 = vmatpush3.msra.mxu0 %v8721_v32 }
0x1c66   : > { %9395 = vmatprep.subr.mxu0 %v8720_v33 }
0x1c67   : > { %9396 = vmatpush3.msra.mxu0 %v8720_v33 }
0x1c68   : > { %9397 = vmatprep.subr.mxu0 %v8719_v35 }
0x1c69   : > { %9398 = vmatpush3.msra.mxu0 %v8719_v35 }
0x1c6a   : > { %9399 = vmatprep.subr.mxu0 %v8718_v37 }
0x1c6b   : > { %9400 = vmatpush3.msra.mxu0 %v8718_v37 }
0x1c6c   : > { %9404 = vmatprep.subr.mxu0 %v9974_v1 }
0x1d24   : > { %v9373_v57 = vpop.f32.mrf.mxu0 }
0x1d25   : > { %v4432_v58 = vadd.f32 %v9373_v57, %v8699_v34 }
0x1d26   : > { %v4426_v59 = vpop.f32.mrf.mxu0 }
0x1d27   : > { %v4436_v60 = vmul.f32 %v4432_v58, %v4432_v58  ;;  %v4427_v61 = vadd.f32 %v8699_v34, %v4426_v59  ;;  %v8723_v34 = vld [vmem:[%s11695_s2 + $0x2] ss:$0 sm:$0xff] }
0x1d29   : > { %v4438_v31 = vmul.f32 %v4436_v60, %v4432_v58  ;;  %v4435_v0 = vmul.f32 %v4427_v61, %v4427_v61 }
0x1d2b   : > { %v4440_v2 = vmul.f32 0.044715, %v4438_v31  ;;  %v4437_v3 = vmul.f32 %v4435_v0, %v4427_v61 }
0x1d2d   : > { %v4442_v4 = vadd.f32 %v4440_v2, %v4432_v58  ;;  %v4439_v52 = vmul.f32 0.044715, %v4437_v3 }
0x1d2f   : > { %v4444_v5 = vmul.f32 0.7978846, %v4442_v4  ;;  %v4441_v6 = vadd.f32 %v4439_v52, %v4427_v61 }
0x1d31   : > { %9818 = vtanh.f32 %v4444_v5  ;;  %v4443_v7 = vmul.f32 0.7978846, %v4441_v6 }
0x1d33   : > { %9820 = vtanh.f32 %v4443_v7 }
0x1d3e   : > { %v9819_v54 = vpop.eup %9818 }
0x1d3f   : > { %v4448_v9 = vadd.f32 1.0, %v9819_v54 }
0x1d40   : > { %v9821_v11 = vpop.eup %9820 }
0x1d41   : > { %v4447_v12 = vadd.f32 1.0, %v9821_v11  ;;  %v4450_v13 = vmul.f32 0.5, %v4448_v9 }
0x1d43   : > { %v4449_v39 = vmul.f32 0.5, %v4447_v12  ;;  %v4452_v18 = vmul.f32 %v4450_v13, %v4432_v58 }
0x1d45   : > { %v4451_v17 = vmul.f32 %v4449_v39, %v4427_v61 }
0x1d47   : > { %9390 = vmatprep.mubr.msk.f32.mxu1 %vm739_vm0, %v4451_v17 }
0x1d48   : > { %9391 = vmatmul.mubr.msk.f32.vlgmr.msra.gmra.mxu1 %vm739_vm0, %v4452_v18 }
0x1d49   : > { %9416 = vmatprep.mubr.msk.f32.mxu1 %vm9975_vm3, %v9974_v1 }
0x1e08   : > { %v9392_v19 = vpop.f32.mrf.mxu1 }
0x1e09   : > { %v4544_v16 = vadd.f32 %v9392_v19, %v10811_v14 }
0x1e0a   : > { %v4534_v46 = vpop.f32.mrf.mxu1 }
0x1e0b   : > { %v10880_v36 = vadd.f32 %v8713_v20, %v4544_v16  ;;  %v4543_v63 = vadd.f32 %v4534_v46, %v10814_v15 }
0x1e0d   : > { %v10883_v10 = vadd.f32 %v8713_v20, %v4543_v63  ;;  %v4562_v62 = vsel %vm827_vm2, %v10880_v36, 0.0 }
0x1e0e   : > { %4563 = vadd.xlane.f32.xlu1 %v4562_v62 }
0x1e0f   : > { %v4559_v21 = vsel %vm823_vm1, %v10883_v10, 0.0 }
0x1e10   : > { %4560 = vadd.xlane.f32.xlu0 %v4559_v21 }
0x1e97   : > { %v4564_v22 = vpop.xlane.xlu1 %4563 }
0x1e98   : > { %v4566_v23 = vmul.f32 0.03125, %v4564_v22 }
0x1e99   : > { %v4561_v24 = vpop.xlane.xlu0 %4560 }
0x1e9a   : > { %v4568_v14 = vsub.f32 %v10880_v36, %v4566_v23  ;;  %v4565_v25 = vmul.f32 0.03125, %v4561_v24 }
0x1e9c   : > { %v4567_v26 = vsub.f32 %v10883_v10, %v4565_v25  ;;  %v4570_v28 = vmul.f32 %v4568_v14, %v4568_v14 }
0x1e9e   : > { %v4574_v15 = vsel %vm827_vm2, %v4570_v28, 0.0  ;;  %v4569_v29 = vmul.f32 %v4567_v26, %v4567_v26 }
0x1e9f   : > { %4575 = vadd.xlane.f32.xlu1 %v4574_v15 }
0x1ea0   : > { %v4571_v30 = vsel %vm823_vm1, %v4569_v29, 0.0 }
0x1ea1   : > { %4572 = vadd.xlane.f32.xlu0 %v4571_v30 }
0x1f28   : > { %v4576_v38 = vpop.xlane.xlu1 %4575 }
0x1f29   : > { %v4578_v40 = vmul.f32 0.03125, %v4576_v38 }
0x1f2a   : > { %v4573_v41 = vpop.xlane.xlu0 %4572 }
0x1f2b   : > { %v4580_v42 = vadd.f32 1e-06, %v4578_v40  ;;  %v4577_v44 = vmul.f32 0.03125, %v4573_v41 }
0x1f2d   : > { %9822 = vrsqrt.f32 %v4580_v42  ;;  %v4579_v45 = vadd.f32 1e-06, %v4577_v44 }
0x1f2f   : > { %9824 = vrsqrt.f32 %v4579_v45 }
0x1f3a   : > { %v9823_v8 = vpop.eup %9822 }
0x1f3b   : > { %v4584_v48 = vmul.f32 %v9823_v8, %v4568_v14 }
0x1f3c   : > { %v9825_v49 = vpop.eup %9824 }
0x1f3d   : > { %v4583_v43 = vmul.f32 %v9825_v49, %v4567_v26  ;;  %v4592_v50 = vmul.f32 %v8716_v47, %v4584_v48 }
0x1f3f   : > { %v4591_v27 = vmul.f32 %v8716_v47, %v4583_v43  ;;  %v4600_v55 = vadd.f32 %v8717_v51, %v4592_v50 }
0x1f41   : > { %v4599_v53 = vadd.f32 %v8717_v51, %v4591_v27 }
0x1f43   : > { %9401 = vmatprep.mubr.msk.f32.mxu0 %vm823_vm1, %v4599_v53 }
0x1f44   : > { %9402 = vmatmul.mubr.msk.f32.vlgmr.msra.gmra.mxu0 %vm823_vm1, %v4600_v55 }
0x1f45   : > { %9406 = vmatprep.mubr.msk.f32.mxu0 %vm9975_vm3, %v9974_v1 }
0x2004   : > { %v9403_v56 = vpop.f32.mrf.mxu0 }
0x2005   : > { %v4692_v59 = vadd.f32 %v9403_v56, %v8723_v34 }
0x2006   : > { %v4686_v57 = vpop.f32.mrf.mxu0 }
0x2007   : > { %v10919_v58 = vadd.f32 %v8723_v34, %v4686_v57  ;;  %v5379_v61 = vrot.slane %v4692_v59, 5 }
0x2009   : > { %4863 = vrot.lane.b32.xlu1 %v10919_v58, %s11708_s20  ;;  %4696 = vrot.lane.b32.xlu0 %v10919_v58, %s11709_s21  ;;  %v5378_v60 = vrot.slane %v10919_v58, 5 }
0x200b   : > { %v10935_v31 = vsel %vm1649_vm8, %v5378_v60, %v5379_v61 }
0x200d   : > { %4861 = vrot.lane.b32.xlu1 %v10919_v58, %s11697_s6  ;;  %5028 = vrot.lane.b32.xlu0 %v10919_v58, %s11698_s3 }
0x2011   : > { %5030 = vrot.lane.b32.xlu1 %v10919_v58, %s11699_s1  ;;  %5195 = vrot.lane.b32.xlu0 %v10919_v58, %s11710_s18 }
0x2015   : > { %5197 = vrot.lane.b32.xlu1 %v10919_v58, %s11700_s0  ;;  %5548 = vrot.lane.b32.xlu0 %v10935_v31, %s11708_s20 }
0x2019   : > { %5715 = vrot.lane.b32.xlu0 %v10935_v31, %s11699_s1  ;;  %5381 = vrot.lane.b32.xlu1 %v10935_v31, %s11709_s21 }
0x201d   : > { %5882 = vrot.lane.b32.xlu0 %v10935_v31, %s11700_s0  ;;  %5546 = vrot.lane.b32.xlu1 %v10935_v31, %s11697_s6 }
0x2021   : > { %5713 = vrot.lane.b32.xlu1 %v10935_v31, %s11698_s3 }
0x2025   : > { %5880 = vrot.lane.b32.xlu1 %v10935_v31, %s11710_s18 }
0x207b   : > { %v4864_v0 = vpop.permute.xlu1 %4863  ;;  %v4697_v2 = vpop.permute.xlu0 %4696 }
0x207c   : > { %9405 = vmatpush3.xpose.msk.msra.mxu0 %vm963_vm4, %v4697_v2  ;;  %9415 = vmatpush3.xpose.msk.msra.mxu1 %vm963_vm4, %v4864_v0 }
0x207d   : > { %9424 = vmatprep.subr.mxu1 %v9974_v1  ;;  %9409 = vmatprep.subr.mxu0 %v9974_v1 }
0x207f   : > { %v4862_v3 = vpop.permute.xlu1 %4861  ;;  %9407 = vmatmul.mubr.msk.f32.vlgmr.msra.gmra.mxu0 %vm963_vm4, %v10919_v58  ;;  %v5029_v4 = vpop.permute.xlu0 %5028 }
0x2080   : > { %9417 = vmatmul.mubr.msk.f32.vlgmr.msra.gmra.mxu1 %vm963_vm4, %v4862_v3  ;;  %9411 = vmatprep.mubr.msk.f32.mxu0 %vm9975_vm3, %v9974_v1 }
0x2081   : > { %9426 = vmatprep.mubr.msk.f32.mxu1 %vm9975_vm3, %v9974_v1 }
0x2083   : > { %v5031_v52 = vpop.permute.xlu1 %5030  ;;  %v5196_v5 = vpop.permute.xlu0 %5195 }
0x2084   : > { %9425 = vmatpush3.xpose.msk.msra.mxu1 %vm963_vm4, %v5031_v52 }
0x2085   : > { %9434 = vmatprep.subr.mxu1 %v9974_v1 }
0x2087   : > { %v5198_v6 = vpop.permute.xlu1 %5197  ;;  %9427 = vmatmul.mubr.msk.f32.vlgmr.msra.gmra.mxu1 %vm963_vm4, %v5029_v4  ;;  %v5549_v7 = vpop.permute.xlu0 %5548 }
0x2088   : > { %9435 = vmatpush3.xpose.msk.msra.mxu1 %vm963_vm4, %v5198_v6  ;;  %9436 = vmatprep.mubr.msk.f32.mxu1 %vm9975_vm3, %v9974_v1 }
0x2089   : > { %9444 = vmatprep.subr.mxu1 %v9974_v1 }
0x208b   : > { %9437 = vmatmul.mubr.msk.f32.vlgmr.msra.gmra.mxu1 %vm963_vm4, %v5196_v5  ;;  %v5382_v54 = vpop.permute.xlu1 %5381  ;;  %v5716_v11 = vpop.permute.xlu0 %5715 }
0x208c   : > { %9445 = vmatpush3.xpose.msk.msra.mxu1 %vm963_vm4, %v5382_v54  ;;  %9446 = vmatprep.mubr.msk.f32.mxu1 %vm9975_vm3, %v9974_v1 }
0x208d   : > { %9454 = vmatprep.subr.mxu1 %v9974_v1 }
0x208f   : > { %9447 = vmatmul.mubr.msk.f32.vlgmr.msra.gmra.mxu1 %vm963_vm4, %v10935_v31  ;;  %v5547_v9 = vpop.permute.xlu1 %5546  ;;  %v5883_v13 = vpop.permute.xlu0 %5882 }
0x2090   : > { %9455 = vmatpush3.xpose.msk.msra.mxu1 %vm963_vm4, %v5549_v7  ;;  %9456 = vmatprep.mubr.msk.f32.mxu1 %vm9975_vm3, %v9974_v1 }
0x2091   : > { %9464 = vmatprep.subr.mxu1 %v9974_v1 }
0x2093   : > { %9457 = vmatmul.mubr.msk.f32.vlgmr.msra.gmra.mxu1 %vm963_vm4, %v5547_v9  ;;  %v5714_v12 = vpop.permute.xlu1 %5713 }
0x2094   : > { %9465 = vmatpush3.xpose.msk.msra.mxu1 %vm963_vm4, %v5716_v11  ;;  %9466 = vmatprep.mubr.msk.f32.mxu1 %vm9975_vm3, %v9974_v1 }
0x2095   : > { %9474 = vmatprep.subr.mxu1 %v9974_v1 }
0x2097   : > { %9467 = vmatmul.mubr.msk.f32.vlgmr.msra.gmra.mxu1 %vm963_vm4, %v5714_v12  ;;  %v5881_v39 = vpop.permute.xlu1 %5880 }
0x2098   : > { %9475 = vmatpush3.xpose.msk.msra.mxu1 %vm963_vm4, %v5883_v13  ;;  %9476 = vmatprep.mubr.msk.f32.mxu1 %vm9975_vm3, %v9974_v1 }
0x209b   : > { %9477 = vmatmul.mubr.msk.f32.vlgmr.msra.gmra.mxu1 %vm963_vm4, %v5881_v39 }
0x213f   : > { %v4768_v17 = vpop.f32.mrf.mxu0 }
0x2140   : > { %v4772_v18 = vmul.f32 0.35355338, %v4768_v17  ;;  %v4935_v19 = vpop.f32.mrf.mxu1 }
0x2141   : > { %v4939_v20 = vmul.f32 0.35355338, %v4935_v19  ;;  %v9408_v16 = vpop.f32.mrf.mxu0 }
0x2142   : > { %v9418_v46 = vpop.f32.mrf.mxu1  ;;  %v4773_v63 = vsel %vm1039_vm5, %v4772_v18, -inf }
0x2143   : > { %4774 = vmax.xlane.f32.xlu0 %v4773_v63  ;;  %v4940_v62 = vsel %vm1039_vm5, %v4939_v20, -inf }
0x2144   : > { %4941 = vmax.xlane.f32.xlu1 %v4940_v62 }
0x2147   : > { %v5102_v21 = vpop.f32.mrf.mxu1 }
0x2148   : > { %v10994_v22 = vmul.f32 0.35355338, %v5102_v21 }
0x2149   : > { %v9428_v23 = vpop.f32.mrf.mxu1 }
0x214a   : > { %v5107_v24 = vsel %vm1039_vm5, %v10994_v22, -inf }
0x214b   : > { %v5269_v14 = vpop.f32.mrf.mxu1  ;;  %5108 = vmax.xlane.f32.xlu0 %v5107_v24 }
0x214c   : > { %v5273_v25 = vmul.f32 0.35355338, %v5269_v14 }
0x214d   : > { %v9438_v26 = vpop.f32.mrf.mxu1 }
0x214e   : > { %v5274_v28 = vsel %vm1039_vm5, %v5273_v25, -inf }
0x214f   : > { %5275 = vmax.xlane.f32.xlu0 %v5274_v28  ;;  %v5453_v15 = vpop.f32.mrf.mxu1 }
0x2150   : > { %v5457_v29 = vmul.f32 0.35355338, %v5453_v15 }
0x2151   : > { %v9448_v30 = vpop.f32.mrf.mxu1 }
0x2152   : > { %v5458_v32 = vsel %vm1039_vm5, %v5457_v29, -inf }
0x2153   : > { %5459 = vmax.xlane.f32.xlu0 %v5458_v32  ;;  %v5620_v33 = vpop.f32.mrf.mxu1 }
0x2154   : > { %v5624_v35 = vmul.f32 0.35355338, %v5620_v33 }
0x2155   : > { %v9458_v37 = vpop.f32.mrf.mxu1 }
0x2156   : > { %v5625_v38 = vsel %vm1039_vm5, %v5624_v35, -inf }
0x2157   : > { %5626 = vmax.xlane.f32.xlu1 %v5625_v38  ;;  %v5787_v40 = vpop.f32.mrf.mxu1 }
0x2158   : > { %v5791_v41 = vmul.f32 0.35355338, %v5787_v40 }
0x2159   : > { %v9468_v42 = vpop.f32.mrf.mxu1 }
0x215a   : > { %v5792_v44 = vsel %vm1039_vm5, %v5791_v41, -inf }
0x215b   : > { %5793 = vmax.xlane.f32.xlu0 %v5792_v44  ;;  %v5954_v45 = vpop.f32.mrf.mxu1 }
0x215c   : > { %v5958_v47 = vmul.f32 0.35355338, %v5954_v45 }
0x215d   : > { %v9478_v8 = vpop.f32.mrf.mxu1 }
0x215e   : > { %v5959_v48 = vsel %vm1039_vm5, %v5958_v47, -inf }
0x2168   : > { %4784 = vrot.lane.b32.xlu1 %v10919_v58, %s11696_s24 }
0x218c   : > { %5960 = vmax.xlane.f32.xlu1 %v5959_v48 }
0x219d   : > { %5118 = vrot.lane.b32.xlu1 %v10919_v58, %s11703_s25 }
0x21a1   : > { %5285 = vrot.lane.b32.xlu1 %v10919_v58, %s11702_s29 }
0x21a5   : > { %5469 = vrot.lane.b32.xlu1 %v10935_v31, %s11696_s24 }
0x21cc   : > { %v4775_v49 = vpop.xlane.xlu0 %4774 }
0x21cd   : > { %v4776_v43 = vsub.f32 %v4772_v18, %v4775_v49  ;;  %v4942_v50 = vpop.xlane.xlu1 %4941 }
0x21ce   : > { %v4943_v51 = vsub.f32 %v4939_v20, %v4942_v50 }
0x21cf   : > { %v4777_v27 = vmul.f32 1.442695, %v4776_v43 }
0x21d0   : > { %v4944_v53 = vmul.f32 1.442695, %v4943_v51 }
0x21d1   : > { %9826 = vpow2.f32 %v4777_v27 }
0x21d2   : > { %9828 = vpow2.f32 %v4944_v53 }
0x21d4   : > { %v5109_v55 = vpop.xlane.xlu0 %5108 }
0x21d5   : > { %v5110_v5 = vsub.f32 %v10994_v22, %v5109_v55 }
0x21d7   : > { %v5111_v7 = vmul.f32 1.442695, %v5110_v5  ;;  %v8761_v5 = vld [vmem:[%s11704_s7 + $0x58] sm:$0xff] }
0x21d8   : > { %v5276_v56 = vpop.xlane.xlu0 %5275  ;;  %9484 = vmatprep.subr.mxu1 %v8761_v5 }
0x21d9   : > { %v5277_v34 = vsub.f32 %v5273_v25, %v5276_v56  ;;  %9485 = vmatpush3.msra.mxu1 %v8761_v5 }
0x21db   : > { %v5278_v57 = vmul.f32 1.442695, %v5277_v34 }
0x21dc   : > { %v5460_v6 = vpop.xlane.xlu0 %5459 }
0x21dd   : > { %9830 = vpow2.f32 %v5278_v57  ;;  %v5461_v54 = vsub.f32 %v5457_v29, %v5460_v6 }
0x21de   : > { %v9827_v59 = vpop.eup %9826  ;;  %9832 = vpow2.f32 %v5111_v7 }
0x21df   : > { %v11011_v60 = vpop.eup %9828  ;;  %v4779_v61 = vsel %vm1039_vm5, %v9827_v59, 0.0  ;;  %v5462_v11 = vmul.f32 1.442695, %v5461_v54  ;;  %v8760_v54 = vld [vmem:[%s11704_s7 + $0x50] sm:$0xff] }
0x21e0   : > { %4780 = vadd.xlane.f32.xlu0 %v4779_v61  ;;  %v5627_v0 = vpop.xlane.xlu1 %5626  ;;  %v4946_v2 = vsel %vm1039_vm5, %v11011_v60, 0.0  ;;  %9486 = vmatprep.subr.mxu1 %v8760_v54 }
0x21e1   : > { %4947 = vadd.xlane.f32.xlu1 %v4946_v2  ;;  %9834 = vpow2.f32 %v5462_v11  ;;  %v5628_v13 = vsub.f32 %v5624_v35, %v5627_v0  ;;  %9487 = vmatpush3.msra.mxu1 %v8760_v54  ;;  %v8785_v54 = vld [vmem:[%s11594_s13 + $0xb8] sm:$0xff] }
0x21e3   : > { %v5629_v17 = vmul.f32 1.442695, %v5628_v13  ;;  %v8758_v13 = vld [vmem:[%s11704_s7 + $0x40] sm:$0xff] }
0x21e4   : > { %v4785_v3 = vpop.permute.xlu1 %4784  ;;  %v5794_v9 = vpop.xlane.xlu0 %5793 }
0x21e5   : > { %9410 = vmatpush3.msk.msra.mxu0 %vm1057_vm6, %v4785_v3  ;;  %v5795_v12 = vsub.f32 %v5791_v41, %v5794_v9  ;;  %v8759_v9 = vld [vmem:[%s11704_s7 + $0x48] sm:$0xff] }
0x21e6   : > { %9419 = vmatprep.subr.mxu0 %v9974_v1  ;;  %9488 = vmatprep.subr.mxu1 %v8759_v9 }
0x21e7   : > { %v5796_v39 = vmul.f32 1.442695, %v5795_v12  ;;  %9489 = vmatpush3.msra.mxu1 %v8759_v9  ;;  %v8784_v9 = vld [vmem:[%s11594_s13 + $0xb0] sm:$0xff] }
0x21e8   : > { %9490 = vmatprep.subr.mxu1 %v8758_v13 }
0x21e9   : > { %9836 = vpow2.f32 %v5796_v39  ;;  %9491 = vmatpush3.msra.mxu1 %v8758_v13  ;;  %v8781_v13 = vld [vmem:[%s11594_s13 + $0x98] sm:$0xff] }
0x21ea   : > { %v11018_v4 = vpop.eup %9830  ;;  %9838 = vpow2.f32 %v5629_v17  ;;  %9506 = vmatprep.subr.mxu1 %v8785_v54 }
0x21eb   : > { %v5280_v52 = vsel %vm1039_vm5, %v11018_v4, 0.0  ;;  %v9833_v18 = vpop.eup %9832 }
0x21ec   : > { %5281 = vadd.xlane.f32.xlu1 %v5280_v52 }
0x21ee   : > { %v11028_v19 = vpop.eup %9834 }
0x21ef   : > { %v5464_v63 = vsel %vm1039_vm5, %v11028_v19, 0.0 }
0x21f6   : > { %4951 = vrot.lane.b32.xlu0 %v10919_v58, %s11712_s4  ;;  %v5113_v58 = vsel %vm1039_vm5, %v9833_v18, 0.0  ;;  %v11032_v62 = vpop.eup %9836 }
0x21f7   : > { %v5798_v21 = vsel %vm1039_vm5, %v11032_v62, 0.0  ;;  %v9839_v22 = vpop.eup %9838 }
0x21f8   : > { %v5631_v23 = vsel %vm1039_vm5, %v9839_v22, 0.0 }
0x21fd   : > { %5636 = vrot.lane.b32.xlu1 %v10935_v31, %s11712_s4 }
0x2215   : > { %5114 = vadd.xlane.f32.xlu0 %v5113_v58  ;;  %v5961_v20 = vpop.xlane.xlu1 %5960 }
0x2216   : > { %v5962_v16 = vsub.f32 %v5958_v47, %v5961_v20 }
0x2218   : > { %v5963_v46 = vmul.f32 1.442695, %v5962_v16 }
0x2219   : > { %5465 = vadd.xlane.f32.xlu0 %v5464_v63  ;;  %v5119_v25 = vpop.permute.xlu1 %5118 }
0x221a   : > { %9840 = vpow2.f32 %v5963_v46 }
0x221d   : > { %5799 = vadd.xlane.f32.xlu0 %v5798_v21  ;;  %v5286_v26 = vpop.permute.xlu1 %5285 }
0x2221   : > { %5632 = vadd.xlane.f32.xlu1 %v5631_v23  ;;  %v5470_v28 = vpop.permute.xlu1 %5469 }
0x2227   : > { %v11037_v24 = vpop.eup %9840 }
0x2228   : > { %v5965_v14 = vsel %vm1039_vm5, %v11037_v24, 0.0 }
0x2229   : > { %5966 = vadd.xlane.f32.xlu0 %v5965_v14 }
0x2232   : > { %5970 = vrot.lane.b32.xlu1 %v10935_v31, %s11702_s29 }
0x223f   : > { %5803 = vrot.lane.b32.xlu0 %v10935_v31, %s11703_s25 }
0x2269   : > { %v4781_v15 = vpop.xlane.xlu0 %4780 }
0x226a   : > { %9842 = vrcp.f32 %v4781_v15  ;;  %v4948_v29 = vpop.xlane.xlu1 %4947 }
0x226b   : > { %9844 = vrcp.f32 %v4948_v29 }
0x226d   : > { %v4952_v35 = vpop.permute.xlu0 %4951 }
0x2275   : > { %v5282_v37 = vpop.xlane.xlu1 %5281 }
0x2277   : > { %v9843_v30 = vpop.eup %9842 }
0x2278   : > { %v4783_v32 = vmul.f32 %v9843_v30, %v9827_v59  ;;  %v9845_v33 = vpop.eup %9844  ;;  %v8765_v30 = vld [vmem:[%s11714_s23 + $0x2] ss:$0 sm:$0xff]  ;;  %s11724_s23 = sld [smem:[#allocation26_spill]] }
0x2279   : > { %v4950_v31 = vmul.f32 %v9845_v33, %v11011_v60  ;;  %v5637_v41 = vpop.permute.xlu1 %5636 }
0x227a   : > { %9412 = vmatmul.mubr.msk.f32.vlgmr.msra.gmra.mxu0 %vm1053_vm7, %v4783_v32 }
0x227b   : > { %9420 = vmatpush3.msk.msra.mxu0 %vm1057_vm6, %v4952_v35  ;;  %9421 = vmatprep.mubr.msk.f32.mxu0 %vm9975_vm3, %v9974_v1 }
0x227c   : > { %9429 = vmatprep.subr.mxu0 %v9974_v1 }
0x227e   : > { %9422 = vmatmul.mubr.msk.f32.vlgmr.msra.gmra.mxu0 %vm1053_vm7, %v4950_v31 }
0x227f   : > { %9430 = vmatpush3.msk.msra.mxu0 %vm1057_vm6, %v5119_v25  ;;  %9431 = vmatprep.mubr.msk.f32.mxu0 %vm9975_vm3, %v9974_v1 }
0x2280   : > { %9439 = vmatprep.subr.mxu0 %v9974_v1 }
0x229e   : > { %v5115_v38 = vpop.xlane.xlu0 %5114 }
0x229f   : > { %9846 = vrcp.f32 %v5115_v38 }
0x22a0   : > { %9848 = vrcp.f32 %v5282_v37 }
0x22a2   : > { %v5466_v40 = vpop.xlane.xlu0 %5465 }
0x22a3   : > { %9850 = vrcp.f32 %v5466_v40 }
0x22a6   : > { %v5800_v42 = vpop.xlane.xlu0 %5799 }
0x22aa   : > { %v5633_v44 = vpop.xlane.xlu1 %5632 }
0x22ab   : > { %9852 = vrcp.f32 %v5633_v44 }
0x22ac   : > { %v9847_v45 = vpop.eup %9846  ;;  %9854 = vrcp.f32 %v5800_v42 }
0x22ad   : > { %v5117_v8 = vmul.f32 %v9847_v45, %v9833_v18  ;;  %v9849_v47 = vpop.eup %9848 }
0x22ae   : > { %v5284_v48 = vmul.f32 %v9849_v47, %v11018_v4  ;;  %v5971_v34 = vpop.permute.xlu1 %5970 }
0x22af   : > { %9432 = vmatmul.mubr.msk.f32.vlgmr.msra.gmra.mxu0 %vm1053_vm7, %v5117_v8 }
0x22b0   : > { %9440 = vmatpush3.msk.msra.mxu0 %vm1057_vm6, %v5286_v26  ;;  %9441 = vmatprep.mubr.msk.f32.mxu0 %vm9975_vm3, %v9974_v1  ;;  %v9851_v49 = vpop.eup %9850 }
0x22b1   : > { %9449 = vmatprep.subr.mxu0 %v9974_v1  ;;  %v5468_v50 = vmul.f32 %v9851_v49, %v11028_v19 }
0x22b2   : > { %v5967_v43 = vpop.xlane.xlu0 %5966 }
0x22b3   : > { %9856 = vrcp.f32 %v5967_v43  ;;  %9442 = vmatmul.mubr.msk.f32.vlgmr.msra.gmra.mxu0 %vm1053_vm7, %v5284_v48  ;;  %v8773_v43 = vld [vmem:[%s11592_s11 + $0x58] sm:$0xff] }
0x22b4   : > { %9450 = vmatpush3.msk.msra.mxu0 %vm1057_vm6, %v5470_v28  ;;  %9451 = vmatprep.mubr.msk.f32.mxu0 %vm9975_vm3, %v9974_v1 }
0x22b5   : > { %9459 = vmatprep.subr.mxu0 %v9974_v1 }
0x22b6   : > { %v5804_v55 = vpop.permute.xlu0 %5803 }
0x22b7   : > { %9452 = vmatmul.mubr.msk.f32.vlgmr.msra.gmra.mxu0 %vm1053_vm7, %v5468_v50  ;;  %v8772_v50 = vld [vmem:[%s11592_s11 + $0x50] sm:$0xff] }
0x22b8   : > { %v9853_v51 = vpop.eup %9852  ;;  %9460 = vmatpush3.msk.msra.mxu0 %vm1057_vm6, %v5637_v41  ;;  %9461 = vmatprep.mubr.msk.f32.mxu0 %vm9975_vm3, %v9974_v1 }
0x22b9   : > { %9469 = vmatprep.subr.mxu0 %v9974_v1  ;;  %v5635_v27 = vmul.f32 %v9853_v51, %v9839_v22  ;;  %v9855_v53 = vpop.eup %9854  ;;  %v8771_v51 = vld [vmem:[%s11592_s11 + $0x48] sm:$0xff] }
0x22ba   : > { %v5802_v56 = vmul.f32 %v9855_v53, %v11032_v62 }
0x22bb   : > { %9462 = vmatmul.mubr.msk.f32.vlgmr.msra.gmra.mxu0 %vm1053_vm7, %v5635_v27  ;;  %v8770_v27 = vld [vmem:[%s11592_s11 + $0x40] sm:$0xff] }
0x22bc   : > { %9470 = vmatpush3.msk.msra.mxu0 %vm1057_vm6, %v5804_v55  ;;  %9471 = vmatprep.mubr.msk.f32.mxu0 %vm9975_vm3, %v9974_v1 }
0x22bd   : > { %9479 = vmatprep.subr.mxu0 %v9974_v1 }
0x22bf   : > { %9472 = vmatmul.mubr.msk.f32.vlgmr.msra.gmra.mxu0 %vm1053_vm7, %v5802_v56 }
0x22c0   : > { %v9857_v57 = vpop.eup %9856  ;;  %9480 = vmatpush3.msk.msra.mxu0 %vm1057_vm6, %v5971_v34  ;;  %9481 = vmatprep.mubr.msk.f32.mxu0 %vm9975_vm3, %v9974_v1 }
0x22c1   : > { %v5969_v59 = vmul.f32 %v9857_v57, %v11037_v24  ;;  %9495 = vmatprep.subr.mxu0 %v8773_v43 }
0x22c3   : > { %9482 = vmatmul.mubr.msk.f32.vlgmr.msra.gmra.mxu0 %vm1053_vm7, %v5969_v59 }
0x22c4   : > { %9496 = vmatpush3.msra.mxu0 %v8773_v43 }
0x22c5   : > { %9497 = vmatprep.subr.mxu0 %v8772_v50 }
0x22c6   : > { %9498 = vmatpush3.msra.mxu0 %v8772_v50 }
0x22c7   : > { %9499 = vmatprep.subr.mxu0 %v8771_v51 }
0x22c8   : > { %9500 = vmatpush3.msra.mxu0 %v8771_v51 }
0x22c9   : > { %9501 = vmatprep.subr.mxu0 %v8770_v27 }
0x22ca   : > { %9502 = vmatpush3.msra.mxu0 %v8770_v27 }
0x233a   : > { %v4857_v60 = vpop.f32.mrf.mxu0 }
0x233c   : > { %v9413_v61 = vpop.f32.mrf.mxu0 }
0x233d   : > { %v8768_v61 = vld [vmem:[%s11590_s9 + $0x2] ss:$0 sm:$0xff] }
0x233e   : > { %v5024_v0 = vpop.f32.mrf.mxu0 }
0x233f   : > { %5363 = vrot.lane.b32.xlu0 %v5024_v0, %s11705_s22 }
0x2340   : > { %v9423_v2 = vpop.f32.mrf.mxu0 }
0x2341   : > { %v8769_v2 = vld [vmem:[%s11591_s10 + $0x2] ss:$0 sm:$0xff] }
0x236f   : > { %v5191_v3 = vpop.f32.mrf.mxu0 }
0x2371   : > { %v9433_v4 = vpop.f32.mrf.mxu0 }
0x2373   : > { %v5358_v52 = vpop.f32.mrf.mxu0 }
0x2375   : > { %v9443_v6 = vpop.f32.mrf.mxu0 }
0x2377   : > { %v5542_v7 = vpop.f32.mrf.mxu0 }
0x2379   : > { %v9453_v11 = vpop.f32.mrf.mxu0 }
0x237a   : > { %v8783_v11 = vld [vmem:[%s11594_s13 + $0xa8] sm:$0xff] }
0x237b   : > { %v5709_v12 = vpop.f32.mrf.mxu0 }
0x237c   : > { %6048 = vrot.lane.b32.xlu0 %v5709_v12, %s11705_s22  ;;  %v8782_v12 = vld [vmem:[%s11594_s13 + $0xa0] sm:$0xff] }
0x237d   : > { %v9463_v39 = vpop.f32.mrf.mxu0 }
0x237e   : > { %v8780_v39 = vld [vmem:[%s11594_s13 + $0x90] sm:$0xff] }
0x237f   : > { %v5876_v17 = vpop.f32.mrf.mxu0 }
0x2380   : > { %5367 = vrot.lane.b32.xlu0 %v5191_v3, %s11706_s19  ;;  %6052 = vrot.lane.b32.xlu1 %v5876_v17, %s11706_s19  ;;  %v8779_v17 = vld [vmem:[%s11594_s13 + $0x88] sm:$0xff] }
0x2381   : > { %v9473_v18 = vpop.f32.mrf.mxu0 }
0x2382   : > { %v8778_v18 = vld [vmem:[%s11594_s13 + $0x80] sm:$0xff] }
0x2383   : > { %v6043_v58 = vpop.f32.mrf.mxu0 }
0x2384   : > { %6056 = vrot.lane.b32.xlu1 %v6043_v58, %s11713_s5  ;;  %v8775_v58 = vld [vmem:[%s11593_s12 + $0x2] ss:$0 sm:$0xff] }
0x2385   : > { %v9483_v19 = vpop.f32.mrf.mxu0 }
0x2388   : > { %5371 = vrot.lane.b32.xlu1 %v5358_v52, %s11713_s5  ;;  %s11720_s5 = sld [smem:[#allocation24_spill]] }
0x23b1   : > { %v5364_v20 = vpop.permute.xlu0 %5363 }
0x23b2   : > { %v5374_v24 = vsel %vm963_vm4, %v4857_v60, %v5364_v20 }
0x23ee   : > { %v6049_v16 = vpop.permute.xlu0 %6048 }
0x23ef   : > { %v6059_v63 = vsel %vm963_vm4, %v5542_v7, %v6049_v16 }
0x23f2   : > { %v6053_v46 = vpop.permute.xlu1 %6052  ;;  %v5368_v22 = vpop.permute.xlu0 %5367 }
0x23f3   : > { %v6060_v62 = vsel %vm1644_vm10, %v6059_v63, %v6053_v46  ;;  %v5375_v14 = vsel %vm1644_vm10, %v5374_v24, %v5368_v22 }
0x23f6   : > { %v6057_v21 = vpop.permute.xlu1 %6056 }
0x23f7   : > { %v6061_v23 = vsel %vm1646_vm9, %v6060_v62, %v6057_v21 }
0x23f8   : > { %v6063_v25 = vrot.slane %v6061_v23, 3 }
0x23fa   : > { %v5372_v26 = vpop.permute.xlu1 %5371 }
0x23fb   : > { %v5376_v28 = vsel %vm1646_vm9, %v5375_v14, %v5372_v26 }
0x23fc   : > { %v6065_v15 = vsel %vm1057_vm6, %v5376_v28, %v6063_v25 }
0x23fd   : > { %9492 = vmatprep.mubr.msk.f32.mxu1 %vm823_vm1, %v6065_v15 }
0x23fe   : > { %9493 = vmatmul.mubr.msk.f32.vlgmr.msra.gmra.mxu1 %vm823_vm1, %v6063_v25 }
0x23ff   : > { %9507 = vmatpush3.msra.mxu1 %v8785_v54 }
0x2400   : > { %9508 = vmatprep.subr.mxu1 %v8784_v9 }
0x2401   : > { %9509 = vmatpush3.msra.mxu1 %v8784_v9 }
0x2402   : > { %9510 = vmatprep.subr.mxu1 %v8783_v11 }
0x2403   : > { %9511 = vmatpush3.msra.mxu1 %v8783_v11 }
0x2404   : > { %9512 = vmatprep.subr.mxu1 %v8782_v12 }
0x2405   : > { %9513 = vmatpush3.msra.mxu1 %v8782_v12  ;;  %v8793_v12 = vld [vmem:[%s11694_s28 + $0x3] ss:$0 sm:$0xff] }
0x2406   : > { %9514 = vmatprep.subr.mxu1 %v8781_v13 }
0x2407   : > { %9515 = vmatpush3.msra.mxu1 %v8781_v13 }
0x2408   : > { %9516 = vmatprep.subr.mxu1 %v8780_v39 }
0x2409   : > { %9517 = vmatpush3.msra.mxu1 %v8780_v39 }
0x240a   : > { %9518 = vmatprep.subr.mxu1 %v8779_v17 }
0x240b   : > { %9519 = vmatpush3.msra.mxu1 %v8779_v17 }
0x240c   : > { %9520 = vmatprep.subr.mxu1 %v8778_v18 }
0x240d   : > { %9521 = vmatpush3.msra.mxu1 %v8778_v18 }
0x240e   : > { %9546 = vmatprep.subr.mxu1 %v9974_v1 }
0x24be   : > { %v9494_v29 = vpop.f32.mrf.mxu1 }
0x24bf   : > { %v6152_v32 = vadd.f32 %v9494_v29, %v10880_v36 }
0x24c0   : > { %v6142_v33 = vpop.f32.mrf.mxu1 }
0x24c1   : > { %v11116_v35 = vadd.f32 %v8765_v30, %v6152_v32  ;;  %v6151_v31 = vadd.f32 %v6142_v33, %v10883_v10 }
0x24c3   : > { %v11119_v37 = vadd.f32 %v8765_v30, %v6151_v31  ;;  %v6170_v38 = vsel %vm827_vm2, %v11116_v35, 0.0 }
0x24c4   : > { %6171 = vadd.xlane.f32.xlu1 %v6170_v38 }
0x24c5   : > { %v6167_v40 = vsel %vm823_vm1, %v11119_v37, 0.0 }
0x24c6   : > { %6168 = vadd.xlane.f32.xlu0 %v6167_v40 }
0x254d   : > { %v6172_v41 = vpop.xlane.xlu1 %6171 }
0x254e   : > { %v6174_v42 = vmul.f32 0.03125, %v6172_v41 }
0x254f   : > { %v6169_v44 = vpop.xlane.xlu0 %6168 }
0x2550   : > { %v6173_v45 = vmul.f32 0.03125, %v6169_v44  ;;  %v6176_v36 = vsub.f32 %v11116_v35, %v6174_v42  ;;  %v8789_v42 = vld [vmem:[%s11595_s14 + $0x2] ss:$0 sm:$0xff] }
0x2552   : > { %v6175_v8 = vsub.f32 %v11119_v37, %v6173_v45  ;;  %v6178_v48 = vmul.f32 %v6176_v36, %v6176_v36 }
0x2554   : > { %v6177_v47 = vmul.f32 %v6175_v8, %v6175_v8  ;;  %v6182_v49 = vsel %vm827_vm2, %v6178_v48, 0.0 }
0x2556   : > { %v6179_v10 = vsel %vm823_vm1, %v6177_v47, 0.0 }
0x2557   : > { %6180 = vadd.xlane.f32.xlu0 %v6179_v10 }
0x255b   : > { %6183 = vadd.xlane.f32.xlu0 %v6182_v49 }
0x25e0   : > { %v6181_v53 = vpop.xlane.xlu0 %6180 }
0x25e1   : > { %v6185_v55 = vmul.f32 0.03125, %v6181_v53 }
0x25e3   : > { %v6187_v56 = vadd.f32 1e-06, %v6185_v55 }
0x25e4   : > { %v6184_v34 = vpop.xlane.xlu0 %6183 }
0x25e5   : > { %9858 = vrsqrt.f32 %v6187_v56  ;;  %v6186_v57 = vmul.f32 0.03125, %v6184_v34  ;;  %v8797_v34 = vld [vmem:[%s11692_s27 + $0x78] sm:$0xff] }
0x25e6   : > { %9525 = vmatprep.subr.mxu0 %v8797_v34 }
0x25e7   : > { %v6188_v59 = vadd.f32 1e-06, %v6186_v57  ;;  %v8796_v57 = vld [vmem:[%s11692_s27 + $0x70] sm:$0xff] }
0x25e9   : > { %9860 = vrsqrt.f32 %v6188_v59  ;;  %v8795_v59 = vld [vmem:[%s11692_s27 + $0x68] sm:$0xff] }
0x25f2   : > { %v9859_v60 = vpop.eup %9858 }
0x25f3   : > { %v6191_v0 = vmul.f32 %v9859_v60, %v6175_v8  ;;  %v8794_v60 = vld [vmem:[%s11692_s27 + $0x60] sm:$0xff] }
0x25f5   : > { %v6199_v3 = vmul.f32 %v8768_v61, %v6191_v0 }
0x25f6   : > { %v9861_v4 = vpop.eup %9860 }
0x25f7   : > { %v6192_v52 = vmul.f32 %v9861_v4, %v6176_v36  ;;  %v6207_v5 = vadd.f32 %v8769_v2, %v6199_v3 }
0x25f9   : > { %v6200_v6 = vmul.f32 %v8768_v61, %v6192_v52  ;;  %9503 = vmatprep.mubr.msk.f32.mxu0 %vm823_vm1, %v6207_v5 }
0x25fb   : > { %v6208_v7 = vadd.f32 %v8769_v2, %v6200_v6  ;;  %v8792_v6 = vld [vmem:[%s11693_s26 + $0x3] ss:$0 sm:$0xff] }
0x25fd   : > { %9504 = vmatmul.mubr.msk.f32.vlgmr.msra.gmra.mxu0 %vm823_vm1, %v6208_v7 }
0x25fe   : > { %9526 = vmatpush3.msra.mxu0 %v8797_v34 }
0x25ff   : > { %9527 = vmatprep.subr.mxu0 %v8796_v57 }
0x2600   : > { %9528 = vmatpush3.msra.mxu0 %v8796_v57 }
0x2601   : > { %9529 = vmatprep.subr.mxu0 %v8795_v59 }
0x2602   : > { %9530 = vmatpush3.msra.mxu0 %v8795_v59 }
0x2603   : > { %9531 = vmatprep.subr.mxu0 %v8794_v60 }
0x2604   : > { %9532 = vmatpush3.msra.mxu0 %v8794_v60 }
0x2605   : > { %9536 = vmatprep.subr.mxu0 %v9974_v1 }
0x26bd   : > { %v9505_v19 = vpop.f32.mrf.mxu0 }
0x26be   : > { %v6300_v20 = vadd.f32 %v9505_v19, %v8775_v58 }
0x26bf   : > { %v6294_v16 = vpop.f32.mrf.mxu0 }
0x26c0   : > { %v6304_v46 = vmul.f32 %v6300_v20, %v6300_v20  ;;  %v6295_v63 = vadd.f32 %v8775_v58, %v6294_v16  ;;  %v8799_v58 = vld [vmem:[%s11695_s2 + $0x3] ss:$0 sm:$0xff] }
0x26c2   : > { %v6306_v62 = vmul.f32 %v6304_v46, %v6300_v20  ;;  %v6303_v21 = vmul.f32 %v6295_v63, %v6295_v63 }
0x26c4   : > { %v6308_v22 = vmul.f32 0.044715, %v6306_v62  ;;  %v6305_v23 = vmul.f32 %v6303_v21, %v6295_v63 }
0x26c6   : > { %v6310_v24 = vadd.f32 %v6308_v22, %v6300_v20  ;;  %v6307_v14 = vmul.f32 0.044715, %v6305_v23 }
0x26c8   : > { %v6312_v25 = vmul.f32 0.7978846, %v6310_v24  ;;  %v6309_v26 = vadd.f32 %v6307_v14, %v6295_v63 }
0x26ca   : > { %9862 = vtanh.f32 %v6312_v25  ;;  %v6311_v28 = vmul.f32 0.7978846, %v6309_v26 }
0x26cc   : > { %9864 = vtanh.f32 %v6311_v28 }
0x26d7   : > { %v9863_v15 = vpop.eup %9862 }
0x26d8   : > { %v6316_v29 = vadd.f32 1.0, %v9863_v15 }
0x26d9   : > { %v9865_v30 = vpop.eup %9864 }
0x26da   : > { %v6315_v32 = vadd.f32 1.0, %v9865_v30  ;;  %v6318_v33 = vmul.f32 0.5, %v6316_v29 }
0x26dc   : > { %v6317_v31 = vmul.f32 0.5, %v6315_v32  ;;  %v6320_v40 = vmul.f32 %v6318_v33, %v6300_v20 }
0x26de   : > { %v6319_v38 = vmul.f32 %v6317_v31, %v6295_v63 }
0x26e0   : > { %9522 = vmatprep.mubr.msk.f32.mxu1 %vm739_vm0, %v6319_v38 }
0x26e1   : > { %9523 = vmatmul.mubr.msk.f32.vlgmr.msra.gmra.mxu1 %vm739_vm0, %v6320_v40 }
0x26e2   : > { %9548 = vmatprep.mubr.msk.f32.mxu1 %vm9975_vm3, %v9974_v1 }
0x27a1   : > { %v9524_v41 = vpop.f32.mrf.mxu1 }
0x27a2   : > { %v6412_v44 = vadd.f32 %v9524_v41, %v11116_v35 }
0x27a3   : > { %v6402_v45 = vpop.f32.mrf.mxu1 }
0x27a4   : > { %v11185_v36 = vadd.f32 %v8789_v42, %v6412_v44  ;;  %v6411_v8 = vadd.f32 %v6402_v45, %v11119_v37 }
0x27a6   : > { %v11188_v47 = vadd.f32 %v8789_v42, %v6411_v8  ;;  %v6430_v10 = vsel %vm827_vm2, %v11185_v36, 0.0 }
0x27a7   : > { %6431 = vadd.xlane.f32.xlu1 %v6430_v10 }
0x27a8   : > { %v6427_v48 = vsel %vm823_vm1, %v11188_v47, 0.0 }
0x27a9   : > { %6428 = vadd.xlane.f32.xlu0 %v6427_v48 }
0x2830   : > { %v6432_v49 = vpop.xlane.xlu1 %6431 }
0x2831   : > { %v6434_v43 = vmul.f32 0.03125, %v6432_v49 }
0x2832   : > { %v6429_v50 = vpop.xlane.xlu0 %6428 }
0x2833   : > { %v6436_v35 = vsub.f32 %v11185_v36, %v6434_v43  ;;  %v6433_v51 = vmul.f32 0.03125, %v6429_v50 }
0x2835   : > { %v6435_v27 = vsub.f32 %v11188_v47, %v6433_v51  ;;  %v6438_v53 = vmul.f32 %v6436_v35, %v6436_v35 }
0x2837   : > { %v6442_v37 = vsel %vm827_vm2, %v6438_v53, 0.0  ;;  %v6437_v55 = vmul.f32 %v6435_v27, %v6435_v27 }
0x2838   : > { %6443 = vadd.xlane.f32.xlu1 %v6442_v37 }
0x2839   : > { %v6439_v56 = vsel %vm823_vm1, %v6437_v55, 0.0 }
0x283a   : > { %6440 = vadd.xlane.f32.xlu0 %v6439_v56 }
0x28c1   : > { %v6444_v61 = vpop.xlane.xlu1 %6443 }
0x28c2   : > { %v6446_v0 = vmul.f32 0.03125, %v6444_v61 }
0x28c3   : > { %v6441_v2 = vpop.xlane.xlu0 %6440 }
0x28c4   : > { %v6448_v3 = vadd.f32 1e-06, %v6446_v0  ;;  %v6445_v4 = vmul.f32 0.03125, %v6441_v2 }
0x28c6   : > { %9866 = vrsqrt.f32 %v6448_v3  ;;  %v6447_v52 = vadd.f32 1e-06, %v6445_v4 }
0x28c8   : > { %9868 = vrsqrt.f32 %v6447_v52 }
0x28d3   : > { %v9867_v5 = vpop.eup %9866 }
0x28d4   : > { %v6452_v7 = vmul.f32 %v9867_v5, %v6436_v35 }
0x28d5   : > { %v9869_v54 = vpop.eup %9868 }
0x28d6   : > { %v6451_v9 = vmul.f32 %v9869_v54, %v6435_v27  ;;  %v6460_v11 = vmul.f32 %v8792_v6, %v6452_v7 }
0x28d8   : > { %v6459_v13 = vmul.f32 %v8792_v6, %v6451_v9  ;;  %v6468_v17 = vadd.f32 %v8793_v12, %v6460_v11 }
0x28da   : > { %v6467_v39 = vadd.f32 %v8793_v12, %v6459_v13 }
0x28dc   : > { %9533 = vmatprep.mubr.msk.f32.mxu0 %vm823_vm1, %v6467_v39 }
0x28dd   : > { %9534 = vmatmul.mubr.msk.f32.vlgmr.msra.gmra.mxu0 %vm823_vm1, %v6468_v17 }
0x28de   : > { %9538 = vmatprep.mubr.msk.f32.mxu0 %vm9975_vm3, %v9974_v1 }
0x299d   : > { %v9535_v18 = vpop.f32.mrf.mxu0 }
0x299e   : > { %v6560_v16 = vadd.f32 %v9535_v18, %v8799_v58 }
0x299f   : > { %v6554_v19 = vpop.f32.mrf.mxu0 }
0x29a0   : > { %v11224_v20 = vadd.f32 %v8799_v58, %v6554_v19  ;;  %v7247_v63 = vrot.slane %v6560_v16, 5 }
0x29a2   : > { %6731 = vrot.lane.b32.xlu1 %v11224_v20, %s11708_s20  ;;  %6564 = vrot.lane.b32.xlu0 %v11224_v20, %s11709_s21  ;;  %v7246_v46 = vrot.slane %v11224_v20, 5 }
0x29a4   : > { %v11240_v62 = vsel %vm1649_vm8, %v7246_v46, %v7247_v63 }
0x29a6   : > { %6729 = vrot.lane.b32.xlu1 %v11224_v20, %s11697_s6  ;;  %6896 = vrot.lane.b32.xlu0 %v11224_v20, %s11698_s3 }
0x29aa   : > { %6898 = vrot.lane.b32.xlu1 %v11224_v20, %s11699_s1  ;;  %7063 = vrot.lane.b32.xlu0 %v11224_v20, %s11710_s18 }
0x29ae   : > { %7065 = vrot.lane.b32.xlu1 %v11224_v20, %s11700_s0  ;;  %7416 = vrot.lane.b32.xlu0 %v11240_v62, %s11708_s20  ;;  %s11718_s20 = sld [smem:[#allocation25_spill]] }
0x29b2   : > { %7583 = vrot.lane.b32.xlu0 %v11240_v62, %s11699_s1  ;;  %7249 = vrot.lane.b32.xlu1 %v11240_v62, %s11709_s21  ;;  %s11715_s21 = smov 16  }
0x29b6   : > { %7750 = vrot.lane.b32.xlu0 %v11240_v62, %s11700_s0  ;;  %7414 = vrot.lane.b32.xlu1 %v11240_v62, %s11697_s6 }
0x29ba   : > { %7581 = vrot.lane.b32.xlu1 %v11240_v62, %s11698_s3  ;;  %s11722_s3 = sld [smem:[#allocation6_spill]] }
0x29be   : > { %7748 = vrot.lane.b32.xlu1 %v11240_v62, %s11710_s18  ;;  %s11716_s18 = smov 24  }
0x29c0   : > { %s701_s0 = sand.u32 1, %s11722_s3  }
0x29c1   : > { %s8585_s6 = sshll.u32 %s701_s0, 1  ;;  %s8509_s3 = scalar_lea.sflag [#allocation3], %s701_s0 }
0x2a14   : > { %v6732_v21 = vpop.permute.xlu1 %6731  ;;  %v6565_v22 = vpop.permute.xlu0 %6564 }
0x2a15   : > { %9537 = vmatpush3.xpose.msk.msra.mxu0 %vm963_vm4, %v6565_v22  ;;  %9547 = vmatpush3.xpose.msk.msra.mxu1 %vm963_vm4, %v6732_v21 }
0x2a16   : > { %9556 = vmatprep.subr.mxu1 %v9974_v1  ;;  %9541 = vmatprep.subr.mxu0 %v9974_v1 }
0x2a18   : > { %v6730_v23 = vpop.permute.xlu1 %6729  ;;  %9539 = vmatmul.mubr.msk.f32.vlgmr.msra.gmra.mxu0 %vm963_vm4, %v11224_v20  ;;  %v6897_v24 = vpop.permute.xlu0 %6896 }
0x2a19   : > { %9549 = vmatmul.mubr.msk.f32.vlgmr.msra.gmra.mxu1 %vm963_vm4, %v6730_v23  ;;  %9543 = vmatprep.mubr.msk.f32.mxu0 %vm9975_vm3, %v9974_v1 }
0x2a1a   : > { %9558 = vmatprep.mubr.msk.f32.mxu1 %vm9975_vm3, %v9974_v1 }
0x2a1c   : > { %v6899_v14 = vpop.permute.xlu1 %6898  ;;  %v7064_v25 = vpop.permute.xlu0 %7063 }
0x2a1d   : > { %9557 = vmatpush3.xpose.msk.msra.mxu1 %vm963_vm4, %v6899_v14 }
0x2a1e   : > { %9566 = vmatprep.subr.mxu1 %v9974_v1 }
0x2a20   : > { %v7066_v26 = vpop.permute.xlu1 %7065  ;;  %9559 = vmatmul.mubr.msk.f32.vlgmr.msra.gmra.mxu1 %vm963_vm4, %v6897_v24  ;;  %v7417_v28 = vpop.permute.xlu0 %7416 }
0x2a21   : > { %9567 = vmatpush3.xpose.msk.msra.mxu1 %vm963_vm4, %v7066_v26  ;;  %9568 = vmatprep.mubr.msk.f32.mxu1 %vm9975_vm3, %v9974_v1 }
0x2a22   : > { %9576 = vmatprep.subr.mxu1 %v9974_v1 }
0x2a24   : > { %9569 = vmatmul.mubr.msk.f32.vlgmr.msra.gmra.mxu1 %vm963_vm4, %v7064_v25  ;;  %v7250_v15 = vpop.permute.xlu1 %7249  ;;  %v7584_v30 = vpop.permute.xlu0 %7583 }
0x2a25   : > { %9577 = vmatpush3.xpose.msk.msra.mxu1 %vm963_vm4, %v7250_v15  ;;  %9578 = vmatprep.mubr.msk.f32.mxu1 %vm9975_vm3, %v9974_v1 }
0x2a26   : > { %9586 = vmatprep.subr.mxu1 %v9974_v1 }
0x2a28   : > { %9579 = vmatmul.mubr.msk.f32.vlgmr.msra.gmra.mxu1 %vm963_vm4, %v11240_v62  ;;  %v7415_v29 = vpop.permute.xlu1 %7414  ;;  %v7751_v33 = vpop.permute.xlu0 %7750 }
0x2a29   : > { %9587 = vmatpush3.xpose.msk.msra.mxu1 %vm963_vm4, %v7417_v28  ;;  %9588 = vmatprep.mubr.msk.f32.mxu1 %vm9975_vm3, %v9974_v1 }
0x2a2a   : > { %9596 = vmatprep.subr.mxu1 %v9974_v1 }
0x2a2c   : > { %9589 = vmatmul.mubr.msk.f32.vlgmr.msra.gmra.mxu1 %vm963_vm4, %v7415_v29  ;;  %v7582_v32 = vpop.permute.xlu1 %7581 }
0x2a2d   : > { %9597 = vmatpush3.xpose.msk.msra.mxu1 %vm963_vm4, %v7584_v30  ;;  %9598 = vmatprep.mubr.msk.f32.mxu1 %vm9975_vm3, %v9974_v1 }
0x2a2e   : > { %9606 = vmatprep.subr.mxu1 %v9974_v1 }
0x2a30   : > { %9599 = vmatmul.mubr.msk.f32.vlgmr.msra.gmra.mxu1 %vm963_vm4, %v7582_v32  ;;  %v7749_v31 = vpop.permute.xlu1 %7748 }
0x2a31   : > { %9607 = vmatpush3.xpose.msk.msra.mxu1 %vm963_vm4, %v7751_v33  ;;  %9608 = vmatprep.mubr.msk.f32.mxu1 %vm9975_vm3, %v9974_v1 }
0x2a34   : > { %9609 = vmatmul.mubr.msk.f32.vlgmr.msra.gmra.mxu1 %vm963_vm4, %v7749_v31 }
0x2ad8   : > { %v6636_v38 = vpop.f32.mrf.mxu0 }
0x2ad9   : > { %v6640_v40 = vmul.f32 0.35355338, %v6636_v38  ;;  %v6803_v41 = vpop.f32.mrf.mxu1 }
0x2ada   : > { %v6807_v42 = vmul.f32 0.35355338, %v6803_v41  ;;  %v9540_v44 = vpop.f32.mrf.mxu0 }
0x2adb   : > { %v9550_v45 = vpop.f32.mrf.mxu1  ;;  %v6641_v8 = vsel %vm1039_vm5, %v6640_v40, -inf }
0x2adc   : > { %6642 = vmax.xlane.f32.xlu0 %v6641_v8  ;;  %v6808_v10 = vsel %vm1039_vm5, %v6807_v42, -inf }
0x2add   : > { %6809 = vmax.xlane.f32.xlu1 %v6808_v10 }
0x2ae0   : > { %v6970_v48 = vpop.f32.mrf.mxu1 }
0x2ae1   : > { %v11299_v49 = vmul.f32 0.35355338, %v6970_v48 }
0x2ae2   : > { %v9560_v43 = vpop.f32.mrf.mxu1 }
0x2ae3   : > { %v6975_v50 = vsel %vm1039_vm5, %v11299_v49, -inf }
0x2ae4   : > { %v7137_v35 = vpop.f32.mrf.mxu1  ;;  %6976 = vmax.xlane.f32.xlu0 %v6975_v50 }
0x2ae5   : > { %v7141_v51 = vmul.f32 0.35355338, %v7137_v35 }
0x2ae6   : > { %v9570_v27 = vpop.f32.mrf.mxu1 }
0x2ae7   : > { %v7142_v53 = vsel %vm1039_vm5, %v7141_v51, -inf }
0x2ae8   : > { %7143 = vmax.xlane.f32.xlu0 %v7142_v53  ;;  %v7321_v37 = vpop.f32.mrf.mxu1 }
0x2ae9   : > { %v7325_v55 = vmul.f32 0.35355338, %v7321_v37 }
0x2aea   : > { %v9580_v56 = vpop.f32.mrf.mxu1 }
0x2aeb   : > { %v7326_v34 = vsel %vm1039_vm5, %v7325_v55, -inf }
0x2aec   : > { %7327 = vmax.xlane.f32.xlu0 %v7326_v34  ;;  %v7488_v57 = vpop.f32.mrf.mxu1 }
0x2aed   : > { %v7492_v59 = vmul.f32 0.35355338, %v7488_v57 }
0x2aee   : > { %v9590_v60 = vpop.f32.mrf.mxu1 }
0x2aef   : > { %v7493_v61 = vsel %vm1039_vm5, %v7492_v59, -inf }
0x2af0   : > { %7494 = vmax.xlane.f32.xlu1 %v7493_v61  ;;  %v7655_v0 = vpop.f32.mrf.mxu1 }
0x2af1   : > { %v7659_v2 = vmul.f32 0.35355338, %v7655_v0 }
0x2af2   : > { %v9600_v3 = vpop.f32.mrf.mxu1 }
0x2af3   : > { %v7660_v4 = vsel %vm1039_vm5, %v7659_v2, -inf }
0x2af4   : > { %7661 = vmax.xlane.f32.xlu0 %v7660_v4  ;;  %v7822_v52 = vpop.f32.mrf.mxu1 }
0x2af5   : > { %v7826_v6 = vmul.f32 0.35355338, %v7822_v52 }
0x2af6   : > { %v9610_v5 = vpop.f32.mrf.mxu1 }
0x2af7   : > { %v7827_v7 = vsel %vm1039_vm5, %v7826_v6, -inf }
0x2b01   : > { %6652 = vrot.lane.b32.xlu1 %v11224_v20, %s11696_s24 }
0x2b25   : > { %7828 = vmax.xlane.f32.xlu1 %v7827_v7 }
0x2b36   : > { %6986 = vrot.lane.b32.xlu1 %v11224_v20, %s11703_s25 }
0x2b3a   : > { %7153 = vrot.lane.b32.xlu1 %v11224_v20, %s11702_s29 }
0x2b3e   : > { %7337 = vrot.lane.b32.xlu1 %v11240_v62, %s11696_s24 }
0x2b65   : > { %v6643_v54 = vpop.xlane.xlu0 %6642 }
0x2b66   : > { %v6644_v9 = vsub.f32 %v6640_v40, %v6643_v54  ;;  %v6810_v11 = vpop.xlane.xlu1 %6809 }
0x2b67   : > { %v6811_v12 = vsub.f32 %v6807_v42, %v6810_v11 }
0x2b68   : > { %v6645_v13 = vmul.f32 1.442695, %v6644_v9 }
0x2b69   : > { %v6812_v39 = vmul.f32 1.442695, %v6811_v12 }
0x2b6a   : > { %9870 = vpow2.f32 %v6645_v13 }
0x2b6b   : > { %9872 = vpow2.f32 %v6812_v39 }
0x2b6d   : > { %v6977_v17 = vpop.xlane.xlu0 %6976 }
0x2b6e   : > { %v6978_v25 = vsub.f32 %v11299_v49, %v6977_v17 }
0x2b70   : > { %v6979_v28 = vmul.f32 1.442695, %v6978_v25  ;;  %v8837_v25 = vld [vmem:[%s11704_s7 + $0x78] sm:$0xff] }
0x2b71   : > { %v7144_v18 = vpop.xlane.xlu0 %7143  ;;  %9616 = vmatprep.subr.mxu1 %v8837_v25 }
0x2b72   : > { %v7145_v58 = vsub.f32 %v7141_v51, %v7144_v18  ;;  %9617 = vmatpush3.msra.mxu1 %v8837_v25 }
0x2b74   : > { %v7146_v19 = vmul.f32 1.442695, %v7145_v58 }
0x2b75   : > { %v7328_v26 = vpop.xlane.xlu0 %7327 }
0x2b76   : > { %9874 = vpow2.f32 %v7146_v19  ;;  %v7329_v15 = vsub.f32 %v7325_v55, %v7328_v26 }
0x2b77   : > { %v9871_v16 = vpop.eup %9870  ;;  %9876 = vpow2.f32 %v6979_v28 }
0x2b78   : > { %v11316_v46 = vpop.eup %9872  ;;  %v6647_v63 = vsel %vm1039_vm5, %v9871_v16, 0.0  ;;  %v7330_v30 = vmul.f32 1.442695, %v7329_v15  ;;  %v8836_v15 = vld [vmem:[%s11704_s7 + $0x70] sm:$0xff] }
0x2b79   : > { %6648 = vadd.xlane.f32.xlu0 %v6647_v63  ;;  %v7495_v21 = vpop.xlane.xlu1 %7494  ;;  %v6814_v22 = vsel %vm1039_vm5, %v11316_v46, 0.0  ;;  %9618 = vmatprep.subr.mxu1 %v8836_v15 }
0x2b7a   : > { %6815 = vadd.xlane.f32.xlu1 %v6814_v22  ;;  %9878 = vpow2.f32 %v7330_v30  ;;  %v7496_v33 = vsub.f32 %v7492_v59, %v7495_v21  ;;  %9619 = vmatpush3.msra.mxu1 %v8836_v15  ;;  %v8861_v15 = vld [vmem:[%s11594_s13 + $0xf8] sm:$0xff] }
0x2b7c   : > { %v7497_v38 = vmul.f32 1.442695, %v7496_v33  ;;  %v8834_v33 = vld [vmem:[%s11704_s7 + $0x60] sm:$0xff] }
0x2b7d   : > { %v6653_v23 = vpop.permute.xlu1 %6652  ;;  %v7662_v29 = vpop.xlane.xlu0 %7661 }
0x2b7e   : > { %9542 = vmatpush3.msk.msra.mxu0 %vm1057_vm6, %v6653_v23  ;;  %v7663_v32 = vsub.f32 %v7659_v2, %v7662_v29  ;;  %v8835_v29 = vld [vmem:[%s11704_s7 + $0x68] sm:$0xff] }
0x2b7f   : > { %9551 = vmatprep.subr.mxu0 %v9974_v1  ;;  %9620 = vmatprep.subr.mxu1 %v8835_v29 }
0x2b80   : > { %v7664_v31 = vmul.f32 1.442695, %v7663_v32  ;;  %9621 = vmatpush3.msra.mxu1 %v8835_v29  ;;  %v8860_v29 = vld [vmem:[%s11594_s13 + $0xf0] sm:$0xff] }
0x2b81   : > { %9622 = vmatprep.subr.mxu1 %v8834_v33 }
0x2b82   : > { %9880 = vpow2.f32 %v7664_v31  ;;  %9623 = vmatpush3.msra.mxu1 %v8834_v33  ;;  %v8857_v33 = vld [vmem:[%s11594_s13 + $0xd8] sm:$0xff] }
0x2b83   : > { %v11323_v24 = vpop.eup %9874  ;;  %9882 = vpow2.f32 %v7497_v38  ;;  %9638 = vmatprep.subr.mxu1 %v8861_v15 }
0x2b84   : > { %v7148_v14 = vsel %vm1039_vm5, %v11323_v24, 0.0  ;;  %v9877_v40 = vpop.eup %9876 }
0x2b85   : > { %7149 = vadd.xlane.f32.xlu1 %v7148_v14 }
0x2b87   : > { %v11333_v41 = vpop.eup %9878 }
0x2b88   : > { %v7332_v8 = vsel %vm1039_vm5, %v11333_v41, 0.0 }
0x2b8f   : > { %6819 = vrot.lane.b32.xlu0 %v11224_v20, %s11712_s4  ;;  %v6981_v20 = vsel %vm1039_vm5, %v9877_v40, 0.0  ;;  %v11337_v10 = vpop.eup %9880 }
0x2b90   : > { %v7666_v48 = vsel %vm1039_vm5, %v11337_v10, 0.0  ;;  %v9883_v49 = vpop.eup %9882 }
0x2b91   : > { %v7499_v43 = vsel %vm1039_vm5, %v9883_v49, 0.0 }
0x2b96   : > { %7504 = vrot.lane.b32.xlu1 %v11240_v62, %s11712_s4  ;;  %s11723_s4 = sld [smem:[#allocation9_spill]] }
0x2bae   : > { %6982 = vadd.xlane.f32.xlu0 %v6981_v20  ;;  %v7829_v42 = vpop.xlane.xlu1 %7828 }
0x2baf   : > { %v7830_v44 = vsub.f32 %v7826_v6, %v7829_v42 }
0x2bb1   : > { %v7831_v45 = vmul.f32 1.442695, %v7830_v44 }
0x2bb2   : > { %7333 = vadd.xlane.f32.xlu0 %v7332_v8  ;;  %v6987_v51 = vpop.permute.xlu1 %6986 }
0x2bb3   : > { %9884 = vpow2.f32 %v7831_v45 }
0x2bb6   : > { %7667 = vadd.xlane.f32.xlu0 %v7666_v48  ;;  %v7154_v27 = vpop.permute.xlu1 %7153 }
0x2bba   : > { %7500 = vadd.xlane.f32.xlu1 %v7499_v43  ;;  %v7338_v53 = vpop.permute.xlu1 %7337 }
0x2bc0   : > { %v11342_v50 = vpop.eup %9884 }
0x2bc1   : > { %v7833_v35 = vsel %vm1039_vm5, %v11342_v50, 0.0 }
0x2bc2   : > { %7834 = vadd.xlane.f32.xlu0 %v7833_v35 }
0x2bcb   : > { %7838 = vrot.lane.b32.xlu1 %v11240_v62, %s11702_s29  ;;  %s11721_s29 = sld [smem:[#allocation29_spill]] }
0x2bd8   : > { %7671 = vrot.lane.b32.xlu0 %v11240_v62, %s11703_s25  ;;  %s11726_s25 = sld [smem:[#allocation28_spill]] }
0x2c02   : > { %v6649_v37 = vpop.xlane.xlu0 %6648 }
0x2c03   : > { %9886 = vrcp.f32 %v6649_v37  ;;  %v6816_v55 = vpop.xlane.xlu1 %6815 }
0x2c04   : > { %9888 = vrcp.f32 %v6816_v55 }
0x2c06   : > { %v6820_v59 = vpop.permute.xlu0 %6819 }
0x2c0e   : > { %v7150_v60 = vpop.xlane.xlu1 %7149 }
0x2c10   : > { %v9887_v56 = vpop.eup %9886 }
0x2c11   : > { %v6651_v34 = vmul.f32 %v9887_v56, %v9871_v16  ;;  %v9889_v57 = vpop.eup %9888  ;;  %v8841_v56 = vld [vmem:[%s11717_s15 + $0x3] ss:$0 sm:$0xff]  ;;  %s703_s15 = scalar_lea.vmem [#allocation2], %s8585_s6 }
0x2c12   : > { %v6818_v62 = vmul.f32 %v9889_v57, %v11316_v46  ;;  %v7505_v2 = vpop.permute.xlu1 %7504  ;;  %s8522_s16 = sshll.u32 %s703_s15, 4  ;;  %s8523_s16 = int_to_ptr.vmem [resolvable:$true] %s8522_s16 }
0x2c13   : > { %9544 = vmatmul.mubr.msk.f32.vlgmr.msra.gmra.mxu0 %vm1053_vm7, %v6651_v34  ;;  %s9912_s19 = scalar_lea.vmem %s8523_s16, 32 }
0x2c14   : > { %9552 = vmatpush3.msk.msra.mxu0 %vm1057_vm6, %v6820_v59  ;;  %9553 = vmatprep.mubr.msk.f32.mxu0 %vm9975_vm3, %v9974_v1  ;;  %p9913_p11 = scmp.ne.s32.totalorder %s8523_s16, %s9912_s19 }
0x2c15   : > { %9561 = vmatprep.subr.mxu0 %v9974_v1 }
0x2c16   : > { %p9914_p12 = pnand %p9913_p11, %p10149_p5 }
0x2c17   : > { %9554 = vmatmul.mubr.msk.f32.vlgmr.msra.gmra.mxu0 %vm1053_vm7, %v6818_v62 }
0x2c18   : > { %9562 = vmatpush3.msk.msra.mxu0 %vm1057_vm6, %v6987_v51  ;;  %9563 = vmatprep.mubr.msk.f32.mxu0 %vm9975_vm3, %v9974_v1  ;;  %p9915_p13 = pneg %p9914_p12 }
0x2c19   : > { %9571 = vmatprep.subr.mxu0 %v9974_v1 }
0x2c37   : > { %v6983_v61 = vpop.xlane.xlu0 %6982 }
0x2c38   : > { %9890 = vrcp.f32 %v6983_v61 }
0x2c39   : > { %9892 = vrcp.f32 %v7150_v60 }
0x2c3b   : > { %v7334_v0 = vpop.xlane.xlu0 %7333 }
0x2c3c   : > { %9894 = vrcp.f32 %v7334_v0 }
0x2c3f   : > { %v7668_v3 = vpop.xlane.xlu0 %7667 }
0x2c43   : > { %v7501_v4 = vpop.xlane.xlu1 %7500 }
0x2c44   : > { %9896 = vrcp.f32 %v7501_v4 }
0x2c45   : > { %v9891_v52 = vpop.eup %9890  ;;  %9898 = vrcp.f32 %v7668_v3 }
0x2c46   : > { %v6985_v5 = vmul.f32 %v9891_v52, %v9877_v40  ;;  %v9893_v6 = vpop.eup %9892 }
0x2c47   : > { %v7152_v7 = vmul.f32 %v9893_v6, %v11323_v24  ;;  %v7839_v58 = vpop.permute.xlu1 %7838 }
0x2c48   : > { %9564 = vmatmul.mubr.msk.f32.vlgmr.msra.gmra.mxu0 %vm1053_vm7, %v6985_v5 }
0x2c49   : > { %9572 = vmatpush3.msk.msra.mxu0 %vm1057_vm6, %v7154_v27  ;;  %9573 = vmatprep.mubr.msk.f32.mxu0 %vm9975_vm3, %v9974_v1  ;;  %v9895_v54 = vpop.eup %9894 }
0x2c4a   : > { %9581 = vmatprep.subr.mxu0 %v9974_v1  ;;  %v7336_v11 = vmul.f32 %v9895_v54, %v11333_v41 }
0x2c4b   : > { %v7835_v9 = vpop.xlane.xlu0 %7834 }
0x2c4c   : > { %9900 = vrcp.f32 %v7835_v9  ;;  %9574 = vmatmul.mubr.msk.f32.vlgmr.msra.gmra.mxu0 %vm1053_vm7, %v7152_v7  ;;  %v8849_v9 = vld [vmem:[%s11592_s11 + $0x78] sm:$0xff] }
0x2c4d   : > { %9582 = vmatpush3.msk.msra.mxu0 %vm1057_vm6, %v7338_v53  ;;  %9583 = vmatprep.mubr.msk.f32.mxu0 %vm9975_vm3, %v9974_v1 }
0x2c4e   : > { %9591 = vmatprep.subr.mxu0 %v9974_v1 }
0x2c4f   : > { %v7672_v17 = vpop.permute.xlu0 %7671 }
0x2c50   : > { %9584 = vmatmul.mubr.msk.f32.vlgmr.msra.gmra.mxu0 %vm1053_vm7, %v7336_v11  ;;  %v8848_v11 = vld [vmem:[%s11592_s11 + $0x70] sm:$0xff] }
0x2c51   : > { %v9897_v12 = vpop.eup %9896  ;;  %9592 = vmatpush3.msk.msra.mxu0 %vm1057_vm6, %v7505_v2  ;;  %9593 = vmatprep.mubr.msk.f32.mxu0 %vm9975_vm3, %v9974_v1 }
0x2c52   : > { %9601 = vmatprep.subr.mxu0 %v9974_v1  ;;  %v7503_v13 = vmul.f32 %v9897_v12, %v9883_v49  ;;  %v9899_v39 = vpop.eup %9898  ;;  %v8847_v12 = vld [vmem:[%s11592_s11 + $0x68] sm:$0xff] }
0x2c53   : > { %v7670_v18 = vmul.f32 %v9899_v39, %v11337_v10 }
0x2c54   : > { %9594 = vmatmul.mubr.msk.f32.vlgmr.msra.gmra.mxu0 %vm1053_vm7, %v7503_v13  ;;  %v8846_v13 = vld [vmem:[%s11592_s11 + $0x60] sm:$0xff] }
0x2c55   : > { %9602 = vmatpush3.msk.msra.mxu0 %vm1057_vm6, %v7672_v17  ;;  %9603 = vmatprep.mubr.msk.f32.mxu0 %vm9975_vm3, %v9974_v1 }
0x2c56   : > { %9611 = vmatprep.subr.mxu0 %v9974_v1 }
0x2c58   : > { %9604 = vmatmul.mubr.msk.f32.vlgmr.msra.gmra.mxu0 %vm1053_vm7, %v7670_v18 }
0x2c59   : > { %v9901_v19 = vpop.eup %9900  ;;  %9612 = vmatpush3.msk.msra.mxu0 %vm1057_vm6, %v7839_v58  ;;  %9613 = vmatprep.mubr.msk.f32.mxu0 %vm9975_vm3, %v9974_v1 }
0x2c5a   : > { %v7837_v16 = vmul.f32 %v9901_v19, %v11342_v50  ;;  %9627 = vmatprep.subr.mxu0 %v8849_v9 }
0x2c5c   : > { %9614 = vmatmul.mubr.msk.f32.vlgmr.msra.gmra.mxu0 %vm1053_vm7, %v7837_v16 }
0x2c5d   : > { %9628 = vmatpush3.msra.mxu0 %v8849_v9  ;;  %v8325_v9 = vld [vmem:[%s11718_s20 + $0x18] sm:$0xff] }
0x2c5e   : > { %9629 = vmatprep.subr.mxu0 %v8848_v11 }
0x2c5f   : > { %9630 = vmatpush3.msra.mxu0 %v8848_v11  ;;  %v8324_v11 = vld [vmem:[%s11718_s20 + $0x10] sm:$0xff] }
0x2c60   : > { %9631 = vmatprep.subr.mxu0 %v8847_v12 }
0x2c61   : > { %9632 = vmatpush3.msra.mxu0 %v8847_v12  ;;  %v8322_v12 = vld [vmem:[%s11718_s20] sm:$0xff] }
0x2c62   : > { %9633 = vmatprep.subr.mxu0 %v8846_v13 }
0x2c63   : > { %9634 = vmatpush3.msra.mxu0 %v8846_v13 }
0x2c64   : > { %9657 = vmatprep.subr.mxu0 %v9974_v1 }
0x2cd3   : > { %v6725_v46 = vpop.f32.mrf.mxu0 }
0x2cd5   : > { %v9545_v63 = vpop.f32.mrf.mxu0 }
0x2cd6   : > { %v8844_v63 = vld [vmem:[%s11590_s9 + $0x3] ss:$0 sm:$0xff] }
0x2cd7   : > { %v6892_v21 = vpop.f32.mrf.mxu0 }
0x2cd8   : > { %7231 = vrot.lane.b32.xlu0 %v6892_v21, %s11705_s22 }
0x2cd9   : > { %v9555_v22 = vpop.f32.mrf.mxu0 }
0x2cda   : > { %v8845_v22 = vld [vmem:[%s11591_s10 + $0x3] ss:$0 sm:$0xff] }
0x2d08   : > { %v7059_v23 = vpop.f32.mrf.mxu0 }
0x2d0a   : > { %v9565_v24 = vpop.f32.mrf.mxu0 }
0x2d0c   : > { %v7226_v14 = vpop.f32.mrf.mxu0 }
0x2d0e   : > { %v9575_v26 = vpop.f32.mrf.mxu0 }
0x2d10   : > { %v7410_v28 = vpop.f32.mrf.mxu0 }
0x2d12   : > { %v9585_v30 = vpop.f32.mrf.mxu0 }
0x2d13   : > { %v8859_v30 = vld [vmem:[%s11594_s13 + $0xe8] sm:$0xff] }
0x2d14   : > { %v7577_v32 = vpop.f32.mrf.mxu0 }
0x2d15   : > { %7916 = vrot.lane.b32.xlu0 %v7577_v32, %s11705_s22  ;;  %v8858_v32 = vld [vmem:[%s11594_s13 + $0xe0] sm:$0xff]  ;;  %s8875_s22 = sshll.u32 %s11723_s4, 5  ;;  %s9990_s4 = smov [#allocation2]  }
0x2d16   : > { %v9595_v31 = vpop.f32.mrf.mxu0 }
0x2d17   : > { %v8856_v31 = vld [vmem:[%s11594_s13 + $0xd0] sm:$0xff] }
0x2d18   : > { %v7744_v38 = vpop.f32.mrf.mxu0 }
0x2d19   : > { %7235 = vrot.lane.b32.xlu0 %v7059_v23, %s11715_s21  ;;  %7920 = vrot.lane.b32.xlu1 %v7744_v38, %s11715_s21  ;;  %v8855_v38 = vld [vmem:[%s11594_s13 + $0xc8] sm:$0xff] }
0x2d1a   : > { %v9605_v40 = vpop.f32.mrf.mxu0 }
0x2d1b   : > { %v8854_v40 = vld [vmem:[%s11594_s13 + $0xc0] sm:$0xff] }
0x2d1c   : > { %v7911_v20 = vpop.f32.mrf.mxu0 }
0x2d1d   : > { %7924 = vrot.lane.b32.xlu1 %v7911_v20, %s11716_s18  ;;  %v8851_v20 = vld [vmem:[%s11593_s12 + $0x3] ss:$0 sm:$0xff] }
0x2d1e   : > { %v9615_v41 = vpop.f32.mrf.mxu0 }
0x2d21   : > { %7239 = vrot.lane.b32.xlu1 %v7226_v14, %s11716_s18  ;;  %s11728_s18 = sld [smem:[#allocation30_spill]] }
0x2d4a   : > { %v7232_v42 = vpop.permute.xlu0 %7231 }
0x2d4b   : > { %v7242_v50 = vsel %vm963_vm4, %v6725_v46, %v7232_v42 }
0x2d87   : > { %v7917_v44 = vpop.permute.xlu0 %7916 }
0x2d88   : > { %v7927_v8 = vsel %vm963_vm4, %v7410_v28, %v7917_v44 }
0x2d8b   : > { %v7921_v45 = vpop.permute.xlu1 %7920  ;;  %v7236_v49 = vpop.permute.xlu0 %7235 }
0x2d8c   : > { %v7928_v10 = vsel %vm1644_vm10, %v7927_v8, %v7921_v45  ;;  %v7243_v35 = vsel %vm1644_vm10, %v7242_v50, %v7236_v49 }
0x2d8f   : > { %v7925_v48 = vpop.permute.xlu1 %7924 }
0x2d90   : > { %v7929_v43 = vsel %vm1646_vm9, %v7928_v10, %v7925_v48 }
0x2d91   : > { %v7931_v51 = vrot.slane %v7929_v43, 3 }
0x2d93   : > { %v7240_v27 = vpop.permute.xlu1 %7239 }
0x2d94   : > { %v7244_v53 = vsel %vm1646_vm9, %v7243_v35, %v7240_v27 }
0x2d95   : > { %v7933_v37 = vsel %vm1057_vm6, %v7244_v53, %v7931_v51 }
0x2d96   : > { %9624 = vmatprep.mubr.msk.f32.mxu1 %vm823_vm1, %v7933_v37 }
0x2d97   : > { %9625 = vmatmul.mubr.msk.f32.vlgmr.msra.gmra.mxu1 %vm823_vm1, %v7931_v51 }
0x2d98   : > { %9639 = vmatpush3.msra.mxu1 %v8861_v15  ;;  %v8870_v15 = vld [vmem:[%s11725_s30] ss:$0 sm:$0xff] }
0x2d99   : > { %9640 = vmatprep.subr.mxu1 %v8860_v29 }
0x2d9a   : > { %9641 = vmatpush3.msra.mxu1 %v8860_v29 }
0x2d9b   : > { %9642 = vmatprep.subr.mxu1 %v8859_v30 }
0x2d9c   : > { %9643 = vmatpush3.msra.mxu1 %v8859_v30  ;;  %v8871_v30 = vld [vmem:[%s11726_s25] ss:$0 sm:$0xff] }
0x2d9d   : > { %9644 = vmatprep.subr.mxu1 %v8858_v32 }
0x2d9e   : > { %9645 = vmatpush3.msra.mxu1 %v8858_v32 }
0x2d9f   : > { %9646 = vmatprep.subr.mxu1 %v8857_v33 }
0x2da0   : > { %9647 = vmatpush3.msra.mxu1 %v8857_v33 }
0x2da1   : > { %9648 = vmatprep.subr.mxu1 %v8856_v31 }
0x2da2   : > { %9649 = vmatpush3.msra.mxu1 %v8856_v31 }
0x2da3   : > { %9650 = vmatprep.subr.mxu1 %v8855_v38 }
0x2da4   : > { %9651 = vmatpush3.msra.mxu1 %v8855_v38 }
0x2da5   : > { %9652 = vmatprep.subr.mxu1 %v8854_v40 }
0x2da6   : > { %9653 = vmatpush3.msra.mxu1 %v8854_v40 }
0x2e57   : > { %v9626_v55 = vpop.f32.mrf.mxu1 }
0x2e58   : > { %v8020_v34 = vadd.f32 %v9626_v55, %v11185_v36 }
0x2e59   : > { %v8010_v57 = vpop.f32.mrf.mxu1 }
0x2e5a   : > { %v8030_v59 = vadd.f32 %v8841_v56, %v8020_v34  ;;  %v8019_v62 = vadd.f32 %v8010_v57, %v11188_v47 }
0x2e5c   : > { %v11422_v60 = vadd.f32 %v8841_v56, %v8019_v62  ;;  %v8038_v61 = vsel %vm827_vm2, %v8030_v59, 0.0 }
0x2e5d   : > { %8039 = vadd.xlane.f32.xlu1 %v8038_v61 }
0x2e5e   : > { %v8035_v0 = vsel %vm823_vm1, %v11422_v60, 0.0 }
0x2e5f   : > { %8036 = vadd.xlane.f32.xlu0 %v8035_v0 }
0x2ee6   : > { %v8040_v2 = vpop.xlane.xlu1 %8039 }
0x2ee7   : > { %v8042_v3 = vmul.f32 0.03125, %v8040_v2 }
0x2ee8   : > { %v8037_v4 = vpop.xlane.xlu0 %8036 }
0x2ee9   : > { %v8041_v52 = vmul.f32 0.03125, %v8037_v4  ;;  %v8044_v5 = vsub.f32 %v8030_v59, %v8042_v3  ;;  %v8865_v3 = vld [vmem:[%s11595_s14 + $0x3] ss:$0 sm:$0xff] }
0x2eeb   : > { %v8043_v36 = vsub.f32 %v11422_v60, %v8041_v52  ;;  %v8046_v47 = vmul.f32 %v8044_v5, %v8044_v5 }
0x2eed   : > { %v8045_v6 = vmul.f32 %v8043_v36, %v8043_v36  ;;  %v8050_v54 = vsel %vm827_vm2, %v8046_v47, 0.0 }
0x2eef   : > { %v8047_v7 = vsel %vm823_vm1, %v8045_v6, 0.0 }
0x2ef0   : > { %8048 = vadd.xlane.f32.xlu0 %v8047_v7 }
0x2ef4   : > { %8051 = vadd.xlane.f32.xlu0 %v8050_v54 }
0x2f79   : > { %v8049_v39 = vpop.xlane.xlu0 %8048 }
0x2f7a   : > { %v8053_v17 = vmul.f32 0.03125, %v8049_v39 }
0x2f7c   : > { %v8055_v18 = vadd.f32 1e-06, %v8053_v17 }
0x2f7d   : > { %v8052_v58 = vpop.xlane.xlu0 %8051 }
0x2f7e   : > { %9902 = vrsqrt.f32 %v8055_v18  ;;  %v8054_v19 = vmul.f32 0.03125, %v8052_v58  ;;  %v8866_v58 = vld [vmem:[%s11719_s17] ss:$0 sm:$0xff]  ;;  %s11729_s17 = sld [smem:[#allocation31_spill]] }
0x2f80   : > { %v8056_v16 = vadd.f32 1e-06, %v8054_v19 }
0x2f82   : > { %9904 = vrsqrt.f32 %v8056_v16  ;;  %v8867_v16 = vld [vmem:[%s11720_s5] ss:$0 sm:$0xff]  ;;  %s9916_s5 = sshll.u32 %s9990_s4, 4  ;;  %s9917_s5 = int_to_ptr.vmem [resolvable:$false] %s9916_s5 }
0x2f83   : > { %s9918_s25 = scalar_lea.vmem %s9917_s5, 64  ;;  %p9919_p0 = scmp.lt.s32.totalorder %s8523_s16, %s9917_s5 }
0x2f84   : > { %s11546_s30 = scalar_lea.hbm %s11729_s17, %s8875_s22  ;;  %p9920_p1 = scmp.lt.s32.totalorder %s9918_s25, %s9912_s19 }
0x2f86   : > { %p9921_p2 = por %p9920_p1, %p9919_p0 }
0x2f88   : > { %p9922_p3 = pnand %p9921_p2, %p9915_p13 }
0x2f8b   : > { %v9903_v46 = vpop.eup %9902 }
0x2f8c   : > { %v8059_v21 = vmul.f32 %v9903_v46, %v8043_v36 }
0x2f8e   : > { %v8067_v23 = vmul.f32 %v8844_v63, %v8059_v21 }
0x2f8f   : > { %v9905_v24 = vpop.eup %9904 }
0x2f90   : > { %v8060_v14 = vmul.f32 %v9905_v24, %v8044_v5  ;;  %v8075_v25 = vadd.f32 %v8845_v22, %v8067_v23  ;;  %v8425_v23 = vld [vmem:[%s11721_s29 + $0x18] sm:$0xff]  ;;  %v8424_v24 = vld [vmem:[%s11721_s29 + $0x10] sm:$0xff] }
0x2f92   : > { %v8068_v26 = vmul.f32 %v8844_v63, %v8060_v14  ;;  %9635 = vmatprep.mubr.msk.f32.mxu0 %vm823_vm1, %v8075_v25  ;;  %v8423_v14 = vld [vmem:[%s11721_s29 + $0x8] sm:$0xff]  ;;  %v8422_v25 = vld [vmem:[%s11721_s29] sm:$0xff] }
0x2f94   : > { %v8076_v28 = vadd.f32 %v8845_v22, %v8068_v26  ;;  %v8868_v26 = vld [vmem:[%s11724_s23] ss:$0 sm:$0xff] }
0x2f96   : > { %9636 = vmatmul.mubr.msk.f32.vlgmr.msra.gmra.mxu0 %vm823_vm1, %v8076_v28 }
0x2f97   : > { %9665 = vmatprep.mubr.msk.f32.mxu0 %vm9975_vm3, %v9974_v1  ;;  %9658 = vmatpush3.msra.mxu0 %v8325_v9 }
0x2f98   : > { %9659 = vmatprep.subr.mxu0 %v9974_v1 }
0x2f99   : > { %9660 = vmatpush3.msra.mxu0 %v8324_v11 }
0x2f9a   : > { %9661 = vmatprep.subr.mxu0 %v9974_v1 }
0x3056   : > { %v9637_v41 = vpop.f32.mrf.mxu0 }
0x3057   : > { %v8168_v42 = vadd.f32 %v9637_v41, %v8851_v20 }
0x3058   : > { %v8162_v44 = vpop.f32.mrf.mxu0 }
0x3059   : > { %v8172_v45 = vmul.f32 %v8168_v42, %v8168_v42  ;;  %v8163_v8 = vadd.f32 %v8851_v20, %v8162_v44 }
0x305b   : > { %v8174_v10 = vmul.f32 %v8172_v45, %v8168_v42  ;;  %v8171_v48 = vmul.f32 %v8163_v8, %v8163_v8 }
0x305d   : > { %v8176_v49 = vmul.f32 0.044715, %v8174_v10  ;;  %v8173_v43 = vmul.f32 %v8171_v48, %v8163_v8 }
0x305f   : > { %v8178_v50 = vadd.f32 %v8176_v49, %v8168_v42  ;;  %v8175_v35 = vmul.f32 0.044715, %v8173_v43 }
0x3061   : > { %v8180_v51 = vmul.f32 0.7978846, %v8178_v50  ;;  %v8177_v27 = vadd.f32 %v8175_v35, %v8163_v8 }
0x3063   : > { %9906 = vtanh.f32 %v8180_v51  ;;  %v8179_v53 = vmul.f32 0.7978846, %v8177_v27 }
0x3065   : > { %9908 = vtanh.f32 %v8179_v53 }
0x3070   : > { %v9907_v37 = vpop.eup %9906 }
0x3071   : > { %v8184_v55 = vadd.f32 1.0, %v9907_v37 }
0x3072   : > { %v9909_v56 = vpop.eup %9908 }
0x3073   : > { %v8183_v34 = vadd.f32 1.0, %v9909_v56  ;;  %v8186_v57 = vmul.f32 0.5, %v8184_v55 }
0x3075   : > { %v8185_v59 = vmul.f32 0.5, %v8183_v34  ;;  %v8188_v61 = vmul.f32 %v8186_v57, %v8168_v42 }
0x3077   : > { %v8187_v62 = vmul.f32 %v8185_v59, %v8163_v8 }
0x3079   : > { %9654 = vmatprep.mubr.msk.f32.mxu1 %vm739_vm0, %v8187_v62 }
0x307a   : > { %9655 = vmatmul.mubr.msk.f32.vlgmr.msra.gmra.mxu1 %vm739_vm0, %v8188_v61 }
0x313a   : > { %v9656_v0 = vpop.f32.mrf.mxu1 }
0x313c   : > { %v8270_v2 = vpop.f32.mrf.mxu1 }
0x313d   : > { %v8278_v4 = vadd.f32 %v8270_v2, %v11422_v60  ;;  %v8323_v60 = vld [vmem:[%s11718_s20 + $0x8] sm:$0xff] }
0x313e   : > { %9662 = vmatpush3.msra.mxu0 %v8323_v60 }
0x313f   : > { %v8287_v52 = vadd.f32 %v8865_v3, %v8278_v4  ;;  %9663 = vmatprep.subr.mxu0 %v9974_v1 }
0x3140   : > { %9664 = vmatpush3.msra.mxu0 %v8322_v12 }
0x3141   : > { %v8290_v5 = vsel %vm823_vm1, %v8287_v52, 0.0  ;;  %9668 = vmatprep.subr.mxu0 %v9974_v1 }
0x3142   : > { %8291 = vadd.xlane.f32.xlu0 %v8290_v5 }
0x31cb   : > { %v8292_v36 = vpop.xlane.xlu0 %8291 }
0x31cc   : > { %v8293_v6 = vmul.f32 0.03125, %v8292_v36 }
0x31ce   : > { %v8294_v7 = vsub.f32 %v8287_v52, %v8293_v6 }
0x31d0   : > { %v8295_v47 = vmul.f32 %v8294_v7, %v8294_v7 }
0x31d2   : > { %v8296_v54 = vsel %vm823_vm1, %v8295_v47, 0.0 }
0x31d3   : > { %8297 = vadd.xlane.f32.xlu1 %v8296_v54 }
0x325c   : > { %v8298_v13 = vpop.xlane.xlu1 %8297 }
0x325d   : > { %v8299_v39 = vmul.f32 0.03125, %v8298_v13 }
0x325f   : > { %v8300_v17 = vadd.f32 1e-06, %v8299_v39 }
0x3261   : > { %9910 = vrsqrt.f32 %v8300_v17 }
0x326e   : > { %v9911_v18 = vpop.eup %9910 }
0x326f   : > { %v8302_v19 = vmul.f32 %v9911_v18, %v8294_v7 }
0x3271   : > { %v8309_v46 = vmul.f32 %v8866_v58, %v8302_v19 }
0x3273   : > { %v8316_v63 = vadd.f32 %v8867_v16, %v8309_v46 }
0x3275   : > { %v8318_v21 = vrot.slane %v8316_v63, 4 }
0x3277   : > { %v8321_v22 = vsel %vm8320_vm11, %v8316_v63, %v8318_v21 }
0x3278   : > { %9666 = vmatmul.mubr.msk.f32.vlgmr.msra.gmra.mxu0 %vm823_vm1, %v8321_v22 }
0x3279   : > { %9676 = vmatprep.mubr.msk.f32.mxu0 %vm9975_vm3, %v9974_v1  ;;  %9669 = vmatpush3.msra.mxu0 %v8425_v23 }
0x327a   : > { %9670 = vmatprep.subr.mxu0 %v9974_v1 }
0x327b   : > { %9671 = vmatpush3.msra.mxu0 %v8424_v24 }
0x327c   : > { %9672 = vmatprep.subr.mxu0 %v9974_v1 }
0x327d   : > { %9673 = vmatpush3.msra.mxu0 %v8423_v14 }
0x327e   : > { %9674 = vmatprep.subr.mxu0 %v9974_v1  ;;  %v8872_v1 = vld [vmem:[%s11728_s18] ss:$0 sm:$0xff] }
0x327f   : > { %9675 = vmatpush3.msra.mxu0 %v8422_v25 }
0x3338   : > { %v8402_v28 = vpop.f32.mrf.mxu0 }
0x3339   : > { %v8403_v29 = vadd.f32 %v8868_v26, %v8402_v28 }
0x333a   : > { %v9667_v32 = vpop.f32.mrf.mxu0 }
0x333b   : > { %v8413_v33 = vmul.f32 %v8870_v15, %v8403_v29 }
0x333d   : > { %v8421_v31 = vadd.f32 %v8871_v30, %v8413_v33 }
0x333f   : > { %9677 = vmatmul.mubr.msk.f32.vlgmr.msra.gmra.mxu0 %vm823_vm1, %v8421_v31 }
0x33ff   : > { %v8502_v38 = vpop.f32.mrf.mxu0 }
0x3400   : > { %v8503_v40 = vadd.f32 %v8872_v1, %v8502_v38 }
0x3401   : > { %v9678_v20 = vpop.f32.mrf.mxu0 }
0x3402   : > { %8507 = vst.msk [vmem:[%s703_s15] sm:$0x3] %vm8506_vm12, %v8503_v40 }
0x3403   : > { %9925 = shalt.err (!%p9922_p3)
}
0x3404   : > { %s9926_s6 = scalar_lea.hbm %s11546_s30, 32  ;;  %s9930_s21 = scalar_lea.hbm %s11729_s17, 64 }
0x3405   : > { %p9927_p4 = scmp.ne.s32.totalorder %s11546_s30, %s9926_s6  ;;  %p9931_p9 = scmp.lt.s32.totalorder %s11546_s30, %s11729_s17 }
0x3406   : > { %p9932_p10 = scmp.lt.s32.totalorder %s9930_s21, %s9926_s6 }
0x3407   : > { %p9928_p7 = pnand %p9927_p4, %p10149_p5 }
0x3408   : > { %p9933_p11 = por %p9932_p10, %p9931_p9 }
0x3409   : > { %p9929_p8 = pneg %p9928_p7 }
0x340b   : > { %p9934_p12 = pnand %p9933_p11, %p9929_p8 }
0x340d   : > { %9937 = shalt.err (!%p9934_p12)
}
0x340e   : > { %9679 = dma.vmem_to_hbm [thread:$0]  (%p10149_p5), %s8523_s16, 32, %s11546_s30, %s8509_s3  }
0x340f PF: > { %s11730_s15 = sld [smem:[#allocation8_spill]] }
0x3410   : > { %s11731_s23 = sld [smem:[#allocation5_spill]] }
0x3415   : > { %p9685_p13 = scmp.ge.s32.totalorder %s11730_s15, 2 }
0x3416   : > { %s8534_s19 = sand.u32 1, %s11731_s23  }
0x3417   : > { %p9682_p0 = pnand %p9685_p13, %p10153_p6  ;;  %s8535_s4 = scalar_lea.sflag [#allocation3], %s8534_s19 }
0x3419   : > { %p9683_p1 = pneg %p9682_p0 }
0x341b   : > { %9955 = dma.done.wait (%p9683_p1), %s8535_s4, 32  }
0x341c   : > { %9957 = vsyncadd (%p9683_p1), %s8535_s4, 4294967264  ;;  %s11733_s25 = sld [smem:[#allocation10_spill]] }
0x341d   : > { %s11734_s4 = sld [smem:[#allocation6_spill]] }
0x341e   : > { %s11735_s30 = sld [smem:[#allocation7_spill]] }
0x341f   : > { %s11736_s24 = sld [smem:[#allocation11_spill]] }
0x3422   : > { %p33_p2 = scmp.ge.s32.totalorder %s11733_s25, 4  }
0x3424   :  { %35 = sbr.rel (!%p33_p2) target bundleno = 22 (0x16), region = 183 }
0x3429   :  { %8540 = vsyncpa [#allocation3], 1 }
0x342a   :  { %8542 = vsyncpa [#allocation3 + $0x1], 1 }

</bundles_post_ra>
